<compile_context>
chip_gen: v7x
topology: tpu7x:2x2x1
jax: 0.10.0
libtpu: 0.0.40
codegen_flags: <defaults>
</compile_context>

<pallas_src>
import jax
import jax.numpy as jnp
from jax.experimental import pallas as pl
from jax.experimental.pallas import tpu as pltpu

# ---- model hyper-parameters (small, consistent with the module) ----
N = 8               # number of graph nodes
F_IN = 32           # in_channels
HEADS = 4           # num_heads
C_HID = 8           # hidden_channels == out_channels (per head)
HC = HEADS * C_HID  # = 32 == F_IN  -> residual x + input is well defined
L = 3               # num_layers: conv1, 1 middle conv, convN
E = 16              # number of edges in the synthetic graph
NEG_SLOPE = 0.2     # GATConv leaky_relu default


def build_dense_adj(edge_index, num_nodes):
    """adj[i, j] = 1 iff message j -> i exists (plus self loops, PyG default)."""
    src, dst = edge_index[0], edge_index[1]
    adj = jnp.zeros((num_nodes, num_nodes), jnp.float32)
    adj = adj.at[dst, src].set(1.0)
    return jnp.maximum(adj, jnp.eye(num_nodes, dtype=jnp.float32))


def _gat_layer(h, adj, wt, a_src, a_dst, bias):
    """One GATConv, concat=True, eval mode (attention dropout = identity)."""
    # projection (weights pre-transposed wrapper-side): (N, F) @ (F, H*C)
    proj = jnp.dot(h, wt, preferred_element_type=jnp.float32)          # (N, HC)
    p = proj.reshape(N, HEADS, C_HID)                                  # (N, H, C)
    al_src = jnp.sum(p * a_src, axis=-1)                               # (N, H)
    al_dst = jnp.sum(p * a_dst, axis=-1)                               # (N, H)
    # e[i, j, h]: score of message j -> i, per head
    e = al_dst[:, None, :] + al_src[None, :, :]                        # (N, N, H)
    e = jnp.where(e > 0, e, NEG_SLOPE * e)                             # LeakyReLU(0.2)
    m = adj[:, :, None] > 0.0                                          # (N, N, 1)
    e = jnp.where(m, e, -1e30)
    e = e - jnp.max(e, axis=1, keepdims=True)                          # softmax over sources j
    w = jnp.where(m, jnp.exp(e), 0.0)
    denom = jnp.sum(w, axis=1, keepdims=True)                          # (N, 1, H)
    alpha = w * pl.reciprocal(denom, approx=True)                      # EUP reciprocal
    # aggregate: out[i, h, c] = sum_j alpha[i, j, h] * p[j, h, c]
    agg = jnp.sum(alpha[:, :, :, None] * p[None, :, :, :], axis=1)     # (N, H, C)
    return agg.reshape(N, HC) + bias                                   # (N, HC)


def multigat_kernel(x_ref, adj_ref, wt_ref, asrc_ref, adst_ref, bias_ref, out_ref):
    """Single invocation (no grid): whole graph + all stacked layer weights in VMEM."""
    x0 = x_ref[...]
    adj = adj_ref[...]

    # x = relu(conv1(x))
    h = jnp.maximum(
        _gat_layer(x0, adj, wt_ref[0], asrc_ref[0], adst_ref[0], bias_ref[0]), 0.0)

    # x = relu(conv(x + input)) for the middle layers (unrolled, static)
    for l in range(1, L - 1):
        h = jnp.maximum(
            _gat_layer(h + x0, adj, wt_ref[l], asrc_ref[l], adst_ref[l], bias_ref[l]), 0.0)

    # x = convN(x + input); return relu(x + input)
    h = _gat_layer(h + x0, adj, wt_ref[L - 1], asrc_ref[L - 1], adst_ref[L - 1],
                   bias_ref[L - 1])
    out_ref[...] = jnp.maximum(h + x0, 0.0)


def multigat_forward(x, edge_index, params):
    w, a_src, a_dst, b = params
    n = x.shape[0]
    # wrapper-side prep (free at runtime): dense mask + pre-transposed weights
    adj = build_dense_adj(edge_index, n)
    wt = jnp.transpose(w, (0, 2, 1))                  # (L, F_IN, HC): kernel does x @ W
    asrc = a_src.reshape(L, HEADS, C_HID)
    adst = a_dst.reshape(L, HEADS, C_HID)
    bias = b.reshape(L, 1, HC)

    vmem = pl.BlockSpec(memory_space=pltpu.MemorySpace.VMEM)
    return pl.pallas_call(
        multigat_kernel,
        out_shape=jax.ShapeDtypeStruct((n, HC), x.dtype),
        in_specs=[vmem] * 6,
        out_specs=vmem,
    )(x, adj, wt, asrc, adst, bias)


# ---------- deterministic synthetic parameters (PyTorch layout) ----------
def init_params(key):
    ks = jax.random.split(key, 4)
    s = 0.2
    w = s * jax.random.normal(ks[0], (L, HC, F_IN), jnp.float32)       # lin.weight
    a_src = s * jax.random.normal(ks[1], (L, 1, HEADS, C_HID), jnp.float32)
    a_dst = s * jax.random.normal(ks[2], (L, 1, HEADS, C_HID), jnp.float32)
    b = s * jax.random.normal(ks[3], (L, HC), jnp.float32)             # GATConv bias
    return w, a_src, a_dst, b


# ---------- pure-JAX reference (same math, exact division) ----------
def ref_forward(x, edge_index, params):
    w, a_src, a_dst, b = params
    adj = build_dense_adj(edge_index, x.shape[0])

    def layer(h, l):
        proj = h @ w[l].T
        p = proj.reshape(N, HEADS, C_HID)
        als = jnp.sum(p * a_src[l], axis=-1)
        ald = jnp.sum(p * a_dst[l], axis=-1)
        e = ald[:, None, :] + als[None, :, :]
        e = jnp.where(e > 0, e, NEG_SLOPE * e)
        m = adj[:, :, None] > 0.0
        e = jnp.where(m, e, -jnp.inf)
        alpha = jax.nn.softmax(e, axis=1)
        alpha = jnp.where(m, alpha, 0.0)
        agg = jnp.sum(alpha[:, :, :, None] * p[None, :, :, :], axis=1)
        return agg.reshape(N, HC) + b[l]

    h = jax.nn.relu(layer(x, 0))
    for l in range(1, L - 1):
        h = jax.nn.relu(layer(h + x, l))
    h = layer(h + x, L - 1)
    return jax.nn.relu(h + x)


if __name__ == "__main__":
    key = jax.random.PRNGKey(0)
    kx, ke1, ke2, kp = jax.random.split(key, 4)
    x = jax.random.normal(kx, (N, F_IN), jnp.float32)
    src = jax.random.randint(ke1, (E,), 0, N)
    dst = jax.random.randint(ke2, (E,), 0, N)
    edge_index = jnp.stack([src, dst]).astype(jnp.int32)
    params = init_params(kp)

    out = jax.block_until_ready(multigat_forward(x, edge_index, params))
    ref = jax.block_until_ready(ref_forward(x, edge_index, params))

    assert out.shape == (N, HC)
    # tolerance covers pl.reciprocal(approx=True) in the softmax denominator
    assert jnp.allclose(out, ref, rtol=5e-3, atol=5e-3), "mismatch vs reference"
    print("KERNEL_OK")
</pallas_src>

<mosaic_0001>
module attributes {stable_mosaic.version = 11 : i64} {
  func.func @multigat_kernel(%arg0: memref<8x32xf32, #tpu.memory_space<vmem>>, %arg1: memref<8x8xf32, #tpu.memory_space<vmem>>, %arg2: memref<3x32x32xf32, #tpu.memory_space<vmem>>, %arg3: memref<3x4x8xf32, #tpu.memory_space<vmem>>, %arg4: memref<3x4x8xf32, #tpu.memory_space<vmem>>, %arg5: memref<3x1x32xf32, #tpu.memory_space<vmem>>, %arg6: memref<8x32xf32, #tpu.memory_space<vmem>>) attributes {dimension_semantics = [], scalar_prefetch = 0 : i64, scratch_operands = 0 : i64, tpu.core_type = #tpu.core_type<tc>} {
    %c0 = arith.constant 0 : index
    %c0_0 = arith.constant 0 : index
    %0 = vector.load %arg0[%c0, %c0_0] : memref<8x32xf32, #tpu.memory_space<vmem>>, vector<8x32xf32>
    %c0_1 = arith.constant 0 : index
    %c0_2 = arith.constant 0 : index
    %1 = vector.load %arg1[%c0_1, %c0_2] : memref<8x8xf32, #tpu.memory_space<vmem>>, vector<8x8xf32>
    %c0_3 = arith.constant 0 : index
    %c0_4 = arith.constant 0 : index
    %c0_5 = arith.constant 0 : index
    %2 = vector.load %arg2[%c0_3, %c0_4, %c0_5] : memref<3x32x32xf32, #tpu.memory_space<vmem>>, vector<1x32x32xf32>
    %3 = vector.shape_cast %2 : vector<1x32x32xf32> to vector<32x32xf32>
    %c0_6 = arith.constant 0 : index
    %c0_7 = arith.constant 0 : index
    %c0_8 = arith.constant 0 : index
    %4 = vector.load %arg3[%c0_6, %c0_7, %c0_8] : memref<3x4x8xf32, #tpu.memory_space<vmem>>, vector<1x4x8xf32>
    %5 = vector.shape_cast %4 : vector<1x4x8xf32> to vector<4x8xf32>
    %c0_9 = arith.constant 0 : index
    %c0_10 = arith.constant 0 : index
    %c0_11 = arith.constant 0 : index
    %6 = vector.load %arg4[%c0_9, %c0_10, %c0_11] : memref<3x4x8xf32, #tpu.memory_space<vmem>>, vector<1x4x8xf32>
    %7 = vector.shape_cast %6 : vector<1x4x8xf32> to vector<4x8xf32>
    %c0_12 = arith.constant 0 : index
    %c0_13 = arith.constant 0 : index
    %c0_14 = arith.constant 0 : index
    %8 = vector.load %arg5[%c0_12, %c0_13, %c0_14] : memref<3x1x32xf32, #tpu.memory_space<vmem>>, vector<1x1x32xf32>
    %9 = vector.shape_cast %8 : vector<1x1x32xf32> to vector<1x32xf32>
    %cst = arith.constant dense<0.000000e+00> : vector<8x32xf32>
    %10 = tpu.matmul %0, %3, %cst {dimension_numbers = #tpu.dot_dimension_numbers<[1], [0], [0], [1], [0, 0, 1, 1], [], []>} : vector<8x32xf32>, vector<32x32xf32>, vector<8x32xf32> -> vector<8x32xf32>
    %11 = vector.shape_cast %10 : vector<8x32xf32> to vector<8x4x8xf32>
    %12 = vector.shape_cast %5 : vector<4x8xf32> to vector<1x4x8xf32>
    %13 = vector.broadcast %12 : vector<1x4x8xf32> to vector<8x4x8xf32>
    %14 = arith.mulf %11, %13 : vector<8x4x8xf32>
    %cst_15 = arith.constant dense<0.000000e+00> : vector<8x4xf32>
    %15 = vector.multi_reduction <add>, %14, %cst_15 [2] : vector<8x4x8xf32> to vector<8x4xf32>
    %16 = vector.shape_cast %7 : vector<4x8xf32> to vector<1x4x8xf32>
    %17 = vector.broadcast %16 : vector<1x4x8xf32> to vector<8x4x8xf32>
    %18 = arith.mulf %11, %17 : vector<8x4x8xf32>
    %cst_16 = arith.constant dense<0.000000e+00> : vector<8x4xf32>
    %19 = vector.multi_reduction <add>, %18, %cst_16 [2] : vector<8x4x8xf32> to vector<8x4xf32>
    %20 = vector.shape_cast %19 : vector<8x4xf32> to vector<8x1x4xf32>
    %21 = vector.shape_cast %15 : vector<8x4xf32> to vector<1x8x4xf32>
    %22 = vector.broadcast %20 : vector<8x1x4xf32> to vector<8x8x4xf32>
    %23 = vector.broadcast %21 : vector<1x8x4xf32> to vector<8x8x4xf32>
    %24 = arith.addf %22, %23 : vector<8x8x4xf32>
    %cst_17 = arith.constant 0.000000e+00 : f32
    %25 = vector.broadcast %cst_17 : f32 to vector<8x8x4xf32>
    %26 = arith.cmpf ogt, %24, %25 : vector<8x8x4xf32>
    %cst_18 = arith.constant 2.000000e-01 : f32
    %27 = vector.broadcast %cst_18 : f32 to vector<8x8x4xf32>
    %28 = arith.mulf %27, %24 : vector<8x8x4xf32>
    %29 = arith.select %26, %24, %28 : vector<8x8x4xi1>, vector<8x8x4xf32>
    %30 = vector.shape_cast %1 : vector<8x8xf32> to vector<8x8x1xf32>
    %cst_19 = arith.constant 0.000000e+00 : f32
    %31 = vector.broadcast %cst_19 : f32 to vector<8x8x1xf32>
    %32 = arith.cmpf ogt, %30, %31 : vector<8x8x1xf32>
    %cst_20 = arith.constant -1.000000e+30 : f32
    %33 = vector.shape_cast %32 : vector<8x8x1xi1> to vector<8x8x1xi1>
    %34 = vector.broadcast %33 : vector<8x8x1xi1> to vector<8x8x4xi1>
    %35 = vector.broadcast %cst_20 : f32 to vector<8x8x4xf32>
    %36 = arith.select %34, %29, %35 : vector<8x8x4xi1>, vector<8x8x4xf32>
    %cst_21 = arith.constant dense<0xFF800000> : vector<8x4xf32>
    %37 = vector.multi_reduction <maximumf>, %36, %cst_21 [1] : vector<8x8x4xf32> to vector<8x4xf32>
    %38 = vector.shape_cast %37 : vector<8x4xf32> to vector<8x1x4xf32>
    %39 = vector.broadcast %38 : vector<8x1x4xf32> to vector<8x8x4xf32>
    %40 = arith.subf %36, %39 : vector<8x8x4xf32>
    %41 = math.exp %40 : vector<8x8x4xf32>
    %cst_22 = arith.constant 0.000000e+00 : f32
    %42 = vector.shape_cast %32 : vector<8x8x1xi1> to vector<8x8x1xi1>
    %43 = vector.broadcast %42 : vector<8x8x1xi1> to vector<8x8x4xi1>
    %44 = vector.broadcast %cst_22 : f32 to vector<8x8x4xf32>
    %45 = arith.select %43, %41, %44 : vector<8x8x4xi1>, vector<8x8x4xf32>
    %cst_23 = arith.constant dense<0.000000e+00> : vector<8x4xf32>
    %46 = vector.multi_reduction <add>, %45, %cst_23 [1] : vector<8x8x4xf32> to vector<8x4xf32>
    %47 = vector.shape_cast %46 : vector<8x4xf32> to vector<8x1x4xf32>
    %48 = tpu.reciprocal %47 {approx = true} : vector<8x1x4xf32> -> vector<8x1x4xf32>
    %49 = vector.broadcast %48 : vector<8x1x4xf32> to vector<8x8x4xf32>
    %50 = arith.mulf %45, %49 : vector<8x8x4xf32>
    %51 = vector.shape_cast %50 : vector<8x8x4xf32> to vector<8x8x4x1xf32>
    %52 = vector.shape_cast %11 : vector<8x4x8xf32> to vector<1x8x4x8xf32>
    %53 = vector.broadcast %51 : vector<8x8x4x1xf32> to vector<8x8x4x8xf32>
    %54 = vector.broadcast %52 : vector<1x8x4x8xf32> to vector<8x8x4x8xf32>
    %55 = arith.mulf %53, %54 : vector<8x8x4x8xf32>
    %cst_24 = arith.constant dense<0.000000e+00> : vector<8x4x8xf32>
    %56 = vector.multi_reduction <add>, %55, %cst_24 [1] : vector<8x8x4x8xf32> to vector<8x4x8xf32>
    %57 = vector.shape_cast %56 : vector<8x4x8xf32> to vector<8x32xf32>
    %58 = vector.broadcast %9 : vector<1x32xf32> to vector<8x32xf32>
    %59 = arith.addf %57, %58 : vector<8x32xf32>
    %cst_25 = arith.constant 0.000000e+00 : f32
    %60 = vector.broadcast %cst_25 : f32 to vector<8x32xf32>
    %61 = arith.maximumf %59, %60 : vector<8x32xf32>
    %62 = arith.addf %61, %0 : vector<8x32xf32>
    %c1 = arith.constant 1 : index
    %c0_26 = arith.constant 0 : index
    %c0_27 = arith.constant 0 : index
    %63 = vector.load %arg2[%c1, %c0_26, %c0_27] : memref<3x32x32xf32, #tpu.memory_space<vmem>>, vector<1x32x32xf32>
    %64 = vector.shape_cast %63 : vector<1x32x32xf32> to vector<32x32xf32>
    %c1_28 = arith.constant 1 : index
    %c0_29 = arith.constant 0 : index
    %c0_30 = arith.constant 0 : index
    %65 = vector.load %arg3[%c1_28, %c0_29, %c0_30] : memref<3x4x8xf32, #tpu.memory_space<vmem>>, vector<1x4x8xf32>
    %66 = vector.shape_cast %65 : vector<1x4x8xf32> to vector<4x8xf32>
    %c1_31 = arith.constant 1 : index
    %c0_32 = arith.constant 0 : index
    %c0_33 = arith.constant 0 : index
    %67 = vector.load %arg4[%c1_31, %c0_32, %c0_33] : memref<3x4x8xf32, #tpu.memory_space<vmem>>, vector<1x4x8xf32>
    %68 = vector.shape_cast %67 : vector<1x4x8xf32> to vector<4x8xf32>
    %c1_34 = arith.constant 1 : index
    %c0_35 = arith.constant 0 : index
    %c0_36 = arith.constant 0 : index
    %69 = vector.load %arg5[%c1_34, %c0_35, %c0_36] : memref<3x1x32xf32, #tpu.memory_space<vmem>>, vector<1x1x32xf32>
    %70 = vector.shape_cast %69 : vector<1x1x32xf32> to vector<1x32xf32>
    %cst_37 = arith.constant dense<0.000000e+00> : vector<8x32xf32>
    %71 = tpu.matmul %62, %64, %cst_37 {dimension_numbers = #tpu.dot_dimension_numbers<[1], [0], [0], [1], [0, 0, 1, 1], [], []>} : vector<8x32xf32>, vector<32x32xf32>, vector<8x32xf32> -> vector<8x32xf32>
    %72 = vector.shape_cast %71 : vector<8x32xf32> to vector<8x4x8xf32>
    %73 = vector.shape_cast %66 : vector<4x8xf32> to vector<1x4x8xf32>
    %74 = vector.broadcast %73 : vector<1x4x8xf32> to vector<8x4x8xf32>
    %75 = arith.mulf %72, %74 : vector<8x4x8xf32>
    %cst_38 = arith.constant dense<0.000000e+00> : vector<8x4xf32>
    %76 = vector.multi_reduction <add>, %75, %cst_38 [2] : vector<8x4x8xf32> to vector<8x4xf32>
    %77 = vector.shape_cast %68 : vector<4x8xf32> to vector<1x4x8xf32>
    %78 = vector.broadcast %77 : vector<1x4x8xf32> to vector<8x4x8xf32>
    %79 = arith.mulf %72, %78 : vector<8x4x8xf32>
    %cst_39 = arith.constant dense<0.000000e+00> : vector<8x4xf32>
    %80 = vector.multi_reduction <add>, %79, %cst_39 [2] : vector<8x4x8xf32> to vector<8x4xf32>
    %81 = vector.shape_cast %80 : vector<8x4xf32> to vector<8x1x4xf32>
    %82 = vector.shape_cast %76 : vector<8x4xf32> to vector<1x8x4xf32>
    %83 = vector.broadcast %81 : vector<8x1x4xf32> to vector<8x8x4xf32>
    %84 = vector.broadcast %82 : vector<1x8x4xf32> to vector<8x8x4xf32>
    %85 = arith.addf %83, %84 : vector<8x8x4xf32>
    %cst_40 = arith.constant 0.000000e+00 : f32
    %86 = vector.broadcast %cst_40 : f32 to vector<8x8x4xf32>
    %87 = arith.cmpf ogt, %85, %86 : vector<8x8x4xf32>
    %cst_41 = arith.constant 2.000000e-01 : f32
    %88 = vector.broadcast %cst_41 : f32 to vector<8x8x4xf32>
    %89 = arith.mulf %88, %85 : vector<8x8x4xf32>
    %90 = arith.select %87, %85, %89 : vector<8x8x4xi1>, vector<8x8x4xf32>
    %91 = vector.shape_cast %1 : vector<8x8xf32> to vector<8x8x1xf32>
    %cst_42 = arith.constant 0.000000e+00 : f32
    %92 = vector.broadcast %cst_42 : f32 to vector<8x8x1xf32>
    %93 = arith.cmpf ogt, %91, %92 : vector<8x8x1xf32>
    %cst_43 = arith.constant -1.000000e+30 : f32
    %94 = vector.shape_cast %93 : vector<8x8x1xi1> to vector<8x8x1xi1>
    %95 = vector.broadcast %94 : vector<8x8x1xi1> to vector<8x8x4xi1>
    %96 = vector.broadcast %cst_43 : f32 to vector<8x8x4xf32>
    %97 = arith.select %95, %90, %96 : vector<8x8x4xi1>, vector<8x8x4xf32>
    %cst_44 = arith.constant dense<0xFF800000> : vector<8x4xf32>
    %98 = vector.multi_reduction <maximumf>, %97, %cst_44 [1] : vector<8x8x4xf32> to vector<8x4xf32>
    %99 = vector.shape_cast %98 : vector<8x4xf32> to vector<8x1x4xf32>
    %100 = vector.broadcast %99 : vector<8x1x4xf32> to vector<8x8x4xf32>
    %101 = arith.subf %97, %100 : vector<8x8x4xf32>
    %102 = math.exp %101 : vector<8x8x4xf32>
    %cst_45 = arith.constant 0.000000e+00 : f32
    %103 = vector.shape_cast %93 : vector<8x8x1xi1> to vector<8x8x1xi1>
    %104 = vector.broadcast %103 : vector<8x8x1xi1> to vector<8x8x4xi1>
    %105 = vector.broadcast %cst_45 : f32 to vector<8x8x4xf32>
    %106 = arith.select %104, %102, %105 : vector<8x8x4xi1>, vector<8x8x4xf32>
    %cst_46 = arith.constant dense<0.000000e+00> : vector<8x4xf32>
    %107 = vector.multi_reduction <add>, %106, %cst_46 [1] : vector<8x8x4xf32> to vector<8x4xf32>
    %108 = vector.shape_cast %107 : vector<8x4xf32> to vector<8x1x4xf32>
    %109 = tpu.reciprocal %108 {approx = true} : vector<8x1x4xf32> -> vector<8x1x4xf32>
    %110 = vector.broadcast %109 : vector<8x1x4xf32> to vector<8x8x4xf32>
    %111 = arith.mulf %106, %110 : vector<8x8x4xf32>
    %112 = vector.shape_cast %111 : vector<8x8x4xf32> to vector<8x8x4x1xf32>
    %113 = vector.shape_cast %72 : vector<8x4x8xf32> to vector<1x8x4x8xf32>
    %114 = vector.broadcast %112 : vector<8x8x4x1xf32> to vector<8x8x4x8xf32>
    %115 = vector.broadcast %113 : vector<1x8x4x8xf32> to vector<8x8x4x8xf32>
    %116 = arith.mulf %114, %115 : vector<8x8x4x8xf32>
    %cst_47 = arith.constant dense<0.000000e+00> : vector<8x4x8xf32>
    %117 = vector.multi_reduction <add>, %116, %cst_47 [1] : vector<8x8x4x8xf32> to vector<8x4x8xf32>
    %118 = vector.shape_cast %117 : vector<8x4x8xf32> to vector<8x32xf32>
    %119 = vector.broadcast %70 : vector<1x32xf32> to vector<8x32xf32>
    %120 = arith.addf %118, %119 : vector<8x32xf32>
    %cst_48 = arith.constant 0.000000e+00 : f32
    %121 = vector.broadcast %cst_48 : f32 to vector<8x32xf32>
    %122 = arith.maximumf %120, %121 : vector<8x32xf32>
    %123 = arith.addf %122, %0 : vector<8x32xf32>
    %c2 = arith.constant 2 : index
    %c0_49 = arith.constant 0 : index
    %c0_50 = arith.constant 0 : index
    %124 = vector.load %arg2[%c2, %c0_49, %c0_50] : memref<3x32x32xf32, #tpu.memory_space<vmem>>, vector<1x32x32xf32>
    %125 = vector.shape_cast %124 : vector<1x32x32xf32> to vector<32x32xf32>
    %c2_51 = arith.constant 2 : index
    %c0_52 = arith.constant 0 : index
    %c0_53 = arith.constant 0 : index
    %126 = vector.load %arg3[%c2_51, %c0_52, %c0_53] : memref<3x4x8xf32, #tpu.memory_space<vmem>>, vector<1x4x8xf32>
    %127 = vector.shape_cast %126 : vector<1x4x8xf32> to vector<4x8xf32>
    %c2_54 = arith.constant 2 : index
    %c0_55 = arith.constant 0 : index
    %c0_56 = arith.constant 0 : index
    %128 = vector.load %arg4[%c2_54, %c0_55, %c0_56] : memref<3x4x8xf32, #tpu.memory_space<vmem>>, vector<1x4x8xf32>
    %129 = vector.shape_cast %128 : vector<1x4x8xf32> to vector<4x8xf32>
    %c2_57 = arith.constant 2 : index
    %c0_58 = arith.constant 0 : index
    %c0_59 = arith.constant 0 : index
    %130 = vector.load %arg5[%c2_57, %c0_58, %c0_59] : memref<3x1x32xf32, #tpu.memory_space<vmem>>, vector<1x1x32xf32>
    %131 = vector.shape_cast %130 : vector<1x1x32xf32> to vector<1x32xf32>
    %cst_60 = arith.constant dense<0.000000e+00> : vector<8x32xf32>
    %132 = tpu.matmul %123, %125, %cst_60 {dimension_numbers = #tpu.dot_dimension_numbers<[1], [0], [0], [1], [0, 0, 1, 1], [], []>} : vector<8x32xf32>, vector<32x32xf32>, vector<8x32xf32> -> vector<8x32xf32>
    %133 = vector.shape_cast %132 : vector<8x32xf32> to vector<8x4x8xf32>
    %134 = vector.shape_cast %127 : vector<4x8xf32> to vector<1x4x8xf32>
    %135 = vector.broadcast %134 : vector<1x4x8xf32> to vector<8x4x8xf32>
    %136 = arith.mulf %133, %135 : vector<8x4x8xf32>
    %cst_61 = arith.constant dense<0.000000e+00> : vector<8x4xf32>
    %137 = vector.multi_reduction <add>, %136, %cst_61 [2] : vector<8x4x8xf32> to vector<8x4xf32>
    %138 = vector.shape_cast %129 : vector<4x8xf32> to vector<1x4x8xf32>
    %139 = vector.broadcast %138 : vector<1x4x8xf32> to vector<8x4x8xf32>
    %140 = arith.mulf %133, %139 : vector<8x4x8xf32>
    %cst_62 = arith.constant dense<0.000000e+00> : vector<8x4xf32>
    %141 = vector.multi_reduction <add>, %140, %cst_62 [2] : vector<8x4x8xf32> to vector<8x4xf32>
    %142 = vector.shape_cast %141 : vector<8x4xf32> to vector<8x1x4xf32>
    %143 = vector.shape_cast %137 : vector<8x4xf32> to vector<1x8x4xf32>
    %144 = vector.broadcast %142 : vector<8x1x4xf32> to vector<8x8x4xf32>
    %145 = vector.broadcast %143 : vector<1x8x4xf32> to vector<8x8x4xf32>
    %146 = arith.addf %144, %145 : vector<8x8x4xf32>
    %cst_63 = arith.constant 0.000000e+00 : f32
    %147 = vector.broadcast %cst_63 : f32 to vector<8x8x4xf32>
    %148 = arith.cmpf ogt, %146, %147 : vector<8x8x4xf32>
    %cst_64 = arith.constant 2.000000e-01 : f32
    %149 = vector.broadcast %cst_64 : f32 to vector<8x8x4xf32>
    %150 = arith.mulf %149, %146 : vector<8x8x4xf32>
    %151 = arith.select %148, %146, %150 : vector<8x8x4xi1>, vector<8x8x4xf32>
    %152 = vector.shape_cast %1 : vector<8x8xf32> to vector<8x8x1xf32>
    %cst_65 = arith.constant 0.000000e+00 : f32
    %153 = vector.broadcast %cst_65 : f32 to vector<8x8x1xf32>
    %154 = arith.cmpf ogt, %152, %153 : vector<8x8x1xf32>
    %cst_66 = arith.constant -1.000000e+30 : f32
    %155 = vector.shape_cast %154 : vector<8x8x1xi1> to vector<8x8x1xi1>
    %156 = vector.broadcast %155 : vector<8x8x1xi1> to vector<8x8x4xi1>
    %157 = vector.broadcast %cst_66 : f32 to vector<8x8x4xf32>
    %158 = arith.select %156, %151, %157 : vector<8x8x4xi1>, vector<8x8x4xf32>
    %cst_67 = arith.constant dense<0xFF800000> : vector<8x4xf32>
    %159 = vector.multi_reduction <maximumf>, %158, %cst_67 [1] : vector<8x8x4xf32> to vector<8x4xf32>
    %160 = vector.shape_cast %159 : vector<8x4xf32> to vector<8x1x4xf32>
    %161 = vector.broadcast %160 : vector<8x1x4xf32> to vector<8x8x4xf32>
    %162 = arith.subf %158, %161 : vector<8x8x4xf32>
    %163 = math.exp %162 : vector<8x8x4xf32>
    %cst_68 = arith.constant 0.000000e+00 : f32
    %164 = vector.shape_cast %154 : vector<8x8x1xi1> to vector<8x8x1xi1>
    %165 = vector.broadcast %164 : vector<8x8x1xi1> to vector<8x8x4xi1>
    %166 = vector.broadcast %cst_68 : f32 to vector<8x8x4xf32>
    %167 = arith.select %165, %163, %166 : vector<8x8x4xi1>, vector<8x8x4xf32>
    %cst_69 = arith.constant dense<0.000000e+00> : vector<8x4xf32>
    %168 = vector.multi_reduction <add>, %167, %cst_69 [1] : vector<8x8x4xf32> to vector<8x4xf32>
    %169 = vector.shape_cast %168 : vector<8x4xf32> to vector<8x1x4xf32>
    %170 = tpu.reciprocal %169 {approx = true} : vector<8x1x4xf32> -> vector<8x1x4xf32>
    %171 = vector.broadcast %170 : vector<8x1x4xf32> to vector<8x8x4xf32>
    %172 = arith.mulf %167, %171 : vector<8x8x4xf32>
    %173 = vector.shape_cast %172 : vector<8x8x4xf32> to vector<8x8x4x1xf32>
    %174 = vector.shape_cast %133 : vector<8x4x8xf32> to vector<1x8x4x8xf32>
    %175 = vector.broadcast %173 : vector<8x8x4x1xf32> to vector<8x8x4x8xf32>
    %176 = vector.broadcast %174 : vector<1x8x4x8xf32> to vector<8x8x4x8xf32>
    %177 = arith.mulf %175, %176 : vector<8x8x4x8xf32>
    %cst_70 = arith.constant dense<0.000000e+00> : vector<8x4x8xf32>
    %178 = vector.multi_reduction <add>, %177, %cst_70 [1] : vector<8x8x4x8xf32> to vector<8x4x8xf32>
    %179 = vector.shape_cast %178 : vector<8x4x8xf32> to vector<8x32xf32>
    %180 = vector.broadcast %131 : vector<1x32xf32> to vector<8x32xf32>
    %181 = arith.addf %179, %180 : vector<8x32xf32>
    %182 = arith.addf %181, %0 : vector<8x32xf32>
    %cst_71 = arith.constant 0.000000e+00 : f32
    %183 = vector.broadcast %cst_71 : f32 to vector<8x32xf32>
    %184 = arith.maximumf %182, %183 : vector<8x32xf32>
    %c0_72 = arith.constant 0 : index
    %c0_73 = arith.constant 0 : index
    %185 = vector.load %arg6[%c0_72, %c0_73] : memref<8x32xf32, #tpu.memory_space<vmem>>, vector<8x32xf32>
    tpu.vector_store %arg6[%c0_72, %c0_73], %184 {strides = array<i32>} : memref<8x32xf32, #tpu.memory_space<vmem>>, vector<8x32xf32>,
    return
  }
}

</mosaic_0001>

<bundles_post_ra>
// kernel: tpu_custom_call.1
= control target key start
LH: loop header
LB: loop body
LE: loop exit
PB: predicated region body
PF: predicated region fallthrough
CT: control target
= control target key end

     0   :  { %11 = vsyncpa [#allocation3], 0  ;;  %s9324_s0 = inlined_call_operand.hbm [shape: f32[8,32], index: 0, kind: input, shape index: {}]   ;;  %s9325_s1 = inlined_call_operand.hbm [shape: f32[8,8], index: 1, kind: input, shape index: {}]   ;;  %s9326_s2 = inlined_call_operand.hbm [shape: f32[3,32,32], index: 2, kind: input, shape index: {}]   ;;  %s9327_s3 = inlined_call_operand.hbm [shape: f32[3,4,8], index: 3, kind: input, shape index: {}]   ;;  %s9328_s4 = inlined_call_operand.vmem [shape: f32[3,4,8], index: 4, kind: input, shape index: {}]   ;;  %s9329_s5 = inlined_call_operand.vmem [shape: f32[3,1,32], index: 5, kind: input, shape index: {}]   ;;  %s9330_s6 = inlined_call_operand.hbm [shape: f32[8,32], index: 6, kind: output, shape index: {}]  }
   0x1   :  { %12 = vsyncpa [#allocation6], 0 }
   0x2   :  { %13 = vsyncpa [#allocation9], 0 }
   0x3   :  { %14 = vsyncpa [#allocation4], 0  ;;  %s5772_s21 = smov [#allocation5]   ;;  %s5773_s23 = smov [#allocation2]  }
   0x4   :  { %s31_s22 = sshll.u32 %s5772_s21, 4  ;;  %s21_s24 = sshll.u32 %s5773_s23, 4  ;;  %s32_s22 = int_to_ptr.vmem [resolvable:$true] %s31_s22  ;;  %s22_s24 = int_to_ptr.vmem [resolvable:$true] %s21_s24 }
   0x5   :  { %s5654_s27 = scalar_lea.hbm %s9325_s1, 128 }
   0x6   :  { %p5655_p0 = scmp.ne.s32.totalorder %s9325_s1, %s5654_s27  ;;  %p5658_p1 = scmp.lt.u32.totalorder %s5654_s27, %s9325_s1 }
   0x8   :  { %p5660_p2 = pnand %p5658_p1, %p5655_p0 }
   0xa   :  { %5663 = shalt.err (!%p5660_p2)
}
   0xb   :  { %s5664_s8 = scalar_lea.vmem %s32_s22, 128  ;;  %p5669_p4 = scmp.lt.s32.totalorder %s32_s22, %s32_s22 }
   0xc   :  { %p5665_p3 = scmp.ne.s32.totalorder %s32_s22, %s5664_s8  ;;  %p5670_p5 = scmp.lt.s32.totalorder %s5664_s8, %s5664_s8 }
   0xe   :  { %p5671_p6 = por %p5670_p5, %p5669_p4 }
  0x10   :  { %p5672_p7 = pnand %p5671_p6, %p5665_p3 }
  0x12   :  { %5675 = shalt.err (!%p5672_p7)
}
  0x13   :  { %34 = dma.hbm_to_vmem [thread:$0]  %s9325_s1, 128, %s32_s22, [#allocation6]  }
  0x14   :  { %s5676_s13 = scalar_lea.hbm %s9324_s0, 128 }
  0x15   :  { %p5677_p8 = scmp.ne.s32.totalorder %s9324_s0, %s5676_s13  ;;  %p5680_p9 = scmp.lt.u32.totalorder %s5676_s13, %s9324_s0 }
  0x17   :  { %p5682_p10 = pnand %p5680_p9, %p5677_p8 }
  0x19   :  { %5685 = shalt.err (!%p5682_p10)
}
  0x1a   :  { %s5686_s18 = scalar_lea.vmem %s22_s24, 128  ;;  %p5691_p12 = scmp.lt.s32.totalorder %s22_s24, %s22_s24 }
  0x1b   :  { %p5687_p11 = scmp.ne.s32.totalorder %s22_s24, %s5686_s18  ;;  %p5692_p13 = scmp.lt.s32.totalorder %s5686_s18, %s5686_s18 }
  0x1d   :  { %p5693_p0 = por %p5692_p13, %p5691_p12 }
  0x1f   :  { %p5694_p1 = pnand %p5693_p0, %p5687_p11 }
  0x21   :  { %5697 = shalt.err (!%p5694_p1)
}
  0x22   :  { %24 = dma.hbm_to_vmem [thread:$0]  %s9324_s0, 128, %s22_s24, [#allocation3]  }
  0x23   :  { %s5774_s20 = smov [#allocation7]   ;;  %s5698_s25 = scalar_lea.hbm %s9326_s2, 1536 }
  0x24   :  { %s40_s21 = sshll.u32 %s5774_s20, 4  ;;  %p5699_p2 = scmp.ne.s32.totalorder %s9326_s2, %s5698_s25  ;;  %s41_s21 = int_to_ptr.vmem [resolvable:$true] %s40_s21 }
  0x25   :  { %p5702_p3 = scmp.lt.u32.totalorder %s5698_s25, %s9326_s2 }
  0x27   :  { %p5704_p4 = pnand %p5702_p3, %p5699_p2 }
  0x29   :  { %5707 = shalt.err (!%p5704_p4)
}
  0x2a   :  { %s5708_s30 = scalar_lea.vmem %s41_s21, 1536  ;;  %p5713_p6 = scmp.lt.s32.totalorder %s41_s21, %s41_s21 }
  0x2b   :  { %p5709_p5 = scmp.ne.s32.totalorder %s41_s21, %s5708_s30  ;;  %p5714_p7 = scmp.lt.s32.totalorder %s5708_s30, %s5708_s30 }
  0x2d   :  { %p5715_p8 = por %p5714_p7, %p5713_p6 }
  0x2f   :  { %p5716_p9 = pnand %p5715_p8, %p5709_p5 }
  0x31   :  { %5719 = shalt.err (!%p5716_p9)
}
  0x32   :  { %s5775_s0 = smov 128   ;;  %s5776_s24 = smov 8  }
  0x33   :  { %46 = dma.hbm_to_vmem [thread:$0]  %s9326_s2, 1536, %s41_s21, [#allocation6], %s5775_s0, %s5775_s0, %s5776_s24  }
  0x34   :  { %s5777_s9 = smov [#allocation8]   ;;  %s5720_s13 = scalar_lea.hbm %s9327_s3, 192 }
  0x35   :  { %s52_s10 = sshll.u32 %s5777_s9, 4  ;;  %p5721_p10 = scmp.ne.s32.totalorder %s9327_s3, %s5720_s13  ;;  %s53_s10 = int_to_ptr.vmem [resolvable:$true] %s52_s10 }
  0x36   :  { %p5724_p11 = scmp.lt.u32.totalorder %s5720_s13, %s9327_s3 }
  0x38   :  { %p5726_p12 = pnand %p5724_p11, %p5721_p10 }
  0x3a   :  { %5729 = shalt.err (!%p5726_p12)
}
  0x3b   :  { %s5730_s18 = scalar_lea.vmem %s53_s10, 192  ;;  %p5735_p0 = scmp.lt.s32.totalorder %s53_s10, %s53_s10 }
  0x3c   :  { %p5731_p13 = scmp.ne.s32.totalorder %s53_s10, %s5730_s18  ;;  %p5736_p1 = scmp.lt.s32.totalorder %s5730_s18, %s5730_s18 }
  0x3e   :  { %p5737_p2 = por %p5736_p1, %p5735_p0 }
  0x40   :  { %p5738_p3 = pnand %p5737_p2, %p5731_p13 }
  0x42   :  { %5741 = shalt.err (!%p5738_p3)
}
  0x43   :  { %s5778_s2 = smov 64   ;;  %s5779_s1 = smov 4  }
  0x44   :  { %58 = dma.hbm_to_vmem [thread:$0]  %s9327_s3, 192, %s53_s10, [#allocation9], %s5778_s2, %s5778_s2, %s5779_s1  }
  0x45   :  { %5764 = dma.done.wait [#allocation3], 128  }
  0x46   :  { %5765 = vsyncadd [#allocation3], 4294967168 }
  0x47   :  { %5766 = dma.done.wait [#allocation6], 1664  }
  0x48   :  { %5767 = vsyncadd [#allocation6], 4294965632 }
  0x49   :  { %5768 = dma.done.wait [#allocation9], 192  }
  0x4a   :  { %5769 = vsyncadd [#allocation9], 4294967104  ;;  %v9333_v0 = vmov 0.0|0.0   ;;  %vm5781_vm0 = vmmov 0   ;;  %v9331_v1 = vmov 0.0   ;;  %v77_v2 = vld [vmem:[#allocation7] sm:$0xff]  ;;  %v173_v9 = vlaneseq }
  0x4b   :  { %5518 = vmatprep.subr.bf16.mxu0 %v9333_v0  ;;  %5493 = vmatprep.mubr.msk.f32.mxu0 %vm5781_vm0, %v9331_v1  ;;  %v78_v3 = vld [vmem:[#allocation7 + $0x8] sm:$0xff]  ;;  %v79_v4 = vld [vmem:[#allocation7 + $0x10] sm:$0xff]  ;;  %v80_v6 = vld [vmem:[#allocation7 + $0x18] sm:$0xff]  ;;  %vm9393_vm1 = vcmask 261120   ;;  %s5783_s3 = smov 104   ;;  %s5784_s21 = smov 120  }
  0x4c   :  { %5524 = vmatprep.subr.bf16.mxu1 %v9333_v0  ;;  %5504 = vmatprep.mubr.msk.f32.mxu1 %vm5781_vm0, %v9331_v1  ;;  %v5519_v5 = vpack.c.bf16 %v78_v3, %v77_v2  ;;  %v5522_v7 = vpack.c.bf16 %v80_v6, %v79_v4  ;;  %v75_v8 = vld [vmem:[#allocation2] sm:$0xff]  ;;  %v5887_v10 = vshrl.u32 %v173_v9, 7  ;;  %v5892_v12 = vld [vmem:[#allocation5] sm:$0xff]  ;;  %s5785_s22 = smov 112   ;;  %v5786_v28 = vmov 1983009808  }
  0x4d   :  { %v171_v29 = vunpack.c.l.s4 %v5786_v28  ;;  %v5787_v31 = vmov 1934713408   ;;  %v82_v50 = vld [vmem:[%s9328_s4] sm:$0xf]  ;;  %vm9397_vm2 = vcmask 60416   ;;  %s5788_s26 = smov 16  }
  0x4e   :  { %5520 = vmatpush3.bf16.msra.mxu0 %v5519_v5  ;;  %v5890_v11 = vsub.s32 1, %v5887_v10  ;;  %v5899_v16 = vsub.s32 2, %v5887_v10  ;;  %v5902_v17 = vsub.s32 0, %v5887_v10  ;;  %v5908_v19 = vsub.s32 4, %v5887_v10  ;;  %v81_v51 = vld [vmem:[#allocation8] sm:$0xf] }
  0x4f   :  { %5521 = vmatprep.subr.bf16.mxu0 %v9333_v0  ;;  %v5913_v21 = vsub.s32 3, %v5887_v10  ;;  %v5918_v23 = vsub.s32 6, %v5887_v10  ;;  %v5923_v25 = vsub.s32 5, %v5887_v10  ;;  %v172_v30 = vunpack.c.0.s8 %v171_v29  ;;  %s5789_s27 = smov 24   ;;  %s5790_s12 = smov [#allocation10]  }
  0x50   :  { %9501 = vst [vmem:[#allocation15_spill] sm:$0xff] %v5890_v11  ;;  %v567_v15 = vrot.slane %v5892_v12, %v5890_v11  ;;  %9502 = vst [vmem:[#allocation16_spill] sm:$0xff] %v5899_v16  ;;  %v574_v18 = vrot.slane %v5892_v12, %v5899_v16  ;;  %v560_v20 = vrot.slane %v5892_v12, %v5902_v17  ;;  %v203_v32 = vunpack.c.l.s4 %v5787_v31  ;;  %s5449_s13 = sshll.u32 %s5790_s12, 4  ;;  %s5450_s13 = int_to_ptr.vmem [resolvable:$true] %s5449_s13 }
  0x51   :  { %9503 = vst [vmem:[#allocation17_spill] sm:$0xff] %v5902_v17  ;;  %9504 = vst [vmem:[#allocation18_spill] sm:$0xff] %v5908_v19  ;;  %v588_v22 = vrot.slane %v5892_v12, %v5908_v19  ;;  %v581_v24 = vrot.slane %v5892_v12, %v5913_v21  ;;  %v602_v26 = vrot.slane %v5892_v12, %v5918_v23  ;;  %p5747_p5 = scmp.lt.s32.totalorder %s5450_s13, %s5450_s13 }
  0x52   :  { %5523 = vmatpush3.bf16.msra.mxu0 %v5522_v7  ;;  %9505 = vst [vmem:[#allocation19_spill] sm:$0xff] %v5913_v21  ;;  %9506 = vst [vmem:[#allocation20_spill] sm:$0xff] %v5918_v23  ;;  %v595_v27 = vrot.slane %v5892_v12, %v5923_v25  ;;  %v5930_v35 = vsub.s32 %v172_v30, %v5887_v10  ;;  %v204_v37 = vunpack.c.0.s8 %v203_v32 }
  0x53   :  { %5530 = vmatprep.subr.bf16.mxu0 %v9333_v0  ;;  %9507 = vst [vmem:[#allocation21_spill] sm:$0xff] %v5923_v25 }
  0x54   :  { %9508 = vst [vmem:[#allocation22_spill] sm:$0xff] %v5930_v35  ;;  %v5934_v43 = vsub.s32 %v204_v37, %v5887_v10 }
  0x55   :  { %5494 = vmatmul.mubr.msk.f32.vlgmr.msra.gmra.mrb[0].mxu0 %vm9393_vm1, %v75_v8  ;;  %vm971_vm1 = vcmask 1047559  }
  0x56   :  { %5515 = vmatprep.mubr.msk.f32.mxu0 %vm5781_vm0, %v9331_v1  ;;  %9509 = vst [vmem:[#allocation23_spill] sm:$0xff] %v5934_v43 }
 0x128   :  { %v154_v13 = vpop.f32.mrb[0].mxu0 }
 0x129   :  { %165 = vrot.lane.b32.xlu1 %v154_v13, %s5783_s3  ;;  %159 = vrot.lane.b32.xlu0 %v154_v13, %s5784_s21  ;;  %v5495_v14 = vpop.f32.mrb[1].mxu0 }
 0x12d   :  { %162 = vrot.lane.b32.xlu0 %v154_v13, %s5785_s22  ;;  %569 = vbcast.lane.b32.xlu1 %v567_v15, 256 }
 0x131   :  { %576 = vbcast.lane.b32.xlu1 %v574_v18, 256  ;;  %562 = vbcast.lane.b32.xlu0 %v560_v20, 256 }
 0x135   :  { %590 = vbcast.lane.b32.xlu1 %v588_v22, 256  ;;  %583 = vbcast.lane.b32.xlu0 %v581_v24, 256 }
 0x139   :  { %604 = vbcast.lane.b32.xlu1 %v602_v26, 256  ;;  %597 = vbcast.lane.b32.xlu0 %v595_v27, 256 }
 0x19b   :  { %v166_v33 = vpop.permute.xlu1 %165  ;;  %v160_v34 = vpop.permute.xlu0 %159 }
 0x19c   :  { %v184_v36 = vcombine.low %v160_v34, %v166_v33  ;;  %v185_v38 = vcombine.high %v160_v34, %v166_v33 }
 0x19e   :  { %v192_v42 = vrot.slane %v184_v36, %v5930_v35  ;;  %v199_v46 = vrot.slane %v185_v38, %v5930_v35 }
 0x19f   :  { %v163_v39 = vpop.permute.xlu0 %162 }
 0x1a0   :  { %v168_v40 = vcombine.low %v154_v13, %v163_v39  ;;  %v169_v41 = vcombine.high %v154_v13, %v163_v39 }
 0x1a2   :  { %v176_v44 = vrot.slane %v168_v40, %v5930_v35  ;;  %v183_v45 = vrot.slane %v169_v41, %v5930_v35 }
 0x1a4   :  { %v200_v47 = vcombine.low %v176_v44, %v192_v42  ;;  %v201_v48 = vcombine.high %v176_v44, %v192_v42  ;;  %v216_v49 = vcombine.low %v183_v45, %v199_v46  ;;  %v217_v57 = vcombine.high %v183_v45, %v199_v46  ;;  %v6007_v45 = vpop.permute.xlu1 %569  ;;  %v6009_v46 = vpop.permute.xlu0 %562 }
 0x1a5   :  { %v6003_v42 = vsub.s32 7, %v5887_v10  ;;  %9519 = vst [vmem:[#allocation33_spill] sm:$0xff] %v6007_v45  ;;  %9520 = vst [vmem:[#allocation34_spill] sm:$0xff] %v6009_v46 }
 0x1a6   :  { %v5943_v52 = vrot.slane %v200_v47, %v5934_v43  ;;  %v5946_v53 = vrot.slane %v201_v48, %v5934_v43  ;;  %v5955_v58 = vrot.slane %v216_v49, %v5934_v43  ;;  %v5966_v2 = vrot.slane %v217_v57, %v5934_v43 }
 0x1a7   :  { %9518 = vst [vmem:[#allocation32_spill] sm:$0xff] %v6003_v42  ;;  %v609_v44 = vrot.slane %v5892_v12, %v6003_v42 }
 0x1a8   :  { %9510 = vst [vmem:[#allocation24_spill] sm:$0xff] %v5943_v52  ;;  %9511 = vst [vmem:[#allocation25_spill] sm:$0xff] %v5946_v53  ;;  %v269_v54 = vmul.f32 %v5943_v52, %v82_v50  ;;  %v236_v55 = vmul.f32 %v5943_v52, %v81_v51  ;;  %v5952_v56 = vcombine.high %v5943_v52, %v9331_v1  ;;  %v6011_v47 = vpop.permute.xlu1 %576  ;;  %v6013_v48 = vpop.permute.xlu0 %583 }
 0x1a9   :  { %9513 = vst [vmem:[#allocation27_spill] sm:$0xff] %v5955_v58  ;;  %v271_v59 = vmul.f32 %v5946_v53, %v82_v50  ;;  %v5963_v63 = vcombine.high %v5946_v53, %v9331_v1  ;;  %9515 = vst [vmem:[#allocation29_spill] sm:$0xff] %v5966_v2  ;;  %v273_v3 = vmul.f32 %v5955_v58, %v82_v50 }
 0x1aa   :  { %9512 = vst [vmem:[#allocation26_spill] sm:$0xff] %v5952_v56  ;;  %v277_v60 = vsel %vm9397_vm2, %v269_v54, 0.0  ;;  %v245_v61 = vsel %vm9397_vm2, %v236_v55, 0.0  ;;  %v270_v62 = vmul.f32 %v5952_v56, %v82_v50  ;;  %v5974_v7 = vcombine.high %v5955_v58, %v9331_v1  ;;  %9521 = vst [vmem:[#allocation35_spill] sm:$0xff] %v6011_v47 }
 0x1ab   :  { %9514 = vst [vmem:[#allocation28_spill] sm:$0xff] %v5963_v63  ;;  %278 = vadd.xlane.f32.xlu0 %v277_v60  ;;  %246 = vadd.xlane.f32.xlu1 %v245_v61  ;;  %v283_v4 = vsel %vm9397_vm2, %v271_v59, 0.0  ;;  %v272_v6 = vmul.f32 %v5963_v63, %v82_v50  ;;  %v275_v8 = vmul.f32 %v5966_v2, %v82_v50  ;;  %v289_v13 = vsel %vm9397_vm2, %v273_v3, 0.0 }
 0x1ac   :  { %v280_v5 = vsel %vm9397_vm2, %v270_v62, 0.0  ;;  %9516 = vst [vmem:[#allocation30_spill] sm:$0xff] %v5974_v7  ;;  %v274_v15 = vmul.f32 %v5974_v7, %v82_v50  ;;  %v5982_v18 = vcombine.high %v5966_v2, %v9331_v1  ;;  %v238_v24 = vmul.f32 %v5946_v53, %v81_v51  ;;  %9522 = vst [vmem:[#allocation36_spill] sm:$0xff] %v6013_v48  ;;  %v6015_v49 = vpop.permute.xlu1 %590 }
 0x1ad   :  { %v286_v14 = vsel %vm9397_vm2, %v272_v6, 0.0  ;;  %v295_v20 = vsel %vm9397_vm2, %v275_v8, 0.0  ;;  %v240_v29 = vmul.f32 %v5955_v58, %v81_v51  ;;  %v239_v30 = vmul.f32 %v5963_v63, %v81_v51  ;;  %9523 = vst [vmem:[#allocation37_spill] sm:$0xff] %v6015_v49 }
 0x1ae   :  { %9517 = vst [vmem:[#allocation31_spill] sm:$0xff] %v5982_v18  ;;  %v292_v22 = vsel %vm9397_vm2, %v274_v15, 0.0  ;;  %v276_v26 = vmul.f32 %v5982_v18, %v82_v50  ;;  %v251_v27 = vsel %vm9397_vm2, %v238_v24, 0.0  ;;  %v242_v33 = vmul.f32 %v5966_v2, %v81_v51  ;;  %v6017_v50 = vpop.permute.xlu0 %597 }
 0x1af   :  { %284 = vadd.xlane.f32.xlu0 %v283_v4  ;;  %281 = vadd.xlane.f32.xlu1 %v280_v5  ;;  %v257_v31 = vsel %vm9397_vm2, %v240_v29, 0.0  ;;  %v254_v32 = vsel %vm9397_vm2, %v239_v30, 0.0  ;;  %v241_v34 = vmul.f32 %v5974_v7, %v81_v51  ;;  %v243_v38 = vmul.f32 %v5982_v18, %v81_v51  ;;  %9524 = vst [vmem:[#allocation38_spill] sm:$0xff] %v6017_v50 }
 0x1b0   :  { %v298_v28 = vsel %vm9397_vm2, %v276_v26, 0.0  ;;  %v263_v36 = vsel %vm9397_vm2, %v242_v33, 0.0  ;;  %v237_v39 = vmul.f32 %v5952_v56, %v81_v51  ;;  %v6019_v51 = vpop.permute.xlu1 %604  ;;  %v702_v62 = vand.u32 127, %v173_v9 }
 0x1b1   :  { %v260_v37 = vsel %vm9397_vm2, %v241_v34, 0.0  ;;  %v266_v40 = vsel %vm9397_vm2, %v243_v38, 0.0  ;;  %9525 = vst [vmem:[#allocation39_spill] sm:$0xff] %v6019_v51 }
 0x1b2   :  { %v248_v41 = vsel %vm9397_vm2, %v237_v39, 0.0  ;;  %v6038_v9 = vsub.s32 %v702_v62, %v5887_v10 }
 0x1b3   :  { %290 = vadd.xlane.f32.xlu0 %v289_v13  ;;  %287 = vadd.xlane.f32.xlu1 %v286_v14 }
 0x1b7   :  { %296 = vadd.xlane.f32.xlu0 %v295_v20  ;;  %293 = vadd.xlane.f32.xlu1 %v292_v22 }
 0x1bb   :  { %252 = vadd.xlane.f32.xlu0 %v251_v27  ;;  %299 = vadd.xlane.f32.xlu1 %v298_v28 }
 0x1bf   :  { %258 = vadd.xlane.f32.xlu0 %v257_v31  ;;  %255 = vadd.xlane.f32.xlu1 %v254_v32 }
 0x1c3   :  { %264 = vadd.xlane.f32.xlu0 %v263_v36  ;;  %261 = vadd.xlane.f32.xlu1 %v260_v37 }
 0x1c7   :  { %267 = vadd.xlane.f32.xlu1 %v266_v40  ;;  %249 = vadd.xlane.f32.xlu0 %v248_v41 }
 0x1dd   :  { %611 = vbcast.lane.b32.xlu0 %v609_v44, 256 }
 0x238   :  { %v247_v54 = vpop.xlane.xlu1 %246  ;;  %v6021_v55 = vpop.xlane.xlu0 %278 }
 0x239   :  { %v301_v12 = vadd.f32 %v6021_v55, %v247_v54 }
 0x23b   :  { %vm365_vm3 = vcmp.gt.f32.partialorder %v301_v12, 0.0  ;;  %v429_v3 = vmul.f32 0.2, %v301_v12 }
 0x23c   :  { %v6024_v57 = vpop.xlane.xlu1 %281  ;;  %v6026_v59 = vpop.xlane.xlu0 %284 }
 0x23d   :  { %v309_v60 = vadd.f32 %v6024_v57, %v247_v54  ;;  %v317_v61 = vadd.f32 %v6026_v59, %v247_v54  ;;  %v6040_v22 = vsel %vm365_vm3, %v301_v12, %v429_v3 }
 0x23f   :  { %v437_v6 = vmul.f32 0.2, %v309_v60  ;;  %v445_v8 = vmul.f32 0.2, %v317_v61  ;;  %vm373_vm4 = vcmp.gt.f32.partialorder %v309_v60, 0.0  ;;  %vm381_vm5 = vcmp.gt.f32.partialorder %v317_v61, 0.0 }
 0x240   :  { %v6031_v4 = vpop.xlane.xlu1 %287  ;;  %v6033_v5 = vpop.xlane.xlu0 %290 }
 0x241   :  { %v325_v13 = vadd.f32 %v6031_v4, %v247_v54  ;;  %v333_v14 = vadd.f32 %v6033_v5, %v247_v54  ;;  %v6046_v27 = vsel %vm373_vm4, %v309_v60, %v437_v6  ;;  %v6048_v28 = vsel %vm381_vm5, %v317_v61, %v445_v8 }
 0x243   :  { %vm389_vm6 = vcmp.gt.f32.partialorder %v325_v13, 0.0  ;;  %v453_v15 = vmul.f32 0.2, %v325_v13  ;;  %vm397_vm7 = vcmp.gt.f32.partialorder %v333_v14, 0.0  ;;  %v461_v20 = vmul.f32 0.2, %v333_v14 }
 0x244   :  { %v6042_v24 = vpop.xlane.xlu1 %293  ;;  %v6044_v26 = vpop.xlane.xlu0 %296 }
 0x245   :  { %v341_v29 = vadd.f32 %v6042_v24, %v247_v54  ;;  %v349_v30 = vadd.f32 %v6044_v26, %v247_v54  ;;  %v6052_v31 = vsel %vm389_vm6, %v325_v13, %v453_v15  ;;  %v6054_v32 = vsel %vm397_vm7, %v333_v14, %v461_v20 }
 0x247   :  { %vm405_vm8 = vcmp.gt.f32.partialorder %v341_v29, 0.0  ;;  %v469_v10 = vmul.f32 0.2, %v341_v29  ;;  %vm413_vm9 = vcmp.gt.f32.partialorder %v349_v30, 0.0  ;;  %v477_v33 = vmul.f32 0.2, %v349_v30 }
 0x248   :  { %v6062_v38 = vpop.xlane.xlu1 %299  ;;  %v253_v39 = vpop.xlane.xlu0 %252 }
 0x249   :  { %v6064_v40 = vsel %vm405_vm8, %v341_v29, %v469_v10  ;;  %v6066_v41 = vsel %vm413_vm9, %v349_v30, %v477_v33  ;;  %v357_v44 = vadd.f32 %v6062_v38, %v247_v54  ;;  %v303_v12 = vadd.f32 %v6021_v55, %v253_v39 }
 0x24a   :  { %v311_v62 = vadd.f32 %v6024_v57, %v253_v39  ;;  %v319_v3 = vadd.f32 %v6026_v59, %v253_v39  ;;  %v327_v13 = vadd.f32 %v6031_v4, %v253_v39  ;;  %v335_v54 = vadd.f32 %v6033_v5, %v253_v39 }
 0x24b   :  { %v485_v8 = vmul.f32 0.2, %v357_v44  ;;  %vm421_vm10 = vcmp.gt.f32.partialorder %v357_v44, 0.0  ;;  %v343_v15 = vadd.f32 %v6042_v24, %v253_v39  ;;  %v351_v20 = vadd.f32 %v6044_v26, %v253_v39 }
 0x24c   :  { %v6085_v29 = vadd.f32 %v6062_v38, %v253_v39  ;;  %vm367_vm11 = vcmp.gt.f32.partialorder %v303_v12, 0.0  ;;  %vm375_vm12 = vcmp.gt.f32.partialorder %v311_v62, 0.0  ;;  %vm383_vm13 = vcmp.gt.f32.partialorder %v319_v3, 0.0  ;;  %v256_v30 = vpop.xlane.xlu1 %255 }
 0x24d   :  { %vm391_vm14 = vcmp.gt.f32.partialorder %v327_v13, 0.0  ;;  %vm399_vm15 = vcmp.gt.f32.partialorder %v335_v54, 0.0  ;;  %vm407_vm0 = vcmp.gt.f32.partialorder %v343_v15, 0.0  ;;  %vm415_vm3 = vcmp.gt.f32.partialorder %v351_v20, 0.0 }
 0x24e   :  { %v6087_v10 = vsel %vm421_vm10, %v357_v44, %v485_v8  ;;  %v431_v33 = vmul.f32 0.2, %v303_v12  ;;  %v439_v1 = vmul.f32 0.2, %v311_v62  ;;  %v447_v0 = vmul.f32 0.2, %v319_v3 }
 0x24f   :  { %9526 = vst [vmem:[#allocation40_spill] sm:$0xff] %v6087_v10  ;;  %v455_v14 = vmul.f32 0.2, %v327_v13  ;;  %v463_v6 = vmul.f32 0.2, %v335_v54  ;;  %v304_v60 = vadd.f32 %v6021_v55, %v256_v30  ;;  %v312_v34 = vadd.f32 %v6024_v57, %v256_v30 }
 0x250   :  { %v471_v61 = vmul.f32 0.2, %v343_v15  ;;  %v479_v39 = vmul.f32 0.2, %v351_v20  ;;  %v6091_v37 = vsel %vm367_vm11, %v303_v12, %v431_v33  ;;  %v6094_v36 = vsel %vm375_vm12, %v311_v62, %v439_v1 }
 0x251   :  { %v6098_v44 = vsel %vm383_vm13, %v319_v3, %v447_v0  ;;  %v6101_v8 = vsel %vm391_vm14, %v327_v13, %v455_v14  ;;  %v6104_v43 = vsel %vm399_vm15, %v335_v54, %v463_v6  ;;  %v6110_v12 = vmul.f32 0.2, %v6085_v29 }
 0x252   :  { %v6107_v35 = vsel %vm407_vm0, %v343_v15, %v471_v61  ;;  %v6113_v1 = vsel %vm415_vm3, %v351_v20, %v479_v39  ;;  %v320_v54 = vadd.f32 %v6026_v59, %v256_v30  ;;  %v328_v14 = vadd.f32 %v6031_v4, %v256_v30  ;;  %v259_v61 = vpop.xlane.xlu0 %258 }
 0x253   :  { %9527 = vst [vmem:[#allocation41_spill] sm:$0xff] %v6107_v35  ;;  %9528 = vst [vmem:[#allocation42_spill] sm:$0xff] %v6110_v12  ;;  %v336_v15 = vadd.f32 %v6033_v5, %v256_v30  ;;  %v344_v20 = vadd.f32 %v6042_v24, %v256_v30  ;;  %v352_v39 = vadd.f32 %v6044_v26, %v256_v30  ;;  %vm368_vm4 = vcmp.gt.f32.partialorder %v304_v60, 0.0 }
 0x254   :  { %9529 = vst [vmem:[#allocation43_spill] sm:$0xff] %v6113_v1  ;;  %v6135_v6 = vadd.f32 %v6062_v38, %v256_v30  ;;  %vm376_vm5 = vcmp.gt.f32.partialorder %v312_v34, 0.0  ;;  %vm384_vm6 = vcmp.gt.f32.partialorder %v320_v54, 0.0  ;;  %vm392_vm7 = vcmp.gt.f32.partialorder %v328_v14, 0.0 }
 0x255   :  { %vm400_vm8 = vcmp.gt.f32.partialorder %v336_v15, 0.0  ;;  %vm408_vm9 = vcmp.gt.f32.partialorder %v344_v20, 0.0  ;;  %vm416_vm10 = vcmp.gt.f32.partialorder %v352_v39, 0.0  ;;  %v432_v13 = vmul.f32 0.2, %v304_v60 }
 0x256   :  { %v440_v3 = vmul.f32 0.2, %v312_v34  ;;  %v448_v0 = vmul.f32 0.2, %v320_v54  ;;  %v456_v62 = vmul.f32 0.2, %v328_v14  ;;  %v305_v33 = vadd.f32 %v6021_v55, %v259_v61 }
 0x257   :  { %v464_v18 = vmul.f32 0.2, %v336_v15  ;;  %v472_v2 = vmul.f32 0.2, %v344_v20  ;;  %v480_v7 = vmul.f32 0.2, %v352_v39  ;;  %v6139_v30 = vsel %vm368_vm4, %v304_v60, %v432_v13 }
 0x258   :  { %v313_v58 = vadd.f32 %v6024_v57, %v259_v61  ;;  %v6143_v63 = vsel %vm376_vm5, %v312_v34, %v440_v3  ;;  %v6146_v53 = vsel %vm384_vm6, %v320_v54, %v448_v0  ;;  %v6149_v56 = vsel %vm392_vm7, %v328_v14, %v456_v62 }
 0x259   :  { %v6152_v52 = vsel %vm400_vm8, %v336_v15, %v464_v18  ;;  %v6155_v42 = vmul.f32 0.2, %v6135_v6  ;;  %v6158_v60 = vsel %vm408_vm9, %v344_v20, %v472_v2  ;;  %v6161_v13 = vsel %vm416_vm10, %v352_v39, %v480_v7  ;;  %v262_v18 = vpop.xlane.xlu1 %261 }
 0x25a   :  { %9530 = vst [vmem:[#allocation44_spill] sm:$0xff] %v6152_v52  ;;  %9532 = vst [vmem:[#allocation46_spill] sm:$0xff] %v6158_v60  ;;  %v321_v7 = vadd.f32 %v6026_v59, %v259_v61  ;;  %v329_v54 = vadd.f32 %v6031_v4, %v259_v61  ;;  %v337_v14 = vadd.f32 %v6033_v5, %v259_v61  ;;  %vm369_vm11 = vcmp.gt.f32.partialorder %v305_v33, 0.0 }
 0x25b   :  { %9531 = vst [vmem:[#allocation45_spill] sm:$0xff] %v6155_v42  ;;  %9533 = vst [vmem:[#allocation47_spill] sm:$0xff] %v6161_v13  ;;  %v345_v20 = vadd.f32 %v6042_v24, %v259_v61  ;;  %v353_v39 = vadd.f32 %v6044_v26, %v259_v61  ;;  %vm377_vm12 = vcmp.gt.f32.partialorder %v313_v58, 0.0  ;;  %v433_v2 = vmul.f32 0.2, %v305_v33 }
 0x25c   :  { %vm385_vm13 = vcmp.gt.f32.partialorder %v321_v7, 0.0  ;;  %vm393_vm14 = vcmp.gt.f32.partialorder %v329_v54, 0.0  ;;  %vm401_vm15 = vcmp.gt.f32.partialorder %v337_v14, 0.0  ;;  %v441_v3 = vmul.f32 0.2, %v313_v58 }
 0x25d   :  { %vm409_vm0 = vcmp.gt.f32.partialorder %v345_v20, 0.0  ;;  %vm417_vm3 = vcmp.gt.f32.partialorder %v353_v39, 0.0  ;;  %v6183_v62 = vadd.f32 %v6062_v38, %v259_v61  ;;  %v449_v0 = vmul.f32 0.2, %v321_v7 }
 0x25e   :  { %v457_v34 = vmul.f32 0.2, %v329_v54  ;;  %v465_v15 = vmul.f32 0.2, %v337_v14  ;;  %v473_v23 = vmul.f32 0.2, %v345_v20  ;;  %v6186_v19 = vsel %vm369_vm11, %v305_v33, %v433_v2 }
 0x25f   :  { %v481_v25 = vmul.f32 0.2, %v353_v39  ;;  %v6189_v21 = vsel %vm377_vm12, %v313_v58, %v441_v3  ;;  %v6192_v16 = vsel %vm385_vm13, %v321_v7, %v449_v0  ;;  %v306_v11 = vadd.f32 %v6021_v55, %v262_v18  ;;  %v6227_v3 = vpop.xlane.xlu0 %264 }
 0x260   :  { %v6195_v17 = vsel %vm393_vm14, %v329_v54, %v457_v34  ;;  %v6198_v61 = vsel %vm401_vm15, %v337_v14, %v465_v15  ;;  %v6202_v51 = vsel %vm409_vm0, %v345_v20, %v473_v23  ;;  %v322_v7 = vadd.f32 %v6026_v59, %v262_v18 }
 0x261   :  { %9534 = vst [vmem:[#allocation48_spill] sm:$0xff] %v6198_v61  ;;  %9535 = vst [vmem:[#allocation49_spill] sm:$0xff] %v6202_v51  ;;  %v6205_v33 = vsel %vm417_vm3, %v353_v39, %v481_v25  ;;  %v314_v25 = vadd.f32 %v6024_v57, %v262_v18  ;;  %v330_v54 = vadd.f32 %v6031_v4, %v262_v18  ;;  %vm370_vm4 = vcmp.gt.f32.partialorder %v306_v11, 0.0  ;;  %v6287_v61 = vpop.xlane.xlu1 %267 }
 0x262   :  { %9536 = vst [vmem:[#allocation50_spill] sm:$0xff] %v6205_v33  ;;  %v338_v14 = vadd.f32 %v6033_v5, %v262_v18  ;;  %v346_v20 = vadd.f32 %v6042_v24, %v262_v18  ;;  %v354_v39 = vadd.f32 %v6044_v26, %v262_v18  ;;  %vm386_vm6 = vcmp.gt.f32.partialorder %v322_v7, 0.0 }
 0x263   :  { %vm378_vm5 = vcmp.gt.f32.partialorder %v314_v25, 0.0  ;;  %vm394_vm7 = vcmp.gt.f32.partialorder %v330_v54, 0.0  ;;  %v434_v23 = vmul.f32 0.2, %v306_v11  ;;  %v442_v2 = vmul.f32 0.2, %v314_v25 }
 0x264   :  { %vm402_vm8 = vcmp.gt.f32.partialorder %v338_v14, 0.0  ;;  %vm410_vm9 = vcmp.gt.f32.partialorder %v346_v20, 0.0  ;;  %vm418_vm10 = vcmp.gt.f32.partialorder %v354_v39, 0.0  ;;  %v6230_v34 = vadd.f32 %v6062_v38, %v262_v18 }
 0x265   :  { %v450_v0 = vmul.f32 0.2, %v322_v7  ;;  %v458_v15 = vmul.f32 0.2, %v330_v54  ;;  %v466_v58 = vmul.f32 0.2, %v338_v14  ;;  %v6233_v12 = vsel %vm370_vm4, %v306_v11, %v434_v23 }
 0x266   :  { %9537 = vst [vmem:[#allocation51_spill] sm:$0xff] %v6230_v34  ;;  %v474_v10 = vmul.f32 0.2, %v346_v20  ;;  %v482_v42 = vmul.f32 0.2, %v354_v39  ;;  %v6236_v50 = vsel %vm378_vm5, %v314_v25, %v442_v2  ;;  %v307_v33 = vadd.f32 %v6021_v55, %v6227_v3 }
 0x267   :  { %v6239_v49 = vsel %vm386_vm6, %v322_v7, %v450_v0  ;;  %v6242_v48 = vsel %vm394_vm7, %v330_v54, %v458_v15  ;;  %v6245_v18 = vsel %vm402_vm8, %v338_v14, %v466_v58  ;;  %v323_v7 = vadd.f32 %v6026_v59, %v6227_v3 }
 0x268   :  { %9538 = vst [vmem:[#allocation52_spill] sm:$0xff] %v6245_v18  ;;  %v6250_v51 = vsel %vm410_vm9, %v346_v20, %v474_v10  ;;  %v6253_v11 = vsel %vm418_vm10, %v354_v39, %v482_v42  ;;  %v315_v42 = vadd.f32 %v6024_v57, %v6227_v3  ;;  %v331_v54 = vadd.f32 %v6031_v4, %v6227_v3 }
 0x269   :  { %9539 = vst [vmem:[#allocation53_spill] sm:$0xff] %v6250_v51  ;;  %9540 = vst [vmem:[#allocation54_spill] sm:$0xff] %v6253_v11  ;;  %v339_v14 = vadd.f32 %v6033_v5, %v6227_v3  ;;  %v347_v15 = vadd.f32 %v6042_v24, %v6227_v3  ;;  %v355_v20 = vadd.f32 %v6044_v26, %v6227_v3  ;;  %vm371_vm11 = vcmp.gt.f32.partialorder %v307_v33, 0.0 }
 0x26a   :  { %v435_v39 = vmul.f32 0.2, %v307_v33  ;;  %vm379_vm12 = vcmp.gt.f32.partialorder %v315_v42, 0.0  ;;  %vm387_vm13 = vcmp.gt.f32.partialorder %v323_v7, 0.0  ;;  %vm395_vm14 = vcmp.gt.f32.partialorder %v331_v54, 0.0 }
 0x26b   :  { %vm403_vm15 = vcmp.gt.f32.partialorder %v339_v14, 0.0  ;;  %vm411_vm0 = vcmp.gt.f32.partialorder %v347_v15, 0.0  ;;  %vm419_vm3 = vcmp.gt.f32.partialorder %v355_v20, 0.0  ;;  %v443_v10 = vmul.f32 0.2, %v315_v42 }
 0x26c   :  { %v451_v25 = vmul.f32 0.2, %v323_v7  ;;  %v459_v58 = vmul.f32 0.2, %v331_v54  ;;  %v467_v23 = vmul.f32 0.2, %v339_v14  ;;  %v6279_v2 = vsel %vm371_vm11, %v307_v33, %v435_v39 }
 0x26d   :  { %v475_v0 = vmul.f32 0.2, %v347_v15  ;;  %v483_v18 = vmul.f32 0.2, %v355_v20  ;;  %v6283_v13 = vsel %vm379_vm12, %v315_v42, %v443_v10  ;;  %v308_v42 = vadd.f32 %v6021_v55, %v6287_v61 }
 0x26e   :  { %v6285_v60 = vsel %vm387_vm13, %v323_v7, %v451_v25  ;;  %v6289_v47 = vsel %vm395_vm14, %v331_v54, %v459_v58  ;;  %v6291_v46 = vsel %vm403_vm15, %v339_v14, %v467_v23  ;;  %v324_v7 = vadd.f32 %v6026_v59, %v6287_v61  ;;  %v250_v25 = vpop.xlane.xlu0 %249 }
 0x26f   :  { %9541 = vst [vmem:[#allocation55_spill] sm:$0xff] %v6291_v46  ;;  %v6293_v45 = vsel %vm411_vm0, %v347_v15, %v475_v0  ;;  %v6298_v39 = vsel %vm419_vm3, %v355_v20, %v483_v18  ;;  %v316_v18 = vadd.f32 %v6024_v57, %v6287_v61  ;;  %v332_v54 = vadd.f32 %v6031_v4, %v6287_v61 }
 0x270   :  { %9542 = vst [vmem:[#allocation56_spill] sm:$0xff] %v6293_v45  ;;  %9543 = vst [vmem:[#allocation57_spill] sm:$0xff] %v6298_v39  ;;  %v340_v14 = vadd.f32 %v6033_v5, %v6287_v61  ;;  %v348_v15 = vadd.f32 %v6042_v24, %v6287_v61  ;;  %v356_v20 = vadd.f32 %v6044_v26, %v6287_v61  ;;  %vm372_vm4 = vcmp.gt.f32.partialorder %v308_v42, 0.0 }
 0x271   :  { %vm380_vm5 = vcmp.gt.f32.partialorder %v316_v18, 0.0  ;;  %v436_v0 = vmul.f32 0.2, %v308_v42  ;;  %vm388_vm6 = vcmp.gt.f32.partialorder %v324_v7, 0.0  ;;  %vm396_vm7 = vcmp.gt.f32.partialorder %v332_v54, 0.0 }
 0x272   :  { %vm404_vm8 = vcmp.gt.f32.partialorder %v340_v14, 0.0  ;;  %vm412_vm9 = vcmp.gt.f32.partialorder %v348_v15, 0.0  ;;  %vm420_vm10 = vcmp.gt.f32.partialorder %v356_v20, 0.0  ;;  %v444_v51 = vmul.f32 0.2, %v316_v18 }
 0x273   :  { %v452_v23 = vmul.f32 0.2, %v324_v7  ;;  %v6324_v58 = vsel %vm372_vm4, %v308_v42, %v436_v0  ;;  %v460_v33 = vmul.f32 0.2, %v332_v54  ;;  %v468_v45 = vmul.f32 0.2, %v340_v14 }
 0x274   :  { %v476_v11 = vmul.f32 0.2, %v348_v15  ;;  %v484_v46 = vmul.f32 0.2, %v356_v20  ;;  %v6329_v34 = vsel %vm380_vm5, %v316_v18, %v444_v51  ;;  %v302_v10 = vadd.f32 %v6021_v55, %v250_v25 }
 0x275   :  { %v6331_v1 = vsel %vm388_vm6, %v324_v7, %v452_v23  ;;  %v6336_v52 = vsel %vm396_vm7, %v332_v54, %v460_v33  ;;  %v6339_v0 = vsel %vm404_vm8, %v340_v14, %v468_v45  ;;  %vm9401_vm11 = vcmask 1041409  }
 0x276   :  { %9544 = vst [vmem:[#allocation58_spill] sm:$0xff] %v6339_v0  ;;  %v6342_v42 = vsel %vm412_vm9, %v348_v15, %v476_v11  ;;  %v6346_v39 = vsel %vm420_vm10, %v356_v20, %v484_v46  ;;  %vm9400_vm12 = vcmask 1042434   ;;  %v310_v46 = vadd.f32 %v6024_v57, %v250_v25 }
 0x277   :  { %9545 = vst [vmem:[#allocation59_spill] sm:$0xff] %v6342_v42  ;;  %9546 = vst [vmem:[#allocation60_spill] sm:$0xff] %v6346_v39  ;;  %v318_v55 = vadd.f32 %v6026_v59, %v250_v25  ;;  %vm9399_vm13 = vcmask 1043459   ;;  %v326_v18 = vadd.f32 %v6031_v4, %v250_v25  ;;  %v334_v7 = vadd.f32 %v6033_v5, %v250_v25 }
 0x278   :  { %v342_v54 = vadd.f32 %v6042_v24, %v250_v25  ;;  %v350_v14 = vadd.f32 %v6044_v26, %v250_v25  ;;  %vm9398_vm14 = vcmask 1044484   ;;  %v358_v20 = vadd.f32 %v6062_v38, %v250_v25 }
 0x279   :  { %vm366_vm15 = vcmp.gt.f32.partialorder %v302_v10, 0.0  ;;  %vm374_vm0 = vcmp.gt.f32.partialorder %v310_v46, 0.0  ;;  %vm967_vm3 = vcmask 1045509   ;;  %vm382_vm4 = vcmp.gt.f32.partialorder %v318_v55, 0.0 }
 0x27a   :  { %vm390_vm5 = vcmp.gt.f32.partialorder %v326_v18, 0.0  ;;  %vm398_vm6 = vcmp.gt.f32.partialorder %v334_v7, 0.0  ;;  %vm406_vm7 = vcmp.gt.f32.partialorder %v342_v54, 0.0  ;;  %vm969_vm8 = vcmask 1046534  }
 0x27b   :  { %vm414_vm9 = vcmp.gt.f32.partialorder %v350_v14, 0.0  ;;  %vm422_vm10 = vcmp.gt.f32.partialorder %v358_v20, 0.0  ;;  %v430_v57 = vmul.f32 0.2, %v302_v10  ;;  %v438_v59 = vmul.f32 0.2, %v310_v46 }
 0x27c   :  { %v446_v4 = vmul.f32 0.2, %v318_v55  ;;  %v454_v5 = vmul.f32 0.2, %v326_v18  ;;  %v462_v24 = vmul.f32 0.2, %v334_v7  ;;  %v6369_v26 = vadd.f32 %v6062_v38, %v6227_v3 }
 0x27d   :  { %v470_v25 = vmul.f32 0.2, %v342_v54  ;;  %v478_v15 = vmul.f32 0.2, %v350_v14  ;;  %v486_v11 = vmul.f32 0.2, %v358_v20  ;;  %v494_v45 = vsel %vm366_vm15, %v302_v10, %v430_v57 }
 0x27e   :  { %v502_v33 = vsel %vm374_vm0, %v310_v46, %v438_v59  ;;  %v510_v23 = vsel %vm382_vm4, %v318_v55, %v446_v4  ;;  %v518_v51 = vsel %vm390_vm5, %v326_v18, %v454_v5  ;;  %v526_v35 = vsel %vm398_vm6, %v334_v7, %v462_v24 }
 0x27f   :  { %v534_v39 = vsel %vm406_vm7, %v342_v54, %v470_v25  ;;  %v542_v42 = vsel %vm414_vm9, %v350_v14, %v478_v15  ;;  %v710_v3 = vrot.slane %v494_v45, %v6038_v9  ;;  %v6381_v0 = vadd.f32 %v6062_v38, %v6287_v61 }
 0x280   :  { %v6384_v10 = vsel %vm422_vm10, %v358_v20, %v486_v11  ;;  %v742_v46 = vrot.slane %v502_v33, %v6038_v9  ;;  %v774_v55 = vrot.slane %v510_v23, %v6038_v9  ;;  %v806_v18 = vrot.slane %v518_v51, %v6038_v9 }
 0x281   :  { %v838_v7 = vrot.slane %v526_v35, %v6038_v9  ;;  %v870_v54 = vrot.slane %v534_v39, %v6038_v9  ;;  %v902_v14 = vrot.slane %v542_v42, %v6038_v9  ;;  %v9547_v45 = vrot.slane %v6040_v22, %v6038_v9 }
 0x282   :  { %v9548_v61 = vrot.slane %v6091_v37, %v6038_v9  ;;  %v9549_v23 = vrot.slane %v6046_v27, %v6038_v9  ;;  %v9550_v35 = vrot.slane %v6048_v28, %v6038_v9  ;;  %v9551_v22 = vrot.slane %v6052_v31, %v6038_v9 }
 0x283   :  { %v960_v38 = vsel %vm9401_vm11, %v710_v3, %v9547_v45  ;;  %v9552_v37 = vrot.slane %v6139_v30, %v6038_v9  ;;  %v9553_v27 = vrot.slane %v6094_v36, %v6038_v9  ;;  %v9554_v28 = vrot.slane %v6098_v44, %v6038_v9 }
 0x284   :  { %v962_v33 = vsel %vm9400_vm12, %v9548_v61, %v960_v38  ;;  %v973_v51 = vsel %vm9401_vm11, %v742_v46, %v9549_v23  ;;  %v980_v39 = vsel %vm9401_vm11, %v774_v55, %v9550_v35  ;;  %v987_v42 = vsel %vm9401_vm11, %v806_v18, %v9551_v22 }
 0x285   :  { %v964_v11 = vsel %vm9399_vm13, %v9552_v37, %v962_v33  ;;  %v974_v15 = vsel %vm9400_vm12, %v9553_v27, %v973_v51  ;;  %v981_v20 = vsel %vm9400_vm12, %v9554_v28, %v980_v39  ;;  %v9555_v31 = vrot.slane %v6101_v8, %v6038_v9 }
 0x286   :  { %v9556_v30 = vrot.slane %v6186_v19, %v6038_v9  ;;  %v9557_v36 = vrot.slane %v6143_v63, %v6038_v9  ;;  %v9558_v44 = vrot.slane %v6146_v53, %v6038_v9  ;;  %v9559_v8 = vrot.slane %v6149_v56, %v6038_v9 }
 0x287   :  { %v988_v57 = vsel %vm9400_vm12, %v9555_v31, %v987_v42  ;;  %vm423_vm15 = vcmp.gt.f32.partialorder %v6085_v29, 0.0  ;;  %v9560_v19 = vrot.slane %v6233_v12, %v6038_v9  ;;  %v9561_v63 = vrot.slane %v6189_v21, %v6038_v9 }
 0x288   :  { %v966_v59 = vsel %vm9398_vm14, %v9556_v30, %v964_v11  ;;  %v975_v4 = vsel %vm9399_vm13, %v9557_v36, %v974_v15  ;;  %v982_v5 = vsel %vm9399_vm13, %v9558_v44, %v981_v20  ;;  %v989_v24 = vsel %vm9399_vm13, %v9559_v8, %v988_v57  ;;  %v9587_v30 = vld [vmem:[#allocation34_spill] sm:$0xff]  ;;  %v9589_v36 = vld [vmem:[#allocation48_spill] sm:$0xff] }
 0x289   :  { %v968_v25 = vsel %vm967_vm3, %v9560_v19, %v966_v59  ;;  %v976_v3 = vsel %vm9398_vm14, %v9561_v63, %v975_v4  ;;  %v9562_v53 = vrot.slane %v6192_v16, %v6038_v9  ;;  %v9563_v56 = vrot.slane %v6195_v17, %v6038_v9  ;;  %v9588_v59 = vld [vmem:[#allocation35_spill] sm:$0xff] }
 0x28a   :  { %vm424_vm0 = vcmp.gt.f32.partialorder %v6135_v6, 0.0  ;;  %v9564_v12 = vrot.slane %v6279_v2, %v6038_v9  ;;  %v9565_v21 = vrot.slane %v6236_v50, %v6038_v9  ;;  %v9566_v16 = vrot.slane %v6239_v49, %v6038_v9  ;;  %v9593_v19 = vld [vmem:[#allocation47_spill] sm:$0xff] }
 0x28b   :  { %v983_v46 = vsel %vm9398_vm14, %v9562_v53, %v982_v5  ;;  %v990_v55 = vsel %vm9398_vm14, %v9563_v56, %v989_v24  ;;  %v9567_v17 = vrot.slane %v6242_v48, %v6038_v9  ;;  %v9568_v2 = vrot.slane %v6324_v58, %v6038_v9  ;;  %v9591_v5 = vld [vmem:[#allocation46_spill] sm:$0xff]  ;;  %v9597_v56 = vld [vmem:[#allocation49_spill] sm:$0xff] }
 0x28c   :  { %v970_v18 = vsel %vm969_vm8, %v9564_v12, %v968_v25  ;;  %v977_v45 = vsel %vm967_vm3, %v9565_v21, %v976_v3  ;;  %v984_v38 = vsel %vm967_vm3, %v9566_v16, %v983_v46  ;;  %v9569_v50 = vrot.slane %v6283_v13, %v6038_v9  ;;  %v9595_v3 = vld [vmem:[#allocation52_spill] sm:$0xff]  ;;  %v9601_v16 = vld [vmem:[#allocation55_spill] sm:$0xff] }
 0x28d   :  { %v991_v61 = vsel %vm967_vm3, %v9567_v17, %v990_v55  ;;  %v6482_v33 = vsel %vm971_vm1, %v9568_v2, %v970_v18  ;;  %v9570_v49 = vrot.slane %v6285_v60, %v6038_v9  ;;  %v9571_v48 = vrot.slane %v6289_v47, %v6038_v9  ;;  %v9599_v18 = vld [vmem:[#allocation50_spill] sm:$0xff] }
 0x28e   :  { %v978_v23 = vsel %vm969_vm8, %v9569_v50, %v977_v45  ;;  %v9572_v58 = vrot.slane %v6329_v34, %v6038_v9  ;;  %v9573_v13 = vrot.slane %v6331_v1, %v6038_v9  ;;  %v9574_v60 = vrot.slane %v6336_v52, %v6038_v9 }
 0x28f   :  { %v985_v51 = vsel %vm969_vm8, %v9570_v49, %v984_v38  ;;  %v992_v35 = vsel %vm969_vm8, %v9571_v48, %v991_v61  ;;  %v9575_v47 = vrot.slane %v6054_v32, %v6038_v9  ;;  %v9576_v34 = vrot.slane %v6104_v43, %v6038_v9  ;;  %v9579_v32 = vld [vmem:[#allocation44_spill] sm:$0xff]  ;;  %v9581_v43 = vld [vmem:[#allocation41_spill] sm:$0xff] }
 0x290   :  { %v979_v39 = vsel %vm971_vm1, %v9572_v58, %v978_v23  ;;  %v986_v22 = vsel %vm971_vm1, %v9573_v13, %v985_v51  ;;  %v6508_v42 = vsel %vm971_vm1, %v9574_v60, %v992_v35  ;;  %v9577_v1 = vrot.slane %v6064_v40, %v6038_v9  ;;  %v9583_v40 = vld [vmem:[#allocation43_spill] sm:$0xff]  ;;  %v9603_v61 = vld [vmem:[#allocation53_spill] sm:$0xff]  ;;  %v9605_v23 = vld [vmem:[#allocation54_spill] sm:$0xff] }
 0x291   :  { %v994_v37 = vsel %vm9401_vm11, %v838_v7, %v9575_v47  ;;  %v9578_v52 = vrot.slane %v6066_v41, %v6038_v9  ;;  %vm425_vm4 = vcmp.gt.f32.partialorder %v6183_v62, 0.0  ;;  %v9580_v7 = vrot.slane %v9579_v32, %v6038_v9  ;;  %v9585_v41 = vld [vmem:[#allocation51_spill] sm:$0xff]  ;;  %v9607_v35 = vld [vmem:[#allocation36_spill] sm:$0xff]  ;;  %v9608_v58 = vld [vmem:[#allocation37_spill] sm:$0xff] }
 0x292   :  { %v995_v11 = vsel %vm9400_vm12, %v9576_v34, %v994_v37  ;;  %v1001_v27 = vsel %vm9401_vm11, %v870_v54, %v9577_v1  ;;  %v9582_v20 = vrot.slane %v9581_v43, %v6038_v9  ;;  %v9584_v54 = vrot.slane %v9583_v40, %v6038_v9  ;;  %v9609_v13 = vld [vmem:[#allocation38_spill] sm:$0xff]  ;;  %v9612_v34 = vld [vmem:[#allocation56_spill] sm:$0xff] }
 0x293   :  { %v1008_v15 = vsel %vm9401_vm11, %v902_v14, %v9578_v52  ;;  %v996_v28 = vsel %vm9399_vm13, %v9580_v7, %v995_v11  ;;  %vm426_vm5 = vcmp.gt.f32.partialorder %v9585_v41, 0.0  ;;  %v9586_v14 = vld [vmem:[#allocation33_spill] sm:$0xff]  ;;  %vm613_vm9 = vcmp.gt.f32.partialorder %v9587_v30, 0.0  ;;  %v9610_v60 = vld [vmem:[#allocation58_spill] sm:$0xff]  ;;  %v9616_v7 = vld [vmem:[#allocation59_spill] sm:$0xff] }
 0x294   :  { %v1002_v31 = vsel %vm9400_vm12, %v9582_v20, %v1001_v27  ;;  %v1009_v57 = vsel %vm9400_vm12, %v9584_v54, %v1008_v15  ;;  %vm614_vm7 = vcmp.gt.f32.partialorder %v9586_v14, 0.0  ;;  %v9590_v4 = vrot.slane %v9589_v36, %v6038_v9  ;;  %v9614_v27 = vld [vmem:[#allocation57_spill] sm:$0xff]  ;;  %v9618_v20 = vld [vmem:[#allocation60_spill] sm:$0xff]  ;;  %v9620_v36 = vld [vmem:[#allocation42_spill] sm:$0xff] }
 0x295   :  { %v9592_v8 = vrot.slane %v9591_v5, %v6038_v9  ;;  %v9594_v25 = vrot.slane %v9593_v19, %v6038_v9  ;;  %vm427_vm2 = vcmp.gt.f32.partialorder %v6369_v26, 0.0  ;;  %v9596_v53 = vrot.slane %v9595_v3, %v6038_v9  ;;  %v6622_v19 = vpop.permute.xlu0 %611 }
 0x296   :  { %v997_v44 = vsel %vm9398_vm14, %v9590_v4, %v996_v28  ;;  %v9598_v55 = vrot.slane %v9597_v56, %v6038_v9  ;;  %v9600_v21 = vrot.slane %v9599_v18, %v6038_v9  ;;  %vm428_vm6 = vcmp.gt.f32.partialorder %v6381_v0, 0.0  ;;  %9622 = vst [vmem:[#allocation44_spill] sm:$0xff] %v6622_v19 }
 0x297   :  { %v1003_v24 = vsel %vm9399_vm13, %v9592_v8, %v1002_v31  ;;  %v1010_v63 = vsel %vm9399_vm13, %v9594_v25, %v1009_v57  ;;  %v998_v46 = vsel %vm967_vm3, %v9596_v53, %v997_v44  ;;  %v9602_v38 = vrot.slane %v9601_v16, %v6038_v9  ;;  %v9621_v44 = vld [vmem:[#allocation45_spill] sm:$0xff] }
 0x298   :  { %v1004_v12 = vsel %vm9398_vm14, %v9598_v55, %v1003_v24  ;;  %v1011_v45 = vsel %vm9398_vm14, %v9600_v21, %v1010_v63  ;;  %v9604_v2 = vrot.slane %v9603_v61, %v6038_v9  ;;  %v9606_v49 = vrot.slane %v9605_v23, %v6038_v9  ;;  %v9624_v55 = vld [vmem:[#allocation39_spill] sm:$0xff] }
 0x299   :  { %v999_v17 = vsel %vm969_vm8, %v9602_v38, %v998_v46  ;;  %v489_v48 = vmul.f32 0.2, %v6183_v62  ;;  %vm616_vm14 = vcmp.gt.f32.partialorder %v9607_v35, 0.0  ;;  %vm9423_vm13 = vcmp.gt.f32.partialorder %v9608_v58, 0.0 }
 0x29a   :  { %v1005_v50 = vsel %vm967_vm3, %v9604_v2, %v1004_v12  ;;  %v1012_v51 = vsel %vm967_vm3, %v9606_v49, %v1011_v45  ;;  %vm9415_vm10 = vcmp.gt.f32.partialorder %v9609_v13, 0.0  ;;  %v9611_v47 = vrot.slane %v9610_v60, %v6038_v9 }
 0x29b   :  { %v9613_v11 = vrot.slane %v9612_v34, %v6038_v9  ;;  %v9615_v52 = vrot.slane %v9614_v27, %v6038_v9  ;;  %v490_v32 = vmul.f32 0.2, %v9585_v41  ;;  %v9617_v28 = vrot.slane %v9616_v7, %v6038_v9 }
 0x29c   :  { %v1000_v37 = vsel %vm971_vm1, %v9611_v47, %v999_v17  ;;  %v9619_v31 = vrot.slane %v9618_v20, %v6038_v9  ;;  %v491_v54 = vmul.f32 0.2, %v6369_v26  ;;  %v492_v57 = vmul.f32 0.2, %v6381_v0 }
 0x29d   :  { %v1006_v1 = vsel %vm969_vm8, %v9613_v11, %v1005_v50  ;;  %v1013_v15 = vsel %vm969_vm8, %v9615_v52, %v1012_v51  ;;  %v551_v4 = vsel %vm423_vm15, %v6085_v29, %v9620_v36  ;;  %v552_v5 = vsel %vm424_vm0, %v6135_v6, %v9621_v44  ;;  %v9623_v6 = vld [vmem:[#allocation40_spill] sm:$0xff] }
 0x29e   :  { %v1007_v43 = vsel %vm971_vm1, %v9617_v28, %v1006_v1  ;;  %v1014_v40 = vsel %vm971_vm1, %v9619_v31, %v1013_v15  ;;  %v553_v8 = vsel %vm425_vm4, %v6183_v62, %v489_v48  ;;  %v554_v24 = vsel %vm426_vm5, %v9585_v41, %v490_v32 }
 0x29f   :  { %v555_v25 = vsel %vm427_vm2, %v6369_v26, %v491_v54  ;;  %v556_v29 = vsel %vm428_vm6, %v6381_v0, %v492_v57  ;;  %v930_v63 = vrot.slane %v9623_v6, %v6038_v9  ;;  %v934_v62 = vrot.slane %v6384_v10, %v6038_v9 }
 0x2a0   :  { %v938_v3 = vrot.slane %v551_v4, %v6038_v9  ;;  %v942_v41 = vrot.slane %v552_v5, %v6038_v9  ;;  %v946_v53 = vrot.slane %v553_v8, %v6038_v9  ;;  %v950_v46 = vrot.slane %v554_v24, %v6038_v9 }
 0x2a1   :  { %v954_v26 = vrot.slane %v555_v25, %v6038_v9  ;;  %v958_v56 = vrot.slane %v556_v29, %v6038_v9  ;;  %v1015_v0 = vsel %vm9401_vm11, %v934_v62, %v930_v63  ;;  %vm9413_vm2 = vcmp.gt.f32.partialorder %v6622_v19, 0.0 }
 0x2a2   :  { %vm9414_vm15 = vcmp.gt.f32.partialorder %v9624_v55, 0.0  ;;  %v1016_v10 = vsel %vm9400_vm12, %v938_v3, %v1015_v0  ;;  %v6647_v12 = vsel %vm613_vm9, %v6482_v33, -1e+30  ;;  %v6651_v18 = vsel %vm614_vm7, %v979_v39, -1e+30 }
 0x2a3   :  { %vm9625_vm0 = vcmp.gt.f32.partialorder %v9588_v59, 0.0  ;;  %vm9626_vm4 = vcmask 1043459   ;;  %vm9627_vm5 = vcmask 31744   ;;  %vm9630_vm11 = vcmask 1044484  }
 0x2a4   :  { %v6655_v21 = vsel %vm9625_vm0, %v986_v22, -1e+30  ;;  %v1017_v45 = vsel %vm9626_vm4, %v942_v41, %v1016_v10  ;;  %v1039_v16 = vsel %vm9627_vm5, %v6647_v12, -inf  ;;  %vm9628_vm6 = vmmov %vm9627_vm5  ;;  %v6669_v22 = vsel %vm616_vm14, %v6508_v42, -1e+30 }
 0x2a5   :  { %v1046_v38 = vsel %vm9628_vm6, %v6651_v18, -inf  ;;  %vm9629_vm12 = vmmov %vm9627_vm5  ;;  %v1018_v17 = vsel %vm9630_vm11, %v946_v53, %v1017_v45  ;;  %v1040_v61 = vrot.slane %v1039_v16, 4  ;;  %v6673_v23 = vsel %vm9423_vm13, %v1000_v37, -1e+30 }
 0x2a6   :  { %v1053_v33 = vsel %vm9629_vm12, %v6655_v21, -inf  ;;  %v1047_v39 = vrot.slane %v1046_v38, 4  ;;  %v1019_v50 = vsel %vm967_vm3, %v950_v46, %v1018_v17  ;;  %v6677_v49 = vsel %vm9415_vm10, %v1007_v43, -1e+30  ;;  %vm9631_vm11 = vmmov %vm9627_vm5 }
 0x2a7   :  { %v1054_v2 = vrot.slane %v1053_v33, 4  ;;  %v1020_v51 = vsel %vm969_vm8, %v954_v26, %v1019_v50  ;;  %v1041_v48 = vmax.f32 %v1039_v16, %v1040_v61  ;;  %v1060_v11 = vsel %vm9631_vm11, %v6669_v22, -inf  ;;  %vm9632_vm12 = vmmov %vm9627_vm5 }
 0x2a8   :  { %v1048_v60 = vmax.f32 %v1046_v38, %v1047_v39  ;;  %v1021_v34 = vsel %vm971_vm1, %v958_v56, %v1020_v51  ;;  %v1067_v42 = vsel %vm9632_vm12, %v6673_v23, -inf  ;;  %vm9633_vm0 = vmmov %vm9627_vm5  ;;  %v1061_v7 = vrot.slane %v1060_v11, 4 }
 0x2a9   :  { %v1055_v47 = vmax.f32 %v1053_v33, %v1054_v2  ;;  %v1074_v37 = vsel %vm9633_vm0, %v6677_v49, -inf  ;;  %v1037_v1 = vsel %vm9413_vm2, %v1021_v34, -1e+30  ;;  %v1042_v27 = vrot.slane %v1041_v48, 2  ;;  %vm9634_vm4 = vmmov %vm9633_vm0 }
 0x2aa   :  { %v1049_v52 = vrot.slane %v1048_v60, 2  ;;  %v1088_v32 = vsel %vm9634_vm4, %v1037_v1, -inf  ;;  %v1068_v28 = vrot.slane %v1067_v42, 4  ;;  %v1075_v43 = vrot.slane %v1074_v37, 4  ;;  %vm9635_vm5 = vmmov %vm9633_vm0 }
 0x2ab   :  { %v1056_v15 = vrot.slane %v1055_v47, 2  ;;  %v1089_v20 = vrot.slane %v1088_v32, 4  ;;  %v1043_v31 = vmax.f32 %v1041_v48, %v1042_v27  ;;  %v1062_v36 = vmax.f32 %v1060_v11, %v1061_v7  ;;  %vm9636_vm6 = vmmov %vm9633_vm0 }
 0x2ac   :  { %v1050_v54 = vmax.f32 %v1048_v60, %v1049_v52  ;;  %v1069_v4 = vmax.f32 %v1067_v42, %v1068_v28  ;;  %v1076_v44 = vmax.f32 %v1074_v37, %v1075_v43  ;;  %v1036_v5 = vsel %vm9414_vm15, %v1014_v40, -1e+30  ;;  %vm9637_vm11 = vmmov %vm9633_vm0 }
 0x2ad   :  { %v1057_v57 = vmax.f32 %v1055_v47, %v1056_v15  ;;  %v1090_v8 = vmax.f32 %v1088_v32, %v1089_v20  ;;  %v1044_v24 = vrot.slane %v1043_v31, 1  ;;  %v1063_v6 = vrot.slane %v1062_v36, 2  ;;  %vm9639_vm4 = vmmov %vm9633_vm0 }
 0x2ae   :  { %v1051_v25 = vrot.slane %v1050_v54, 1  ;;  %v1070_v63 = vrot.slane %v1069_v4, 2  ;;  %v1077_v62 = vrot.slane %v1076_v44, 2  ;;  %v1081_v3 = vsel %vm9635_vm5, %v1036_v5, -inf  ;;  %vm9640_vm5 = vmmov %vm9633_vm0 }
 0x2af   :  { %v1058_v29 = vrot.slane %v1057_v57, 1  ;;  %v1091_v41 = vrot.slane %v1090_v8, 2  ;;  %v1045_v53 = vmax.f32 %v1043_v31, %v1044_v24  ;;  %v1064_v56 = vmax.f32 %v1062_v36, %v1063_v6 }
 0x2b0   :  { %v1052_v46 = vmax.f32 %v1050_v54, %v1051_v25  ;;  %v1071_v0 = vmax.f32 %v1069_v4, %v1070_v63  ;;  %v1078_v10 = vmax.f32 %v1076_v44, %v1077_v62  ;;  %v1082_v45 = vrot.slane %v1081_v3, 4 }
 0x2b1   :  { %v1059_v26 = vmax.f32 %v1057_v57, %v1058_v29  ;;  %v1092_v16 = vmax.f32 %v1090_v8, %v1091_v41  ;;  %v1095_v40 = vsub.f32 %v6647_v12, %v1045_v53  ;;  %v1065_v17 = vrot.slane %v1064_v56, 1 }
 0x2b2   :  { %v1096_v38 = vsub.f32 %v6651_v18, %v1052_v46  ;;  %v1072_v61 = vrot.slane %v1071_v0, 1  ;;  %v1079_v39 = vrot.slane %v1078_v10, 1  ;;  %v1083_v2 = vmax.f32 %v1081_v3, %v1082_v45 }
 0x2b3   :  { %v1097_v33 = vsub.f32 %v6655_v21, %v1059_v26  ;;  %v1093_v50 = vrot.slane %v1092_v16, 1  ;;  %v1103_v51 = vmul.f32 1.442695, %v1095_v40  ;;  %v1066_v47 = vmax.f32 %v1064_v56, %v1065_v17 }
 0x2b4   :  { %v1105_v48 = vmul.f32 1.442695, %v1096_v38  ;;  %v1073_v34 = vmax.f32 %v1071_v0, %v1072_v61  ;;  %v1080_v11 = vmax.f32 %v1078_v10, %v1079_v39  ;;  %v1084_v37 = vrot.slane %v1083_v2, 2 }
 0x2b5   :  { %v1107_v60 = vmul.f32 1.442695, %v1097_v33  ;;  %v1094_v42 = vmax.f32 %v1092_v16, %v1093_v50  ;;  %5555 = vpow2.f32 %v1103_v51  ;;  %v1098_v12 = vsub.f32 %v6669_v22, %v1066_v47 }
 0x2b6   :  { %5557 = vpow2.f32 %v1105_v48  ;;  %v1099_v18 = vsub.f32 %v6673_v23, %v1073_v34  ;;  %v1100_v21 = vsub.f32 %v6677_v49, %v1080_v11  ;;  %v1085_v52 = vmax.f32 %v1083_v2, %v1084_v37 }
 0x2b7   :  { %v1102_v27 = vsub.f32 %v1037_v1, %v1094_v42  ;;  %5559 = vpow2.f32 %v1107_v60  ;;  %v1109_v15 = vmul.f32 1.442695, %v1098_v12  ;;  %vm9638_vm12 = vcmp.gt.f32.partialorder %v9588_v59, 0.0 }
 0x2b8   :  { %v1111_v32 = vmul.f32 1.442695, %v1099_v18  ;;  %v1113_v28 = vmul.f32 1.442695, %v1100_v21  ;;  %v1086_v43 = vrot.slane %v1085_v52, 1 }
 0x2b9   :  { %v1117_v7 = vmul.f32 1.442695, %v1102_v27  ;;  %5561 = vpow2.f32 %v1109_v15 }
 0x2ba   :  { %v1087_v20 = vmax.f32 %v1085_v52, %v1086_v43 }
 0x2bb   :  { %5563 = vpow2.f32 %v1117_v7 }
 0x2bc   :  { %5565 = vpow2.f32 %v1111_v32  ;;  %v1101_v31 = vsub.f32 %v1036_v5, %v1087_v20 }
 0x2bd   :  { %5567 = vpow2.f32 %v1113_v28 }
 0x2be   :  { %v1115_v22 = vmul.f32 1.442695, %v1101_v31 }
 0x2bf   :  { %v5556_v54 = vpop.eup %5555 }
 0x2c0   :  { %v5558_v57 = vpop.eup %5557  ;;  %v6701_v23 = vsel %vm613_vm9, %v5556_v54, 0.0  ;;  %5569 = vpow2.f32 %v1115_v22 }
 0x2c1   :  { %v5560_v49 = vpop.eup %5559  ;;  %v1127_v1 = vsel %vm9636_vm6, %v6701_v23, 0.0  ;;  %v6707_v36 = vsel %vm614_vm7, %v5558_v57, 0.0  ;;  %vm9641_vm6 = vmmov %vm9633_vm0 }
 0x2c2   :  { %v1128_v4 = vrot.slane %v1127_v1, 4  ;;  %v1134_v44 = vsel %vm9637_vm11, %v6707_v36, 0.0  ;;  %v6713_v5 = vsel %vm9638_vm12, %v5560_v49, 0.0  ;;  %vm9642_vm11 = vmmov %vm9633_vm0 }
 0x2c3   :  { %v1135_v8 = vrot.slane %v1134_v44, 4  ;;  %v1141_v24 = vsel %vm9633_vm0, %v6713_v5, 0.0  ;;  %v5562_v25 = vpop.eup %5561  ;;  %vm9643_vm12 = vmmov %vm9633_vm0  ;;  %vm9654_vm0 = vcmask 60416  }
 0x2c4   :  { %v1129_v29 = vadd.f32 %v1128_v4, %v1127_v1  ;;  %v1142_v6 = vrot.slane %v1141_v24, 4  ;;  %v6719_v3 = vsel %vm616_vm14, %v5562_v25, 0.0 }
 0x2c5   :  { %v5564_v63 = vpop.eup %5563  ;;  %v1136_v62 = vadd.f32 %v1135_v8, %v1134_v44  ;;  %v1148_v56 = vsel %vm9639_vm4, %v6719_v3, 0.0  ;;  %vm9655_vm4 = vmmov %vm9654_vm0 }
 0x2c6   :  { %v5566_v41 = vpop.eup %5565  ;;  %v6723_v53 = vsel %vm9413_vm2, %v5564_v63, 0.0  ;;  %v1130_v46 = vrot.slane %v1129_v29, 2  ;;  %v1143_v26 = vadd.f32 %v1142_v6, %v1141_v24  ;;  %v1149_v45 = vrot.slane %v1148_v56, 4  ;;  %vm9662_vm2 = vmmov %vm9654_vm0 }
 0x2c7   :  { %v5568_v0 = vpop.eup %5567  ;;  %v1137_v10 = vrot.slane %v1136_v62, 2  ;;  %v6729_v16 = vsel %vm9423_vm13, %v5566_v41, 0.0  ;;  %v1176_v40 = vsel %vm9640_vm5, %v6723_v53, 0.0  ;;  %vm9657_vm5 = vmmov %vm9654_vm0 }
 0x2c8   :  { %v1131_v38 = vadd.f32 %v1130_v46, %v1129_v29  ;;  %v1144_v33 = vrot.slane %v1143_v26, 2  ;;  %v1155_v17 = vsel %vm9641_vm6, %v6729_v16, 0.0  ;;  %v1150_v39 = vadd.f32 %v1149_v45, %v1148_v56  ;;  %vm9658_vm6 = vmmov %vm9654_vm0 }
 0x2c9   :  { %v1138_v61 = vadd.f32 %v1137_v10, %v1136_v62  ;;  %v1156_v2 = vrot.slane %v1155_v17, 4  ;;  %v6737_v50 = vsel %vm9415_vm10, %v5568_v0, 0.0  ;;  %v1177_v12 = vrot.slane %v1176_v40, 4  ;;  %v9644_v10 = vld [vmem:[#allocation15_spill] sm:$0xff]  ;;  %vm9664_vm10 = vmmov %vm9654_vm0 }
 0x2ca   :  { %v1132_v51 = vrot.slane %v1131_v38, 1  ;;  %v1145_v48 = vadd.f32 %v1144_v33, %v1143_v26  ;;  %v1162_v60 = vsel %vm9642_vm11, %v6737_v50, 0.0  ;;  %v5570_v47 = vpop.eup %5569  ;;  %v1151_v11 = vrot.slane %v1150_v39, 2  ;;  %vm9659_vm11 = vmmov %vm9654_vm0 }
 0x2cb   :  { %v1139_v34 = vrot.slane %v1138_v61, 1  ;;  %v1157_v42 = vadd.f32 %v1156_v2, %v1155_v17  ;;  %v1163_v37 = vrot.slane %v1162_v60, 4  ;;  %v6743_v27 = vsel %vm9414_vm15, %v5570_v47, 0.0  ;;  %vm9663_vm15 = vmmov %vm9654_vm0 }
 0x2cc   :  { %v1133_v18 = vadd.f32 %v1132_v51, %v1131_v38  ;;  %v1146_v21 = vrot.slane %v1145_v48, 1  ;;  %v1152_v15 = vadd.f32 %v1151_v11, %v1150_v39  ;;  %v1169_v43 = vsel %vm9643_vm12, %v6743_v27, 0.0  ;;  %vm9660_vm12 = vmmov %vm9654_vm0 }
 0x2cd   :  { %v1140_v52 = vadd.f32 %v1139_v34, %v1138_v61  ;;  %v1158_v32 = vrot.slane %v1157_v42, 2  ;;  %v1164_v7 = vadd.f32 %v1163_v37, %v1162_v60  ;;  %v1170_v22 = vrot.slane %v1169_v43, 4 }
 0x2ce   :  { %5571 = vrcp.f32 %v1133_v18  ;;  %v1147_v28 = vadd.f32 %v1146_v21, %v1145_v48  ;;  %v1153_v20 = vrot.slane %v1152_v15, 1  ;;  %v1178_v57 = vadd.f32 %v1177_v12, %v1176_v40  ;;  %v9645_v40 = vld [vmem:[#allocation17_spill] sm:$0xff] }
 0x2cf   :  { %5573 = vrcp.f32 %v1140_v52  ;;  %v1159_v31 = vadd.f32 %v1158_v32, %v1157_v42  ;;  %v1165_v54 = vrot.slane %v1164_v7, 2  ;;  %v1171_v44 = vadd.f32 %v1170_v22, %v1169_v43 }
 0x2d0   :  { %5575 = vrcp.f32 %v1147_v28  ;;  %v1154_v49 = vadd.f32 %v1153_v20, %v1152_v15  ;;  %v1179_v24 = vrot.slane %v1178_v57, 2  ;;  %v9646_v20 = vld [vmem:[#allocation16_spill] sm:$0xff] }
 0x2d1   :  { %v1160_v1 = vrot.slane %v1159_v31, 1  ;;  %v1166_v4 = vadd.f32 %v1165_v54, %v1164_v7  ;;  %v1172_v8 = vrot.slane %v1171_v44, 2 }
 0x2d2   :  { %5577 = vrcp.f32 %v1154_v49  ;;  %v1180_v46 = vadd.f32 %v1179_v24, %v1178_v57 }
 0x2d3   :  { %v1161_v25 = vadd.f32 %v1160_v1, %v1159_v31  ;;  %v1167_v29 = vrot.slane %v1166_v4, 1  ;;  %v1173_v6 = vadd.f32 %v1172_v8, %v1171_v44  ;;  %v9647_v44 = vld [vmem:[#allocation19_spill] sm:$0xff] }
 0x2d4   :  { %v1181_v17 = vrot.slane %v1180_v46, 1 }
 0x2d5   :  { %5579 = vrcp.f32 %v1161_v25  ;;  %v1168_v26 = vadd.f32 %v1167_v29, %v1166_v4  ;;  %v1174_v56 = vrot.slane %v1173_v6, 1 }
 0x2d6   :  { %v1182_v48 = vadd.f32 %v1181_v17, %v1180_v46 }
 0x2d7   :  { %5581 = vrcp.f32 %v1168_v26  ;;  %v9648_v26 = vld [vmem:[#allocation18_spill] sm:$0xff] }
 0x2d8   :  { %v5572_v63 = vpop.eup %5571 }
 0x2d9   :  { %v5574_v62 = vpop.eup %5573  ;;  %v6748_v41 = vmul.f32 %v5572_v63, %v6701_v23  ;;  %v1175_v23 = vadd.f32 %v1174_v56, %v1173_v6 }
 0x2da   :  { %v5576_v0 = vpop.eup %5575  ;;  %v6755_v33 = vmul.f32 %v5574_v62, %v6707_v36 }
 0x2db   :  { %v1209_v45 = vrot.slane %v6748_v41, %v9644_v10  ;;  %v1202_v38 = vrot.slane %v6748_v41, %v9645_v40  ;;  %v6762_v2 = vmul.f32 %v5576_v0, %v6713_v5  ;;  %5583 = vrcp.f32 %v1175_v23 }
 0x2dc   :  { %v1265_v61 = vrot.slane %v6755_v33, %v9644_v10  ;;  %v1258_v39 = vrot.slane %v6755_v33, %v9645_v40  ;;  %v5578_v51 = vpop.eup %5577  ;;  %5585 = vrcp.f32 %v1182_v48  ;;  %v1216_v31 = vrot.slane %v6748_v41, %v9646_v20 }
 0x2dd   :  { %1211 = vbcast.lane.b32.xlu0 %v1209_v45, 256  ;;  %1204 = vbcast.lane.b32.xlu1 %v1202_v38, 256  ;;  %v1321_v36 = vrot.slane %v6762_v2, %v9644_v10  ;;  %v1314_v60 = vrot.slane %v6762_v2, %v9645_v40  ;;  %v6769_v47 = vmul.f32 %v5578_v51, %v6719_v3  ;;  %v9649_v51 = vld [vmem:[#allocation21_spill] sm:$0xff] }
 0x2de   :  { %v1328_v22 = vrot.slane %v6762_v2, %v9646_v20  ;;  %v1279_v8 = vrot.slane %v6755_v33, %v9647_v44  ;;  %v1223_v24 = vrot.slane %v6748_v41, %v9647_v44  ;;  %v1335_v29 = vrot.slane %v6762_v2, %v9647_v44 }
 0x2df   :  { %v5580_v34 = vpop.eup %5579  ;;  %v1377_v5 = vrot.slane %v6769_v47, %v9644_v10  ;;  %v1370_v11 = vrot.slane %v6769_v47, %v9645_v40  ;;  %v1384_v54 = vrot.slane %v6769_v47, %v9646_v20  ;;  %v1391_v25 = vrot.slane %v6769_v47, %v9647_v44 }
 0x2e0   :  { %v6776_v42 = vmul.f32 %v5580_v34, %v6729_v16  ;;  %v1286_v56 = vrot.slane %v6755_v33, %v9648_v26  ;;  %v1230_v0 = vrot.slane %v6748_v41, %v9648_v26  ;;  %v1398_v45 = vrot.slane %v6769_v47, %v9648_v26 }
 0x2e1   :  { %1267 = vbcast.lane.b32.xlu0 %v1265_v61, 256  ;;  %1260 = vbcast.lane.b32.xlu1 %v1258_v39, 256  ;;  %v5582_v37 = vpop.eup %5581  ;;  %v1342_v38 = vrot.slane %v6762_v2, %v9648_v26  ;;  %v1293_v48 = vrot.slane %v6755_v33, %v9649_v51  ;;  %v1349_v34 = vrot.slane %v6762_v2, %v9649_v51 }
 0x2e2   :  { %v1433_v3 = vrot.slane %v6776_v42, %v9644_v10  ;;  %v1426_v12 = vrot.slane %v6776_v42, %v9645_v40  ;;  %v6783_v18 = vmul.f32 %v5582_v37, %v6737_v50  ;;  %v1440_v49 = vrot.slane %v6776_v42, %v9646_v20 }
 0x2e3   :  { %v1447_v63 = vrot.slane %v6776_v42, %v9647_v44  ;;  %v1454_v23 = vrot.slane %v6776_v42, %v9648_v26 }
 0x2e4   :  { %v1489_v52 = vrot.slane %v6783_v18, %v9644_v10  ;;  %v1482_v16 = vrot.slane %v6783_v18, %v9645_v40  ;;  %v1496_v57 = vrot.slane %v6783_v18, %v9646_v20  ;;  %v1503_v6 = vrot.slane %v6783_v18, %v9647_v44 }
 0x2e5   :  { %1323 = vbcast.lane.b32.xlu0 %v1321_v36, 256  ;;  %1316 = vbcast.lane.b32.xlu1 %v1314_v60, 256  ;;  %v5584_v21 = vpop.eup %5583  ;;  %v1510_v17 = vrot.slane %v6783_v18, %v9648_v26  ;;  %v1237_v36 = vrot.slane %v6748_v41, %v9649_v51  ;;  %v1405_v60 = vrot.slane %v6769_v47, %v9649_v51 }
 0x2e6   :  { %v6790_v15 = vmul.f32 %v5584_v21, %v6743_v27  ;;  %v5586_v32 = vpop.eup %5585 }
 0x2e7   :  { %v6793_v7 = vmul.f32 %v5586_v32, %v6723_v53  ;;  %v1272_v53 = vrot.slane %v6755_v33, %v9646_v20 }
 0x2e8   :  { %v1545_v50 = vrot.slane %v6790_v15, %v9644_v10  ;;  %v1538_v28 = vrot.slane %v6790_v15, %v9645_v40  ;;  %v1552_v4 = vrot.slane %v6790_v15, %v9646_v20  ;;  %v1559_v46 = vrot.slane %v6790_v15, %v9647_v44 }
 0x2e9   :  { %1379 = vbcast.lane.b32.xlu0 %v1377_v5, 256  ;;  %1372 = vbcast.lane.b32.xlu1 %v1370_v11, 256  ;;  %v1601_v43 = vrot.slane %v6793_v7, %v9644_v10  ;;  %v1594_v27 = vrot.slane %v6793_v7, %v9645_v40  ;;  %v1608_v1 = vrot.slane %v6793_v7, %v9646_v20 }
 0x2ea   :  { %v1615_v62 = vrot.slane %v6793_v7, %v9647_v44  ;;  %v1622_v61 = vrot.slane %v6793_v7, %v9648_v26  ;;  %v1566_v39 = vrot.slane %v6790_v15, %v9648_v26  ;;  %v1517_v5 = vrot.slane %v6783_v18, %v9649_v51 }
 0x2eb   :  { %v1461_v11 = vrot.slane %v6776_v42, %v9649_v51  ;;  %v1629_v37 = vrot.slane %v6793_v7, %v9649_v51 }
 0x2ed   :  { %1435 = vbcast.lane.b32.xlu0 %v1433_v3, 256  ;;  %1428 = vbcast.lane.b32.xlu1 %v1426_v12, 256  ;;  %v1573_v3 = vrot.slane %v6790_v15, %v9649_v51  ;;  %v9650_v12 = vld [vmem:[#allocation20_spill] sm:$0xff] }
 0x2ee   :  { %v1300_v21 = vrot.slane %v6755_v33, %v9650_v12  ;;  %v1356_v32 = vrot.slane %v6762_v2, %v9650_v12 }
 0x2f1   :  { %1491 = vbcast.lane.b32.xlu0 %v1489_v52, 256  ;;  %1484 = vbcast.lane.b32.xlu1 %v1482_v16, 256  ;;  %v1244_v52 = vrot.slane %v6748_v41, %v9650_v12  ;;  %v1412_v16 = vrot.slane %v6769_v47, %v9650_v12 }
 0x2f5   :  { %1547 = vbcast.lane.b32.xlu0 %v1545_v50, 256  ;;  %1540 = vbcast.lane.b32.xlu1 %v1538_v28, 256  ;;  %v1524_v50 = vrot.slane %v6783_v18, %v9650_v12  ;;  %v1468_v28 = vrot.slane %v6776_v42, %v9650_v12 }
 0x2f9   :  { %1603 = vbcast.lane.b32.xlu0 %v1601_v43, 256  ;;  %1596 = vbcast.lane.b32.xlu1 %v1594_v27, 256  ;;  %v1636_v43 = vrot.slane %v6793_v7, %v9650_v12  ;;  %v1580_v27 = vrot.slane %v6790_v15, %v9650_v12 }
 0x2fd   :  { %1274 = vbcast.lane.b32.xlu0 %v1272_v53, 256  ;;  %1218 = vbcast.lane.b32.xlu1 %v1216_v31, 256  ;;  %v9651_v53 = vld [vmem:[#allocation32_spill] sm:$0xff] }
 0x2fe   :  { %v1307_v31 = vrot.slane %v6755_v33, %v9651_v53  ;;  %v1531_v33 = vrot.slane %v6783_v18, %v9651_v53 }
 0x301   :  { %1386 = vbcast.lane.b32.xlu0 %v1384_v54, 256  ;;  %1330 = vbcast.lane.b32.xlu1 %v1328_v22, 256  ;;  %v1251_v54 = vrot.slane %v6748_v41, %v9651_v53  ;;  %v1475_v41 = vrot.slane %v6776_v42, %v9651_v53 }
 0x305   :  { %1498 = vbcast.lane.b32.xlu0 %v1496_v57, 256  ;;  %1442 = vbcast.lane.b32.xlu1 %v1440_v49, 256  ;;  %v1419_v49 = vrot.slane %v6769_v47, %v9651_v53  ;;  %v1643_v47 = vrot.slane %v6793_v7, %v9651_v53 }
 0x309   :  { %1610 = vbcast.lane.b32.xlu0 %v1608_v1, 256  ;;  %1554 = vbcast.lane.b32.xlu1 %v1552_v4, 256  ;;  %v1363_v1 = vrot.slane %v6762_v2, %v9651_v53  ;;  %v1587_v2 = vrot.slane %v6790_v15, %v9651_v53 }
 0x30d   :  { %1281 = vbcast.lane.b32.xlu0 %v1279_v8, 256  ;;  %1225 = vbcast.lane.b32.xlu1 %v1223_v24, 256 }
 0x311   :  { %1393 = vbcast.lane.b32.xlu0 %v1391_v25, 256  ;;  %1337 = vbcast.lane.b32.xlu1 %v1335_v29, 256 }
 0x315   :  { %1505 = vbcast.lane.b32.xlu0 %v1503_v6, 256  ;;  %1449 = vbcast.lane.b32.xlu1 %v1447_v63, 256 }
 0x319   :  { %1617 = vbcast.lane.b32.xlu0 %v1615_v62, 256  ;;  %1561 = vbcast.lane.b32.xlu1 %v1559_v46, 256 }
 0x31d   :  { %1288 = vbcast.lane.b32.xlu0 %v1286_v56, 256  ;;  %1232 = vbcast.lane.b32.xlu1 %v1230_v0, 256 }
 0x321   :  { %1400 = vbcast.lane.b32.xlu0 %v1398_v45, 256  ;;  %1344 = vbcast.lane.b32.xlu1 %v1342_v38, 256 }
 0x325   :  { %1512 = vbcast.lane.b32.xlu0 %v1510_v17, 256  ;;  %1456 = vbcast.lane.b32.xlu1 %v1454_v23, 256 }
 0x329   :  { %1624 = vbcast.lane.b32.xlu0 %v1622_v61, 256  ;;  %1568 = vbcast.lane.b32.xlu1 %v1566_v39, 256 }
 0x32d   :  { %1295 = vbcast.lane.b32.xlu0 %v1293_v48, 256  ;;  %1239 = vbcast.lane.b32.xlu1 %v1237_v36, 256 }
 0x331   :  { %1407 = vbcast.lane.b32.xlu0 %v1405_v60, 256  ;;  %1351 = vbcast.lane.b32.xlu1 %v1349_v34, 256 }
 0x335   :  { %1519 = vbcast.lane.b32.xlu0 %v1517_v5, 256  ;;  %1463 = vbcast.lane.b32.xlu1 %v1461_v11, 256 }
 0x339   :  { %1631 = vbcast.lane.b32.xlu0 %v1629_v37, 256  ;;  %1575 = vbcast.lane.b32.xlu1 %v1573_v3, 256 }
 0x33d   :  { %1302 = vbcast.lane.b32.xlu0 %v1300_v21, 256  ;;  %1246 = vbcast.lane.b32.xlu1 %v1244_v52, 256 }
 0x341   :  { %1414 = vbcast.lane.b32.xlu0 %v1412_v16, 256  ;;  %1358 = vbcast.lane.b32.xlu1 %v1356_v32, 256 }
 0x345   :  { %1526 = vbcast.lane.b32.xlu0 %v1524_v50, 256  ;;  %1470 = vbcast.lane.b32.xlu1 %v1468_v28, 256 }
 0x349   :  { %1638 = vbcast.lane.b32.xlu0 %v1636_v43, 256  ;;  %1582 = vbcast.lane.b32.xlu1 %v1580_v27, 256 }
 0x34d   :  { %1309 = vbcast.lane.b32.xlu0 %v1307_v31, 256  ;;  %1253 = vbcast.lane.b32.xlu1 %v1251_v54, 256  ;;  %v9652_v54 = vld [vmem:[#allocation24_spill] sm:$0xff] }
 0x34f   :  { %v1205_v22 = vpop.permute.xlu1 %1204  ;;  %v1212_v57 = vpop.permute.xlu0 %1211 }
 0x351   :  { %1421 = vbcast.lane.b32.xlu0 %v1419_v49, 256  ;;  %1365 = vbcast.lane.b32.xlu1 %v1363_v1, 256  ;;  %v1647_v49 = vmul.f32 %v1205_v22, %v9652_v54  ;;  %v9653_v1 = vld [vmem:[#allocation26_spill] sm:$0xff] }
 0x353   :  { %v1261_v4 = vpop.permute.xlu1 %1260  ;;  %v1268_v8 = vpop.permute.xlu0 %1267 }
 0x354   :  { %v1655_v12 = vmul.f32 %v1261_v4, %v9652_v54  ;;  %v1656_v51 = vmul.f32 %v1268_v8, %v9653_v1 }
 0x355   :  { %1533 = vbcast.lane.b32.xlu0 %v1531_v33, 256  ;;  %1477 = vbcast.lane.b32.xlu1 %v1475_v41, 256  ;;  %v1648_v33 = vmul.f32 %v1212_v57, %v9653_v1 }
 0x356   :  { %v1726_v19 = vsel %vm9657_vm5, %v1655_v12, 0.0  ;;  %v1727_v55 = vsel %vm9658_vm6, %v1656_v51, 0.0  ;;  %vm9665_vm5 = vmmov %vm9654_vm0 }
 0x357   :  { %v1317_v24 = vpop.permute.xlu1 %1316  ;;  %v1324_v25 = vpop.permute.xlu0 %1323  ;;  %v1712_v53 = vsel %vm9655_vm4, %v1648_v33, 0.0  ;;  %v9656_v33 = vld [vmem:[#allocation25_spill] sm:$0xff]  ;;  %vm9661_vm4 = vmmov %vm9654_vm0 }
 0x358   :  { %v1663_v26 = vmul.f32 %v1317_v24, %v9652_v54  ;;  %v1664_v44 = vmul.f32 %v1324_v25, %v9653_v1  ;;  %vm9666_vm6 = vmmov %vm9654_vm0 }
 0x359   :  { %1645 = vbcast.lane.b32.xlu0 %v1643_v47, 256  ;;  %1589 = vbcast.lane.b32.xlu1 %v1587_v2, 256  ;;  %v1711_v2 = vsel %vm9654_vm0, %v1647_v49, 0.0 }
 0x35b   :  { %v1373_v29 = vpop.permute.xlu1 %1372  ;;  %v1380_v6 = vpop.permute.xlu0 %1379 }
 0x35c   :  { %v1671_v22 = vmul.f32 %v1373_v29, %v9652_v54  ;;  %v1672_v57 = vmul.f32 %v1380_v6, %v9653_v1 }
 0x35f   :  { %v1429_v63 = vpop.permute.xlu1 %1428  ;;  %v1436_v62 = vpop.permute.xlu0 %1435 }
 0x360   :  { %v1679_v20 = vmul.f32 %v1429_v63, %v9652_v54  ;;  %v1680_v40 = vmul.f32 %v1436_v62, %v9653_v1 }
 0x363   :  { %v1485_v18 = vpop.permute.xlu1 %1484  ;;  %v1492_v46 = vpop.permute.xlu0 %1491 }
 0x364   :  { %v1687_v4 = vmul.f32 %v1485_v18, %v9652_v54  ;;  %v1688_v8 = vmul.f32 %v1492_v46, %v9653_v1  ;;  %v1741_v18 = vsel %vm9659_vm11, %v1663_v26, 0.0  ;;  %v1742_v46 = vsel %vm9660_vm12, %v1664_v44, 0.0  ;;  %vm9667_vm11 = vmmov %vm9654_vm0 }
 0x365   :  { %vm9668_vm12 = vmmov %vm9654_vm0 }
 0x366   :  { %v1786_v12 = vsel %vm9664_vm10, %v1687_v4, 0.0  ;;  %v1787_v51 = vsel %vm9665_vm5, %v1688_v8, 0.0  ;;  %vm9671_vm10 = vmmov %vm9654_vm0 }
 0x367   :  { %v1541_v56 = vpop.permute.xlu1 %1540  ;;  %v1548_v42 = vpop.permute.xlu0 %1547  ;;  %v1788_v58 = vadd.f32 %v1787_v51, %v1786_v12  ;;  %vm9673_vm5 = vmmov %vm9654_vm0 }
 0x368   :  { %v1695_v24 = vmul.f32 %v1541_v56, %v9652_v54  ;;  %v1696_v25 = vmul.f32 %v1548_v42, %v9653_v1  ;;  %v1756_v56 = vsel %vm9654_vm0, %v1671_v22, 0.0  ;;  %v1757_v42 = vsel %vm9661_vm4, %v1672_v57, 0.0  ;;  %vm9669_vm4 = vmmov %vm9654_vm0 }
 0x36a   :  { %v1801_v26 = vsel %vm9666_vm6, %v1695_v24, 0.0  ;;  %v1802_v44 = vsel %vm9667_vm11, %v1696_v25, 0.0  ;;  %v1713_v24 = vadd.f32 %v1712_v53, %v1711_v2  ;;  %v1728_v25 = vadd.f32 %v1727_v55, %v1726_v19  ;;  %vm9674_vm6 = vmmov %vm9654_vm0 }
 0x36b   :  { %v1597_v0 = vpop.permute.xlu1 %1596  ;;  %v1604_v45 = vpop.permute.xlu0 %1603  ;;  %vm9675_vm11 = vmmov %vm9654_vm0 }
 0x36c   :  { %v1703_v29 = vmul.f32 %v1597_v0, %v9652_v54  ;;  %v1704_v6 = vmul.f32 %v1604_v45, %v9653_v1  ;;  %v1771_v0 = vsel %vm9662_vm2, %v1679_v20, 0.0  ;;  %v1772_v45 = vsel %vm9663_vm15, %v1680_v40, 0.0  ;;  %vm9670_vm2 = vmmov %vm9654_vm0 }
 0x36d   :  { %v1773_v13 = vadd.f32 %v1772_v45, %v1771_v0  ;;  %vm9672_vm15 = vmmov %vm9654_vm0 }
 0x36e   :  { %v1817_v1 = vsel %vm9654_vm0, %v1704_v6, 0.0 }
 0x36f   :  { %v1219_v38 = vpop.permute.xlu1 %1218  ;;  %v1275_v17 = vpop.permute.xlu0 %1274 }
 0x370   :  { %v1649_v63 = vmul.f32 %v1219_v38, %v9656_v33  ;;  %v1657_v62 = vmul.f32 %v1275_v17, %v9656_v33  ;;  %v1816_v17 = vsel %vm9668_vm12, %v1703_v29, 0.0  ;;  %vm9676_vm12 = vmmov %vm9654_vm0 }
 0x371   :  { %v1818_v35 = vadd.f32 %v1817_v1, %v1816_v17 }
 0x372   :  { %v1714_v20 = vsel %vm9669_vm4, %v1649_v63, 0.0  ;;  %v1729_v40 = vsel %vm9670_vm2, %v1657_v62, 0.0  ;;  %v1743_v62 = vadd.f32 %v1742_v46, %v1741_v18  ;;  %vm9678_vm4 = vmmov %vm9654_vm0 }
 0x373   :  { %v6899_v23 = vpop.permute.xlu1 %1330  ;;  %v6901_v7 = vpop.permute.xlu0 %1386  ;;  %v1715_v59 = vadd.f32 %v1714_v20, %v1713_v24  ;;  %vm9680_vm2 = vmmov %vm9654_vm0 }
 0x374   :  { %v1665_v22 = vmul.f32 %v6899_v23, %v9656_v33  ;;  %v1673_v57 = vmul.f32 %v6901_v7, %v9656_v33  ;;  %v1758_v7 = vadd.f32 %v1757_v42, %v1756_v56 }
 0x376   :  { %v1744_v19 = vsel %vm9671_vm10, %v1665_v22, 0.0  ;;  %v1759_v55 = vsel %vm9672_vm15, %v1673_v57, 0.0  ;;  %vm9681_vm10 = vmmov %vm9654_vm0 }
 0x377   :  { %v6903_v61 = vpop.permute.xlu1 %1442  ;;  %v6905_v15 = vpop.permute.xlu0 %1498  ;;  %vm9682_vm15 = vmmov %vm9654_vm0 }
 0x378   :  { %v1681_v4 = vmul.f32 %v6903_v61, %v9656_v33  ;;  %v1689_v8 = vmul.f32 %v6905_v15, %v9656_v33  ;;  %v1803_v61 = vadd.f32 %v1802_v44, %v1801_v26  ;;  %v1730_v15 = vadd.f32 %v1729_v40, %v1728_v25 }
 0x379   :  { %v1745_v26 = vadd.f32 %v1744_v19, %v1743_v62  ;;  %v1760_v44 = vadd.f32 %v1759_v55, %v1758_v7 }
 0x37a   :  { %v1774_v53 = vsel %vm9673_vm5, %v1681_v4, 0.0  ;;  %vm9683_vm5 = vmmov %vm9654_vm0 }
 0x37b   :  { %v6907_v39 = vpop.permute.xlu1 %1554  ;;  %v6909_v48 = vpop.permute.xlu0 %1610  ;;  %v1775_v17 = vadd.f32 %v1774_v53, %v1773_v13 }
 0x37c   :  { %v1697_v29 = vmul.f32 %v6907_v39, %v9656_v33  ;;  %v1705_v6 = vmul.f32 %v6909_v48, %v9656_v33  ;;  %v1789_v39 = vsel %vm9674_vm6, %v1689_v8, 0.0  ;;  %v9677_v33 = vld [vmem:[#allocation28_spill] sm:$0xff]  ;;  %vm9684_vm6 = vmmov %vm9654_vm0 }
 0x37d   :  { %v1790_v1 = vadd.f32 %v1789_v39, %v1788_v58 }
 0x37e   :  { %v1804_v48 = vsel %vm9675_vm11, %v1697_v29, 0.0  ;;  %v1819_v2 = vsel %vm9676_vm12, %v1705_v6, 0.0  ;;  %vm9685_vm11 = vmmov %vm9654_vm0 }
 0x37f   :  { %v6911_v36 = vpop.permute.xlu1 %1225  ;;  %v6913_v60 = vpop.permute.xlu0 %1281  ;;  %v1820_v20 = vadd.f32 %v1819_v2, %v1818_v35  ;;  %vm9686_vm12 = vmmov %vm9654_vm0 }
 0x380   :  { %v1650_v18 = vmul.f32 %v6911_v36, %v9677_v33  ;;  %v1658_v46 = vmul.f32 %v6913_v60, %v9677_v33 }
 0x382   :  { %v1731_v40 = vsel %vm9678_vm4, %v1658_v46, 0.0  ;;  %vm9687_vm4 = vmmov %vm9654_vm0 }
 0x383   :  { %v6915_v34 = vpop.permute.xlu1 %1337  ;;  %v6917_v5 = vpop.permute.xlu0 %1393  ;;  %v1732_v25 = vadd.f32 %v1731_v40, %v1730_v15  ;;  %v9689_v15 = vld [vmem:[#allocation30_spill] sm:$0xff] }
 0x384   :  { %v1666_v0 = vmul.f32 %v6915_v34, %v9677_v33  ;;  %v1674_v45 = vmul.f32 %v6917_v5, %v9677_v33  ;;  %v1805_v34 = vadd.f32 %v1804_v48, %v1803_v61  ;;  %v1716_v5 = vsel %vm9654_vm0, %v1650_v18, 0.0 }
 0x385   :  { %v1717_v24 = vadd.f32 %v1716_v5, %v1715_v59 }
 0x387   :  { %v6919_v11 = vpop.permute.xlu1 %1449  ;;  %v6921_v37 = vpop.permute.xlu0 %1505 }
 0x388   :  { %v1682_v12 = vmul.f32 %v6919_v11, %v9677_v33  ;;  %v1690_v51 = vmul.f32 %v6921_v37, %v9677_v33  ;;  %v9679_v11 = vld [vmem:[#allocation27_spill] sm:$0xff] }
 0x38a   :  { %v1776_v58 = vsel %vm9682_vm15, %v1682_v12, 0.0  ;;  %v1791_v35 = vsel %vm9683_vm5, %v1690_v51, 0.0  ;;  %vm9691_vm15 = vmmov %vm9654_vm0 }
 0x38b   :  { %v6923_v3 = vpop.permute.xlu1 %1561  ;;  %v6925_v21 = vpop.permute.xlu0 %1617  ;;  %v1792_v39 = vadd.f32 %v1791_v35, %v1790_v1  ;;  %vm9693_vm5 = vmmov %vm9654_vm0  ;;  %v9702_v35 = vld [vmem:[#allocation31_spill] sm:$0xff] }
 0x38c   :  { %v1698_v36 = vmul.f32 %v6923_v3, %v9677_v33  ;;  %v1706_v60 = vmul.f32 %v6925_v21, %v9677_v33  ;;  %v1746_v3 = vsel %vm9680_vm2, %v1666_v0, 0.0  ;;  %v1761_v21 = vsel %vm9681_vm10, %v1674_v45, 0.0  ;;  %vm9688_vm2 = vmmov %vm9654_vm0 }
 0x38d   :  { %v1747_v62 = vadd.f32 %v1746_v3, %v1745_v26  ;;  %v1762_v7 = vadd.f32 %v1761_v21, %v1760_v44  ;;  %vm9690_vm10 = vmmov %vm9654_vm0 }
 0x38e   :  { %v1806_v13 = vsel %vm9684_vm6, %v1698_v36, 0.0  ;;  %v1821_v8 = vsel %vm9685_vm11, %v1706_v60, 0.0  ;;  %v9692_v60 = vld [vmem:[#allocation29_spill] sm:$0xff]  ;;  %vm9694_vm6 = vmmov %vm9654_vm0 }
 0x38f   :  { %v6927_v52 = vpop.permute.xlu1 %1232  ;;  %v6929_v16 = vpop.permute.xlu0 %1288  ;;  %v7051_v48 = vadd.f32 %v1806_v13, %v1805_v34  ;;  %v7053_v59 = vadd.f32 %v1821_v8, %v1820_v20  ;;  %vm9695_vm11 = vmmov %vm9654_vm0 }
 0x390   :  { %v1651_v22 = vmul.f32 %v6927_v52, %v9679_v11  ;;  %v1659_v37 = vmul.f32 %v6929_v16, %v9679_v11 }
 0x392   :  { %v1718_v61 = vsel %vm9686_vm12, %v1651_v22, 0.0  ;;  %v1733_v19 = vsel %vm9654_vm0, %v1659_v37, 0.0  ;;  %vm9696_vm12 = vmmov %vm9654_vm0 }
 0x393   :  { %v6931_v32 = vpop.permute.xlu1 %1344  ;;  %v6933_v50 = vpop.permute.xlu0 %1400  ;;  %v1719_v33 = vadd.f32 %v1718_v61, %v1717_v24  ;;  %v1734_v18 = vadd.f32 %v1733_v19, %v1732_v25 }
 0x394   :  { %v1667_v52 = vmul.f32 %v6931_v32, %v9679_v11  ;;  %v1675_v16 = vmul.f32 %v6933_v50, %v9679_v11  ;;  %v1777_v32 = vadd.f32 %v1776_v58, %v1775_v17 }
 0x396   :  { %v1748_v50 = vsel %vm9687_vm4, %v1667_v52, 0.0  ;;  %vm9697_vm4 = vmmov %vm9654_vm0 }
 0x397   :  { %v6935_v28 = vpop.permute.xlu1 %1456  ;;  %v6937_v43 = vpop.permute.xlu0 %1512  ;;  %v1749_v44 = vadd.f32 %v1748_v50, %v1747_v62 }
 0x398   :  { %v1683_v29 = vmul.f32 %v6935_v28, %v9679_v11  ;;  %v1691_v6 = vmul.f32 %v6937_v43, %v9679_v11  ;;  %v1763_v28 = vsel %vm9688_vm2, %v1675_v16, 0.0  ;;  %vm9698_vm2 = vmmov %vm9654_vm0 }
 0x399   :  { %v1764_v36 = vadd.f32 %v1763_v28, %v1762_v7 }
 0x39a   :  { %v1778_v46 = vsel %vm9690_vm10, %v1683_v29, 0.0  ;;  %v1793_v0 = vsel %vm9691_vm15, %v1691_v6, 0.0  ;;  %vm9699_vm10 = vmmov %vm9654_vm0 }
 0x39b   :  { %v6939_v27 = vpop.permute.xlu1 %1568  ;;  %v6941_v31 = vpop.permute.xlu0 %1624  ;;  %v1794_v5 = vadd.f32 %v1793_v0, %v1792_v39  ;;  %vm9700_vm15 = vmmov %vm9654_vm0 }
 0x39c   :  { %v1699_v45 = vmul.f32 %v6939_v27, %v9679_v11  ;;  %v1707_v12 = vmul.f32 %v6941_v31, %v9679_v11 }
 0x39f   :  { %v6945_v41 = vpop.permute.xlu1 %1239  ;;  %v6947_v47 = vpop.permute.xlu0 %1295 }
 0x3a0   :  { %v1652_v43 = vmul.f32 %v6945_v41, %v9689_v15  ;;  %v1660_v2 = vmul.f32 %v6947_v47, %v9689_v15 }
 0x3a2   :  { %v1720_v34 = vsel %vm9693_vm5, %v1652_v43, 0.0  ;;  %v1735_v27 = vsel %vm9694_vm6, %v1660_v2, 0.0  ;;  %vm9701_vm5 = vmmov %vm9654_vm0 }
 0x3a3   :  { %v6959_v10 = vpop.permute.xlu1 %1351  ;;  %v6961_v49 = vpop.permute.xlu0 %1407  ;;  %v1721_v3 = vadd.f32 %v1720_v34, %v1719_v33  ;;  %vm9703_vm6 = vmmov %vm9654_vm0 }
 0x3a4   :  { %v1668_v51 = vmul.f32 %v6959_v10, %v9689_v15  ;;  %v1676_v41 = vmul.f32 %v6961_v49, %v9689_v15  ;;  %v1779_v10 = vadd.f32 %v1778_v46, %v1777_v32 }
 0x3a6   :  { %v1750_v11 = vsel %vm9654_vm0, %v1668_v51, 0.0  ;;  %v1765_v22 = vsel %vm9697_vm4, %v1676_v41, 0.0  ;;  %vm9706_vm4 = vmmov %vm9654_vm0 }
 0x3a7   :  { %v6979_v54 = vpop.permute.xlu1 %1463  ;;  %v6981_v38 = vpop.permute.xlu0 %1519  ;;  %v1751_v52 = vadd.f32 %v1750_v11, %v1749_v44  ;;  %v1766_v16 = vadd.f32 %v1765_v22, %v1764_v36 }
 0x3a8   :  { %v1684_v49 = vmul.f32 %v6979_v54, %v9689_v15  ;;  %v1692_v40 = vmul.f32 %v6981_v38, %v9689_v15 }
 0x3aa   :  { %v1780_v24 = vsel %vm9703_vm6, %v1684_v49, 0.0  ;;  %vm9711_vm6 = vmmov %vm9654_vm0 }
 0x3ab   :  { %v7003_v63 = vpop.permute.xlu1 %1575  ;;  %v7005_v23 = vpop.permute.xlu0 %1631  ;;  %v1781_v49 = vadd.f32 %v1780_v24, %v1779_v10 }
 0x3ac   :  { %v1700_v29 = vmul.f32 %v7003_v63, %v9689_v15  ;;  %v1708_v6 = vmul.f32 %v7005_v23, %v9689_v15 }
 0x3af   :  { %v1247_v56 = vpop.permute.xlu1 %1246  ;;  %v1303_v42 = vpop.permute.xlu0 %1302 }
 0x3b0   :  { %v1653_v17 = vmul.f32 %v1247_v56, %v9692_v60  ;;  %v1661_v1 = vmul.f32 %v1303_v42, %v9692_v60  ;;  %v1808_v56 = vsel %vm9695_vm11, %v1699_v45, 0.0  ;;  %v1823_v42 = vsel %vm9696_vm12, %v1707_v12, 0.0  ;;  %vm9704_vm11 = vmmov %vm9654_vm0 }
 0x3b1   :  { %v1795_v25 = vsel %vm9704_vm11, %v1692_v40, 0.0  ;;  %vm9705_vm12 = vmmov %vm9654_vm0 }
 0x3b2   :  { %v1722_v21 = vsel %vm9698_vm2, %v1653_v17, 0.0  ;;  %v1737_v58 = vsel %vm9699_vm10, %v1661_v1, 0.0  ;;  %vm9707_vm2 = vmmov %vm9654_vm0  ;;  %v1796_v40 = vadd.f32 %v1795_v25, %v1794_v5 }
 0x3b3   :  { %v1359_v57 = vpop.permute.xlu1 %1358  ;;  %v1415_v4 = vpop.permute.xlu0 %1414  ;;  %v1723_v62 = vadd.f32 %v1722_v21, %v1721_v3  ;;  %vm9708_vm10 = vmmov %vm9654_vm0 }
 0x3b4   :  { %v1669_v31 = vmul.f32 %v1359_v57, %v9692_v60  ;;  %v1677_v20 = vmul.f32 %v1415_v4, %v9692_v60  ;;  %v1736_v4 = vadd.f32 %v1735_v27, %v1734_v18  ;;  %v1810_v0 = vsel %vm9708_vm10, %v1700_v29, 0.0  ;;  %vm9712_vm11 = vmmov %vm9654_vm0 }
 0x3b5   :  { %vm9717_vm10 = vmmov %vm9654_vm0 }
 0x3b6   :  { %v1752_v54 = vsel %vm9700_vm15, %v1669_v31, 0.0  ;;  %v1767_v38 = vsel %vm9701_vm5, %v1677_v20, 0.0  ;;  %v1738_v7 = vadd.f32 %v1737_v58, %v1736_v4  ;;  %vm9709_vm15 = vmmov %vm9654_vm0 }
 0x3b7   :  { %v1471_v55 = vpop.permute.xlu1 %1470  ;;  %v1527_v53 = vpop.permute.xlu0 %1526  ;;  %v1753_v32 = vadd.f32 %v1752_v54, %v1751_v52  ;;  %v1768_v39 = vadd.f32 %v1767_v38, %v1766_v16  ;;  %v1825_v45 = vsel %vm9709_vm15, %v1708_v6, 0.0  ;;  %vm9710_vm5 = vmmov %vm9654_vm0  ;;  %v9715_v54 = vld [vmem:[#allocation22_spill] sm:$0xff]  ;;  %vm9422_vm15 = vcmask 64512  }
 0x3b8   :  { %v1685_v43 = vmul.f32 %v1471_v55, %v9692_v60  ;;  %v1693_v2 = vmul.f32 %v1527_v53, %v9692_v60 }
 0x3ba   :  { %v1782_v17 = vsel %vm9710_vm5, %v1685_v43, 0.0  ;;  %v1797_v1 = vsel %vm9711_vm6, %v1693_v2, 0.0  ;;  %v1927_v2 = vld [vmem:[#allocation7 + $0x20] sm:$0xff]  ;;  %vm9421_vm5 = vcmask 130048   ;;  %vm9420_vm6 = vcmask 195584  }
 0x3bb   :  { %v1583_v26 = vpop.permute.xlu1 %1582  ;;  %v1639_v47 = vpop.permute.xlu0 %1638  ;;  %v1783_v3 = vadd.f32 %v1782_v17, %v1781_v49  ;;  %v1798_v4 = vadd.f32 %v1797_v1, %v1796_v40  ;;  %v5651_v1 = vld [vmem:[#allocation2] sm:$0xff] }
 0x3bc   :  { %v1701_v23 = vmul.f32 %v1583_v26, %v9692_v60  ;;  %v1709_v15 = vmul.f32 %v1639_v47, %v9692_v60  ;;  %v1809_v47 = vadd.f32 %v1808_v56, %v7051_v48  ;;  %v1824_v60 = vadd.f32 %v1823_v42, %v7053_v59 }
 0x3be   :  { %v1812_v34 = vsel %vm9712_vm11, %v1701_v23, 0.0  ;;  %v1811_v11 = vadd.f32 %v1810_v0, %v1809_v47  ;;  %v1826_v22 = vadd.f32 %v1825_v45, %v1824_v60  ;;  %vm9720_vm11 = vcmask 261120  }
 0x3bf   :  { %v1254_v37 = vpop.permute.xlu1 %1253  ;;  %v1310_v57 = vpop.permute.xlu0 %1309 }
 0x3c0   :  { %v1654_v13 = vmul.f32 %v1254_v37, %v9702_v35  ;;  %v1662_v8 = vmul.f32 %v1310_v57, %v9702_v35  ;;  %v1813_v21 = vadd.f32 %v1812_v34, %v1811_v11 }
 0x3c2   :  { %v1724_v33 = vsel %vm9705_vm12, %v1654_v13, 0.0  ;;  %v1739_v63 = vsel %vm9654_vm0, %v1662_v8, 0.0  ;;  %vm9713_vm12 = vmmov %vm9654_vm0 }
 0x3c3   :  { %v1366_v61 = vpop.permute.xlu1 %1365  ;;  %v1422_v19 = vpop.permute.xlu0 %1421  ;;  %v1725_v41 = vadd.f32 %v1724_v33, %v1723_v62  ;;  %v1740_v44 = vadd.f32 %v1739_v63, %v1738_v7  ;;  %v1827_v27 = vsel %vm9713_vm12, %v1709_v15, 0.0  ;;  %v1928_v33 = vld [vmem:[#allocation7 + $0x28] sm:$0xff]  ;;  %v1929_v63 = vld [vmem:[#allocation7 + $0x30] sm:$0xff]  ;;  %v1930_v15 = vld [vmem:[#allocation7 + $0x38] sm:$0xff] }
 0x3c4   :  { %v1670_v50 = vmul.f32 %v1366_v61, %v9702_v35  ;;  %v1678_v28 = vmul.f32 %v1422_v19, %v9702_v35  ;;  %v1828_v58 = vadd.f32 %v1827_v27, %v1826_v22  ;;  %v5525_v23 = vpack.c.bf16 %v1928_v33, %v1927_v2  ;;  %vm9726_vm12 = vmmov %vm9654_vm0 }
 0x3c5   :  { %v5528_v45 = vpack.c.bf16 %v1930_v15, %v1929_v63 }
 0x3c6   :  { %v1754_v18 = vsel %vm9706_vm4, %v1670_v50, 0.0  ;;  %v1769_v46 = vsel %vm9707_vm2, %v1678_v28, 0.0  ;;  %vm9714_vm4 = vmmov %vm9654_vm0  ;;  %5526 = vmatpush3.bf16.msra.mxu1 %v5525_v23 }
 0x3c7   :  { %v1755_v12 = vadd.f32 %v1754_v18, %v1753_v32  ;;  %v1770_v55 = vadd.f32 %v1769_v46, %v1768_v39  ;;  %v1478_v51 = vpop.permute.xlu1 %1477  ;;  %v1534_v53 = vpop.permute.xlu0 %1533  ;;  %vm9716_vm2 = vmmov %vm9654_vm0  ;;  %v9718_v32 = vld [vmem:[#allocation23_spill] sm:$0xff] }
 0x3c8   :  { %v1686_v36 = vmul.f32 %v1478_v51, %v9702_v35  ;;  %v1694_v26 = vmul.f32 %v1534_v53, %v9702_v35 }
 0x3c9   :  { %v1831_v31 = vcombine.low %v1725_v41, %v1755_v12  ;;  %v1839_v20 = vcombine.low %v1740_v44, %v1770_v55  ;;  %v9719_v12 = vmov 0.0|0.0   ;;  %v5461_v44 = vld [vmem:[%s9329_s5] ss:$0 sm:$0xff] }
 0x3ca   :  { %v1784_v48 = vsel %vm9654_vm0, %v1686_v36, 0.0  ;;  %v1799_v59 = vsel %vm9714_vm4, %v1694_v26, 0.0  ;;  %5527 = vmatprep.subr.bf16.mxu1 %v9719_v12  ;;  %vm9729_vm4 = vmmov %vm9654_vm0 }
 0x3cb   :  { %v1590_v37 = vpop.permute.xlu1 %1589  ;;  %v1646_v57 = vpop.permute.xlu0 %1645  ;;  %v1838_v38 = vrot.slane %v1831_v31, %v9715_v54  ;;  %v1846_v10 = vrot.slane %v1839_v20, %v9715_v54  ;;  %v1785_v8 = vadd.f32 %v1784_v48, %v1783_v3  ;;  %v1800_v52 = vadd.f32 %v1799_v59, %v1798_v4  ;;  %5529 = vmatpush3.bf16.msra.mxu1 %v5528_v45 }
 0x3cc   :  { %v1702_v56 = vmul.f32 %v1590_v37, %v9702_v35  ;;  %v1710_v42 = vmul.f32 %v1646_v57, %v9702_v35 }
 0x3cd   :  { %v1864_v62 = vcombine.high %v1838_v38, %v1846_v10  ;;  %v1863_v7 = vcombine.low %v1838_v38, %v1846_v10  ;;  %v1932_v38 = vld [vmem:[#allocation8 + $0x4] sm:$0xf] }
 0x3ce   :  { %v1814_v5 = vsel %vm9716_vm2, %v1702_v56, 0.0  ;;  %v1829_v13 = vsel %vm9717_vm10, %v1710_v42, 0.0  ;;  %vm9730_vm2 = vmmov %vm9654_vm0 }
 0x3cf   :  { %v1815_v16 = vadd.f32 %v1814_v5, %v1813_v21  ;;  %v1830_v24 = vadd.f32 %v1829_v13, %v1828_v58  ;;  %v1878_v39 = vrot.slane %v1864_v62, %v9718_v32  ;;  %v1871_v28 = vrot.slane %v1863_v7, %v9718_v32  ;;  %v5462_v58 = vld [vmem:[%s9328_s4 + $0x4] sm:$0xf]  ;;  %vm9732_vm10 = vmmov %vm9654_vm0 }
 0x3d1   :  { %v1847_v25 = vcombine.low %v1785_v8, %v1815_v16  ;;  %v1855_v29 = vcombine.low %v1800_v52, %v1830_v24  ;;  %v9723_v52 = vmov 0.0  }
 0x3d3   :  { %v1854_v35 = vrot.slane %v1847_v25, %v9715_v54  ;;  %v1862_v6 = vrot.slane %v1855_v29, %v9715_v54 }
 0x3d5   :  { %v1880_v61 = vcombine.high %v1854_v35, %v1862_v6  ;;  %v1879_v19 = vcombine.low %v1854_v35, %v1862_v6 }
 0x3d7   :  { %v1894_v50 = vrot.slane %v1880_v61, %v9718_v32  ;;  %v1887_v43 = vrot.slane %v1879_v19, %v9718_v32 }
 0x3d9   :  { %v1897_v18 = vcombine.low %v1878_v39, %v1894_v50  ;;  %v1896_v46 = vcombine.high %v1871_v28, %v1887_v43  ;;  %v1895_v0 = vcombine.low %v1871_v28, %v1887_v43  ;;  %v1898_v55 = vcombine.high %v1878_v39, %v1894_v50 }
 0x3db   :  { %1904 = vrot.lane.b32.xlu0 %v1897_v18, %s5788_s26  ;;  %1900 = vrot.lane.b32.xlu1 %v1896_v46, %s5776_s24 }
 0x3df   :  { %1908 = vrot.lane.b32.xlu1 %v1898_v55, %s5789_s27 }
 0x44d   :  { %v1901_v51 = vpop.permute.xlu1 %1900  ;;  %v1905_v53 = vpop.permute.xlu0 %1904 }
 0x44e   :  { %v1912_v41 = vsel %vm9422_vm15, %v1895_v0, %v1901_v51 }
 0x44f   :  { %v1914_v26 = vsel %vm9421_vm5, %v1912_v41, %v1905_v53 }
 0x451   :  { %v1909_v36 = vpop.permute.xlu1 %1908 }
 0x452   :  { %v1916_v47 = vsel %vm9420_vm6, %v1914_v26, %v1909_v36 }
 0x453   :  { %v1923_v60 = vadd.f32 %v5461_v44, %v1916_v47 }
 0x455   :  { %v1924_v17 = vmax.f32 %v1923_v60, 0.0 }
 0x457   :  { %v1925_v34 = vadd.f32 %v5651_v1, %v1924_v17 }
 0x459   :  { %5505 = vmatmul.mubr.msk.f32.vlgmr.msra.gmra.mrb[0].mxu1 %vm9720_vm11, %v1925_v34  ;;  %vm9733_vm11 = vmmov %vm9654_vm0 }
 0x52c   :  { %v2006_v27 = vpop.f32.mrb[0].mxu1 }
 0x52d   :  { %2014 = vrot.lane.b32.xlu1 %v2006_v27, %s5785_s22  ;;  %2011 = vrot.lane.b32.xlu0 %v2006_v27, %s5784_s21  ;;  %v5506_v31 = vpop.f32.mrb[1].mxu1 }
 0x531   :  { %2017 = vrot.lane.b32.xlu0 %v2006_v27, %s5783_s3 }
 0x59f   :  { %v2015_v20 = vpop.permute.xlu1 %2014  ;;  %v2012_v49 = vpop.permute.xlu0 %2011 }
 0x5a0   :  { %v2020_v40 = vcombine.low %v2006_v27, %v2015_v20  ;;  %v2021_v11 = vcombine.high %v2006_v27, %v2015_v20 }
 0x5a2   :  { %v2028_v48 = vrot.slane %v2020_v40, %v9715_v54  ;;  %v2035_v42 = vrot.slane %v2021_v11, %v9715_v54 }
 0x5a3   :  { %v2018_v22 = vpop.permute.xlu0 %2017 }
 0x5a4   :  { %v2036_v37 = vcombine.low %v2012_v49, %v2018_v22  ;;  %v2037_v57 = vcombine.high %v2012_v49, %v2018_v22 }
 0x5a6   :  { %v2044_v59 = vrot.slane %v2036_v37, %v9715_v54  ;;  %v2051_v56 = vrot.slane %v2037_v57, %v9715_v54 }
 0x5a8   :  { %v2052_v3 = vcombine.low %v2028_v48, %v2044_v59  ;;  %v2053_v4 = vcombine.high %v2028_v48, %v2044_v59  ;;  %v2068_v21 = vcombine.low %v2035_v42, %v2051_v56  ;;  %v2069_v24 = vcombine.high %v2035_v42, %v2051_v56 }
 0x5aa   :  { %v7153_v10 = vrot.slane %v2052_v3, %v9718_v32  ;;  %v7156_v5 = vrot.slane %v2053_v4, %v9718_v32  ;;  %v7165_v25 = vrot.slane %v2068_v21, %v9718_v32  ;;  %v7176_v61 = vrot.slane %v2069_v24, %v9718_v32 }
 0x5ac   :  { %9721 = vst [vmem:[#allocation41_spill] sm:$0xff] %v7153_v10  ;;  %9722 = vst [vmem:[#allocation43_spill] sm:$0xff] %v7156_v5  ;;  %v2120_v13 = vmul.f32 %v5462_v58, %v7153_v10  ;;  %v2088_v8 = vmul.f32 %v7153_v10, %v1932_v38  ;;  %v7162_v16 = vcombine.high %v7153_v10, %v9723_v52 }
 0x5ad   :  { %9725 = vst [vmem:[#allocation48_spill] sm:$0xff] %v7165_v25  ;;  %v2122_v29 = vmul.f32 %v5462_v58, %v7156_v5  ;;  %v7173_v7 = vcombine.high %v7156_v5, %v9723_v52  ;;  %9728 = vst [vmem:[#allocation47_spill] sm:$0xff] %v7176_v61  ;;  %v2124_v19 = vmul.f32 %v5462_v58, %v7165_v25 }
 0x5ae   :  { %9724 = vst [vmem:[#allocation51_spill] sm:$0xff] %v7162_v16  ;;  %v2128_v35 = vsel %vm9726_vm12, %v2120_v13, 0.0  ;;  %v2096_v6 = vsel %vm9654_vm0, %v2088_v8, 0.0  ;;  %v2121_v62 = vmul.f32 %v5462_v58, %v7162_v16  ;;  %v7184_v43 = vcombine.high %v7165_v25, %v9723_v52  ;;  %vm9735_vm12 = vmmov %vm9654_vm0 }
 0x5af   :  { %9727 = vst [vmem:[#allocation46_spill] sm:$0xff] %v7173_v7  ;;  %2129 = vadd.xlane.f32.xlu0 %v2128_v35  ;;  %2097 = vadd.xlane.f32.xlu1 %v2096_v6  ;;  %v2134_v39 = vsel %vm9729_vm4, %v2122_v29, 0.0  ;;  %v2123_v28 = vmul.f32 %v5462_v58, %v7173_v7  ;;  %v2126_v2 = vmul.f32 %v5462_v58, %v7176_v61  ;;  %v2140_v33 = vsel %vm9732_vm10, %v2124_v19, 0.0  ;;  %vm9736_vm4 = vmmov %vm9654_vm0 }
 0x5b0   :  { %v2131_v50 = vsel %vm9730_vm2, %v2121_v62, 0.0  ;;  %9731 = vst [vmem:[#allocation52_spill] sm:$0xff] %v7184_v43  ;;  %v2125_v23 = vmul.f32 %v5462_v58, %v7184_v43  ;;  %v7192_v15 = vcombine.high %v7176_v61, %v9723_v52  ;;  %v2090_v0 = vmul.f32 %v7156_v5, %v1932_v38  ;;  %vm9737_vm2 = vmmov %vm9654_vm0 }
 0x5b1   :  { %v2137_v63 = vsel %vm9733_vm11, %v2123_v28, 0.0  ;;  %v2146_v18 = vsel %vm9735_vm12, %v2126_v2, 0.0  ;;  %v2092_v53 = vmul.f32 %v7165_v25, %v1932_v38  ;;  %v2091_v41 = vmul.f32 %v7173_v7, %v1932_v38  ;;  %vm9738_vm10 = vmmov %vm9654_vm0 }
 0x5b2   :  { %9734 = vst [vmem:[#allocation49_spill] sm:$0xff] %v7192_v15  ;;  %v2143_v46 = vsel %vm9654_vm0, %v2125_v23, 0.0  ;;  %v2127_v45 = vmul.f32 %v5462_v58, %v7192_v15  ;;  %v2102_v55 = vsel %vm9736_vm4, %v2090_v0, 0.0  ;;  %vm9739_vm11 = vmmov %vm9654_vm0  ;;  %v2093_v26 = vmul.f32 %v7184_v43, %v1932_v38 }
 0x5b3   :  { %2135 = vadd.xlane.f32.xlu0 %v2134_v39  ;;  %2132 = vadd.xlane.f32.xlu1 %v2131_v50  ;;  %v2108_v44 = vsel %vm9738_vm10, %v2092_v53, 0.0  ;;  %v2105_v36 = vsel %vm9739_vm11, %v2091_v41, 0.0  ;;  %v2089_v47 = vmul.f32 %v7162_v16, %v1932_v38  ;;  %vm9740_vm12 = vmmov %vm9654_vm0  ;;  %v2095_v1 = vmul.f32 %v7192_v15, %v1932_v38 }
 0x5b4   :  { %v2149_v51 = vsel %vm9737_vm2, %v2127_v45, 0.0  ;;  %v2111_v60 = vsel %vm9740_vm12, %v2093_v26, 0.0  ;;  %v2094_v34 = vmul.f32 %v7176_v61, %v1932_v38  ;;  %vm9741_vm4 = vmmov %vm9654_vm0 }
 0x5b5   :  { %v2099_v17 = vsel %vm9654_vm0, %v2089_v47, 0.0  ;;  %v2117_v27 = vsel %vm9741_vm4, %v2095_v1, 0.0  ;;  %vm9742_vm2 = vmmov %vm9654_vm0 }
 0x5b6   :  { %v2114_v31 = vsel %vm9742_vm2, %v2094_v34, 0.0 }
 0x5b7   :  { %2141 = vadd.xlane.f32.xlu0 %v2140_v33  ;;  %2138 = vadd.xlane.f32.xlu1 %v2137_v63 }
 0x5bb   :  { %2147 = vadd.xlane.f32.xlu0 %v2146_v18  ;;  %2144 = vadd.xlane.f32.xlu1 %v2143_v46 }
 0x5bf   :  { %2103 = vadd.xlane.f32.xlu0 %v2102_v55  ;;  %2150 = vadd.xlane.f32.xlu1 %v2149_v51 }
 0x5c3   :  { %2109 = vadd.xlane.f32.xlu0 %v2108_v44  ;;  %2106 = vadd.xlane.f32.xlu1 %v2105_v36 }
 0x5c7   :  { %2112 = vadd.xlane.f32.xlu1 %v2111_v60  ;;  %2100 = vadd.xlane.f32.xlu0 %v2099_v17 }
 0x5cb   :  { %2118 = vadd.xlane.f32.xlu1 %v2117_v27  ;;  %2115 = vadd.xlane.f32.xlu0 %v2114_v31 }
 0x63c   :  { %v7212_v20 = vpop.xlane.xlu0 %2129  ;;  %v7214_v49 = vpop.xlane.xlu1 %2097 }
 0x63d   :  { %v2152_v40 = vadd.f32 %v7212_v20, %v7214_v49 }
 0x63f   :  { %vm2216_vm10 = vcmp.gt.f32.partialorder %v2152_v40, 0.0  ;;  %v2280_v48 = vmul.f32 0.2, %v2152_v40 }
 0x640   :  { %v7218_v11 = vpop.xlane.xlu0 %2135  ;;  %v7220_v22 = vpop.xlane.xlu1 %2132 }
 0x641   :  { %v2168_v37 = vadd.f32 %v7218_v11, %v7214_v49  ;;  %v2160_v57 = vadd.f32 %v7220_v22, %v7214_v49  ;;  %v7234_v13 = vsel %vm2216_vm10, %v2152_v40, %v2280_v48 }
 0x643   :  { %v2296_v42 = vmul.f32 0.2, %v2168_v37  ;;  %v2288_v3 = vmul.f32 0.2, %v2160_v57  ;;  %vm2232_vm11 = vcmp.gt.f32.partialorder %v2168_v37, 0.0  ;;  %vm2224_vm12 = vcmp.gt.f32.partialorder %v2160_v57, 0.0 }
 0x644   :  { %v7226_v59 = vpop.xlane.xlu0 %2141  ;;  %v7228_v56 = vpop.xlane.xlu1 %2138 }
 0x645   :  { %v2184_v4 = vadd.f32 %v7226_v59, %v7214_v49  ;;  %v2176_v21 = vadd.f32 %v7228_v56, %v7214_v49  ;;  %v7240_v29 = vsel %vm2232_vm11, %v2168_v37, %v2296_v42  ;;  %v7242_v35 = vsel %vm2224_vm12, %v2160_v57, %v2288_v3 }
 0x647   :  { %vm2248_vm0 = vcmp.gt.f32.partialorder %v2184_v4, 0.0  ;;  %v2312_v58 = vmul.f32 0.2, %v2184_v4  ;;  %vm2240_vm4 = vcmp.gt.f32.partialorder %v2176_v21, 0.0  ;;  %v2304_v38 = vmul.f32 0.2, %v2176_v21 }
 0x648   :  { %v7236_v8 = vpop.xlane.xlu0 %2147  ;;  %v7238_v24 = vpop.xlane.xlu1 %2144 }
 0x649   :  { %v2200_v6 = vadd.f32 %v7236_v8, %v7214_v49  ;;  %v2192_v62 = vadd.f32 %v7238_v24, %v7214_v49  ;;  %v7248_v19 = vsel %vm2248_vm0, %v2184_v4, %v2312_v58  ;;  %v7250_v39 = vsel %vm2240_vm4, %v2176_v21, %v2304_v38 }
 0x64b   :  { %vm2264_vm2 = vcmp.gt.f32.partialorder %v2200_v6, 0.0  ;;  %v2328_v50 = vmul.f32 0.2, %v2200_v6  ;;  %vm2256_vm10 = vcmp.gt.f32.partialorder %v2192_v62, 0.0  ;;  %v2320_v28 = vmul.f32 0.2, %v2192_v62 }
 0x64c   :  { %v2104_v23 = vpop.xlane.xlu0 %2103  ;;  %v7279_v48 = vpop.xlane.xlu1 %2150 }
 0x64d   :  { %v2154_v0 = vadd.f32 %v7212_v20, %v2104_v23  ;;  %v2162_v45 = vadd.f32 %v7220_v22, %v2104_v23  ;;  %v7264_v55 = vsel %vm2264_vm2, %v2200_v6, %v2328_v50  ;;  %v7266_v51 = vsel %vm2256_vm10, %v2192_v62, %v2320_v28 }
 0x64e   :  { %v2170_v53 = vadd.f32 %v7218_v11, %v2104_v23  ;;  %v2178_v41 = vadd.f32 %v7228_v56, %v2104_v23  ;;  %v2186_v44 = vadd.f32 %v7226_v59, %v2104_v23  ;;  %v2194_v36 = vadd.f32 %v7238_v24, %v2104_v23 }
 0x64f   :  { %v2202_v26 = vadd.f32 %v7236_v8, %v2104_v23  ;;  %vm2218_vm11 = vcmp.gt.f32.partialorder %v2154_v0, 0.0  ;;  %vm2226_vm12 = vcmp.gt.f32.partialorder %v2162_v45, 0.0  ;;  %v2282_v47 = vmul.f32 0.2, %v2154_v0 }
 0x650   :  { %vm2234_vm0 = vcmp.gt.f32.partialorder %v2170_v53, 0.0  ;;  %vm2242_vm4 = vcmp.gt.f32.partialorder %v2178_v41, 0.0  ;;  %vm2250_vm6 = vcmp.gt.f32.partialorder %v2186_v44, 0.0  ;;  %vm2258_vm2 = vcmp.gt.f32.partialorder %v2194_v36, 0.0  ;;  %v2110_v58 = vpop.xlane.xlu0 %2109 }
 0x651   :  { %vm2266_vm5 = vcmp.gt.f32.partialorder %v2202_v26, 0.0  ;;  %v2290_v60 = vmul.f32 0.2, %v2162_v45  ;;  %v2298_v17 = vmul.f32 0.2, %v2170_v53  ;;  %v7273_v27 = vsel %vm2218_vm11, %v2154_v0, %v2282_v47 }
 0x652   :  { %v2306_v1 = vmul.f32 0.2, %v2178_v41  ;;  %v2314_v34 = vmul.f32 0.2, %v2186_v44  ;;  %v2322_v40 = vmul.f32 0.2, %v2194_v36  ;;  %v2212_v31 = vadd.f32 %v7279_v48, %v2110_v58 }
 0x653   :  { %v2330_v37 = vmul.f32 0.2, %v2202_v26  ;;  %v7277_v57 = vsel %vm2226_vm12, %v2162_v45, %v2290_v60  ;;  %v7284_v3 = vsel %vm2234_vm0, %v2170_v53, %v2298_v17  ;;  %v2208_v53 = vadd.f32 %v7279_v48, %v7214_v49 }
 0x654   :  { %v7287_v4 = vsel %vm2242_vm4, %v2178_v41, %v2306_v1  ;;  %v7290_v21 = vsel %vm2250_vm6, %v2186_v44, %v2314_v34  ;;  %v7293_v38 = vsel %vm2258_vm2, %v2194_v36, %v2322_v40  ;;  %v2210_v41 = vadd.f32 %v7279_v48, %v2104_v23  ;;  %v2101_v25 = vpop.xlane.xlu0 %2100 }
 0x655   :  { %v7296_v6 = vsel %vm2266_vm5, %v2202_v26, %v2330_v37  ;;  %v2156_v44 = vadd.f32 %v7212_v20, %v2110_v58  ;;  %v2164_v36 = vadd.f32 %v7220_v22, %v2110_v58  ;;  %v2172_v26 = vadd.f32 %v7218_v11, %v2110_v58 }
 0x656   :  { %vm2272_vm5 = vcmp.gt.f32.partialorder %v2208_v53, 0.0  ;;  %v2336_v47 = vmul.f32 0.2, %v2208_v53  ;;  %v2180_v60 = vadd.f32 %v7228_v56, %v2110_v58  ;;  %v2188_v17 = vadd.f32 %v7226_v59, %v2110_v58 }
 0x657   :  { %vm2274_vm6 = vcmp.gt.f32.partialorder %v2210_v41, 0.0  ;;  %v2338_v1 = vmul.f32 0.2, %v2210_v41  ;;  %v2196_v34 = vadd.f32 %v7238_v24, %v2110_v58  ;;  %v2204_v49 = vadd.f32 %v7236_v8, %v2110_v58 }
 0x658   :  { %v7322_v37 = vsel %vm2272_vm5, %v2208_v53, %v2336_v47  ;;  %vm2220_vm10 = vcmp.gt.f32.partialorder %v2156_v44, 0.0  ;;  %vm2228_vm11 = vcmp.gt.f32.partialorder %v2164_v36, 0.0  ;;  %vm2236_vm12 = vcmp.gt.f32.partialorder %v2172_v26, 0.0 }
 0x659   :  { %v7325_v42 = vsel %vm2274_vm6, %v2210_v41, %v2338_v1  ;;  %vm2244_vm0 = vcmp.gt.f32.partialorder %v2180_v60, 0.0  ;;  %vm2252_vm4 = vcmp.gt.f32.partialorder %v2188_v17, 0.0  ;;  %vm2260_vm2 = vcmp.gt.f32.partialorder %v2196_v34, 0.0  ;;  %v2107_v1 = vpop.xlane.xlu1 %2106 }
 0x65a   :  { %vm2268_vm15 = vcmp.gt.f32.partialorder %v2204_v49, 0.0  ;;  %vm2276_vm13 = vcmp.gt.f32.partialorder %v2212_v31, 0.0  ;;  %v2284_v23 = vmul.f32 0.2, %v2156_v44  ;;  %v2292_v18 = vmul.f32 0.2, %v2164_v36 }
 0x65b   :  { %v2300_v47 = vmul.f32 0.2, %v2172_v26  ;;  %v2308_v58 = vmul.f32 0.2, %v2180_v60  ;;  %v2316_v41 = vmul.f32 0.2, %v2188_v17 }
 0x65c   :  { %v2324_v40 = vmul.f32 0.2, %v2196_v34  ;;  %v2332_v0 = vmul.f32 0.2, %v2204_v49  ;;  %v2340_v45 = vmul.f32 0.2, %v2212_v31  ;;  %v7332_v28 = vsel %vm2220_vm10, %v2156_v44, %v2284_v23 }
 0x65d   :  { %v7335_v50 = vsel %vm2228_vm11, %v2164_v36, %v2292_v18  ;;  %v7338_v46 = vsel %vm2236_vm12, %v2172_v26, %v2300_v47  ;;  %v7341_v33 = vsel %vm2244_vm0, %v2180_v60, %v2308_v58  ;;  %v7344_v53 = vsel %vm2252_vm4, %v2188_v17, %v2316_v41  ;;  %v2113_v2 = vpop.xlane.xlu1 %2112 }
 0x65e   :  { %9743 = vst [vmem:[#allocation50_spill] sm:$0xff] %v7344_v53  ;;  %v7347_v63 = vsel %vm2260_vm2, %v2196_v34, %v2324_v40  ;;  %v7350_v62 = vsel %vm2268_vm15, %v2204_v49, %v2332_v0  ;;  %v2155_v44 = vadd.f32 %v7212_v20, %v2107_v1  ;;  %v2163_v18 = vadd.f32 %v7220_v22, %v2107_v1 }
 0x65f   :  { %9744 = vst [vmem:[#allocation55_spill] sm:$0xff] %v7347_v63  ;;  %9745 = vst [vmem:[#allocation53_spill] sm:$0xff] %v7350_v62  ;;  %v7355_v36 = vsel %vm2276_vm13, %v2212_v31, %v2340_v45  ;;  %v2171_v31 = vadd.f32 %v7218_v11, %v2107_v1  ;;  %v2179_v45 = vadd.f32 %v7228_v56, %v2107_v1 }
 0x660   :  { %9746 = vst [vmem:[#allocation54_spill] sm:$0xff] %v7355_v36  ;;  %v2187_v23 = vadd.f32 %v7226_v59, %v2107_v1  ;;  %v2195_v40 = vadd.f32 %v7238_v24, %v2107_v1  ;;  %v2203_v47 = vadd.f32 %v7236_v8, %v2107_v1  ;;  %v2211_v41 = vadd.f32 %v7279_v48, %v2107_v1 }
 0x661   :  { %vm2219_vm13 = vcmp.gt.f32.partialorder %v2155_v44, 0.0  ;;  %vm2227_vm15 = vcmp.gt.f32.partialorder %v2163_v18, 0.0  ;;  %vm2235_vm5 = vcmp.gt.f32.partialorder %v2171_v31, 0.0  ;;  %vm2243_vm6 = vcmp.gt.f32.partialorder %v2179_v45, 0.0 }
 0x662   :  { %vm2251_vm10 = vcmp.gt.f32.partialorder %v2187_v23, 0.0  ;;  %vm2259_vm11 = vcmp.gt.f32.partialorder %v2195_v40, 0.0  ;;  %vm2267_vm12 = vcmp.gt.f32.partialorder %v2203_v47, 0.0  ;;  %vm2275_vm0 = vcmp.gt.f32.partialorder %v2211_v41, 0.0 }
 0x663   :  { %v2283_v49 = vmul.f32 0.2, %v2155_v44  ;;  %v2291_v34 = vmul.f32 0.2, %v2163_v18  ;;  %v2299_v17 = vmul.f32 0.2, %v2171_v31 }
 0x664   :  { %v2307_v60 = vmul.f32 0.2, %v2179_v45  ;;  %v2315_v26 = vmul.f32 0.2, %v2187_v23  ;;  %v2323_v58 = vmul.f32 0.2, %v2195_v40 }
 0x665   :  { %v2331_v52 = vmul.f32 0.2, %v2203_v47  ;;  %v2339_v1 = vmul.f32 0.2, %v2211_v41  ;;  %v7380_v12 = vsel %vm2219_vm13, %v2155_v44, %v2283_v49  ;;  %v7383_v32 = vsel %vm2227_vm15, %v2163_v18, %v2291_v34 }
 0x666   :  { %v7386_v54 = vsel %vm2235_vm5, %v2171_v31, %v2299_v17  ;;  %v7389_v15 = vsel %vm2243_vm6, %v2179_v45, %v2307_v60  ;;  %v7392_v0 = vsel %vm2251_vm10, %v2187_v23, %v2315_v26  ;;  %v7395_v61 = vsel %vm2259_vm11, %v2195_v40, %v2323_v58 }
 0x667   :  { %v7398_v43 = vsel %vm2267_vm12, %v2203_v47, %v2331_v52  ;;  %v2157_v44 = vadd.f32 %v7212_v20, %v2113_v2  ;;  %v2165_v18 = vadd.f32 %v7220_v22, %v2113_v2  ;;  %v7403_v34 = vsel %vm2275_vm0, %v2211_v41, %v2339_v1 }
 0x668   :  { %v2173_v45 = vadd.f32 %v7218_v11, %v2113_v2  ;;  %v2181_v23 = vadd.f32 %v7228_v56, %v2113_v2  ;;  %v2189_v40 = vadd.f32 %v7226_v59, %v2113_v2  ;;  %v2197_v47 = vadd.f32 %v7238_v24, %v2113_v2 }
 0x669   :  { %v2205_v58 = vadd.f32 %v7236_v8, %v2113_v2  ;;  %v2213_v1 = vadd.f32 %v7279_v48, %v2113_v2  ;;  %vm2221_vm4 = vcmp.gt.f32.partialorder %v2157_v44, 0.0  ;;  %vm2229_vm2 = vcmp.gt.f32.partialorder %v2165_v18, 0.0 }
 0x66a   :  { %vm2237_vm13 = vcmp.gt.f32.partialorder %v2173_v45, 0.0  ;;  %vm2245_vm15 = vcmp.gt.f32.partialorder %v2181_v23, 0.0  ;;  %vm2253_vm5 = vcmp.gt.f32.partialorder %v2189_v40, 0.0  ;;  %vm2261_vm6 = vcmp.gt.f32.partialorder %v2197_v47, 0.0 }
 0x66b   :  { %vm2269_vm10 = vcmp.gt.f32.partialorder %v2205_v58, 0.0  ;;  %vm2277_vm11 = vcmp.gt.f32.partialorder %v2213_v1, 0.0  ;;  %v2285_v31 = vmul.f32 0.2, %v2157_v44  ;;  %v2293_v49 = vmul.f32 0.2, %v2165_v18 }
 0x66c   :  { %v2301_v17 = vmul.f32 0.2, %v2173_v45  ;;  %v2309_v26 = vmul.f32 0.2, %v2181_v23  ;;  %v2317_v60 = vmul.f32 0.2, %v2189_v40 }
 0x66d   :  { %v2325_v41 = vmul.f32 0.2, %v2197_v47  ;;  %v2333_v7 = vmul.f32 0.2, %v2205_v58  ;;  %v2341_v2 = vmul.f32 0.2, %v2213_v1  ;;  %v7428_v5 = vsel %vm2221_vm4, %v2157_v44, %v2285_v31 }
 0x66e   :  { %v7431_v10 = vsel %vm2229_vm2, %v2165_v18, %v2293_v49  ;;  %v7434_v16 = vsel %vm2237_vm13, %v2173_v45, %v2301_v17  ;;  %v7437_v14 = vsel %vm2245_vm15, %v2181_v23, %v2309_v26  ;;  %v7440_v52 = vsel %vm2253_vm5, %v2189_v40, %v2317_v60 }
 0x66f   :  { %9747 = vst [vmem:[#allocation58_spill] sm:$0xff] %v7431_v10  ;;  %9748 = vst [vmem:[#allocation56_spill] sm:$0xff] %v7434_v16  ;;  %v7443_v30 = vsel %vm2261_vm6, %v2197_v47, %v2325_v41  ;;  %v7446_v36 = vsel %vm2269_vm10, %v2205_v58, %v2333_v7  ;;  %v2153_v44 = vadd.f32 %v7212_v20, %v2101_v25  ;;  %vm9755_vm10 = vcmask 1041409  }
 0x670   :  { %9749 = vst [vmem:[#allocation57_spill] sm:$0xff] %v7437_v14  ;;  %9750 = vst [vmem:[#allocation59_spill] sm:$0xff] %v7440_v52  ;;  %v2161_v18 = vadd.f32 %v7220_v22, %v2101_v25  ;;  %v7451_v49 = vsel %vm2277_vm11, %v2213_v1, %v2341_v2  ;;  %v2169_v23 = vadd.f32 %v7218_v11, %v2101_v25  ;;  %vm9757_vm11 = vcmask 1042434  }
 0x671   :  { %9751 = vst [vmem:[#allocation60_spill] sm:$0xff] %v7443_v30  ;;  %9752 = vst [vmem:[#allocation42_spill] sm:$0xff] %v7446_v36  ;;  %v2177_v40 = vadd.f32 %v7228_v56, %v2101_v25  ;;  %v2185_v47 = vadd.f32 %v7226_v59, %v2101_v25  ;;  %v2193_v58 = vadd.f32 %v7238_v24, %v2101_v25  ;;  %vm2217_vm12 = vcmp.gt.f32.partialorder %v2153_v44, 0.0 }
 0x672   :  { %9753 = vst [vmem:[#allocation45_spill] sm:$0xff] %v7451_v49  ;;  %v2201_v41 = vadd.f32 %v7236_v8, %v2101_v25  ;;  %v2209_v2 = vadd.f32 %v7279_v48, %v2101_v25  ;;  %vm2225_vm0 = vcmp.gt.f32.partialorder %v2161_v18, 0.0  ;;  %vm2233_vm4 = vcmp.gt.f32.partialorder %v2169_v23, 0.0 }
 0x673   :  { %vm2241_vm2 = vcmp.gt.f32.partialorder %v2177_v40, 0.0  ;;  %vm2249_vm13 = vcmp.gt.f32.partialorder %v2185_v47, 0.0  ;;  %vm2257_vm15 = vcmp.gt.f32.partialorder %v2193_v58, 0.0  ;;  %v2281_v45 = vmul.f32 0.2, %v2153_v44 }
 0x674   :  { %vm2265_vm5 = vcmp.gt.f32.partialorder %v2201_v41, 0.0  ;;  %vm2273_vm6 = vcmp.gt.f32.partialorder %v2209_v2, 0.0  ;;  %v2289_v31 = vmul.f32 0.2, %v2161_v18  ;;  %v2297_v17 = vmul.f32 0.2, %v2169_v23 }
 0x675   :  { %v2305_v60 = vmul.f32 0.2, %v2177_v40  ;;  %v2313_v26 = vmul.f32 0.2, %v2185_v47  ;;  %v2321_v30 = vmul.f32 0.2, %v2193_v58  ;;  %v2345_v25 = vsel %vm2217_vm12, %v2153_v44, %v2281_v45  ;;  %vm9759_vm12 = vmmov %vm9755_vm10 }
 0x676   :  { %v2329_v1 = vmul.f32 0.2, %v2201_v41  ;;  %v2337_v36 = vmul.f32 0.2, %v2209_v2  ;;  %v2353_v62 = vsel %vm2225_vm0, %v2161_v18, %v2289_v31  ;;  %v2361_v52 = vsel %vm2233_vm4, %v2169_v23, %v2297_v17  ;;  %v2119_v31 = vpop.xlane.xlu1 %2118  ;;  %vm9761_vm0 = vmmov %vm9755_vm10 }
 0x677   :  { %v2369_v14 = vsel %vm2241_vm2, %v2177_v40, %v2305_v60  ;;  %v2377_v63 = vsel %vm2249_vm13, %v2185_v47, %v2313_v26  ;;  %v2385_v16 = vsel %vm2257_vm15, %v2193_v58, %v2321_v30  ;;  %v2479_v10 = vrot.slane %v2345_v25, %v6038_v9  ;;  %vm9763_vm4 = vmmov %vm9761_vm0 }
 0x678   :  { %v2393_v7 = vsel %vm2265_vm5, %v2201_v41, %v2329_v1  ;;  %v2401_v49 = vsel %vm2273_vm6, %v2209_v2, %v2337_v36  ;;  %v2511_v53 = vrot.slane %v2353_v62, %v6038_v9  ;;  %v2543_v44 = vrot.slane %v2361_v52, %v6038_v9  ;;  %vm9765_vm2 = vmmov %vm9757_vm11 }
 0x679   :  { %v2575_v18 = vrot.slane %v2369_v14, %v6038_v9  ;;  %v2607_v17 = vrot.slane %v2377_v63, %v6038_v9  ;;  %v2639_v60 = vrot.slane %v2385_v16, %v6038_v9  ;;  %v2671_v26 = vrot.slane %v2393_v7, %v6038_v9  ;;  %vm9767_vm13 = vmmov %vm9765_vm2 }
 0x67a   :  { %v2703_v30 = vrot.slane %v2401_v49, %v6038_v9  ;;  %v9754_v36 = vrot.slane %v7234_v13, %v6038_v9  ;;  %v9756_v62 = vrot.slane %v7273_v27, %v6038_v9  ;;  %v9758_v14 = vrot.slane %v7242_v35, %v6038_v9  ;;  %vm9769_vm15 = vmmov %vm9765_vm2 }
 0x67b   :  { %v9760_v16 = vrot.slane %v7240_v29, %v6038_v9  ;;  %v9762_v13 = vrot.slane %v7250_v39, %v6038_v9  ;;  %v9764_v27 = vrot.slane %v7277_v57, %v6038_v9  ;;  %v9766_v35 = vrot.slane %v7284_v3, %v6038_v9 }
 0x67c   :  { %v2728_v45 = vsel %vm9755_vm10, %v2479_v10, %v9754_v36  ;;  %v2735_v63 = vsel %vm9759_vm12, %v2511_v53, %v9758_v14  ;;  %v9768_v29 = vrot.slane %v7287_v4, %v6038_v9  ;;  %v2159_v40 = vadd.f32 %v7212_v20, %v2119_v31  ;;  %vm9775_vm10 = vmmov %vm9761_vm0 }
 0x67d   :  { %v2729_v52 = vsel %vm9757_vm11, %v9756_v62, %v2728_v45  ;;  %v2742_v49 = vsel %vm9761_vm0, %v2543_v44, %v9760_v16  ;;  %v2749_v10 = vsel %vm9763_vm4, %v2575_v18, %v9762_v13  ;;  %v2736_v7 = vsel %vm9765_vm2, %v9764_v27, %v2735_v63  ;;  %vm9777_vm11 = vmmov %vm9765_vm2 }
 0x67e   :  { %v2743_v53 = vsel %vm9767_vm13, %v9766_v35, %v2742_v49  ;;  %v2750_v23 = vsel %vm9769_vm15, %v9768_v29, %v2749_v10  ;;  %v9770_v39 = vrot.slane %v7380_v12, %v6038_v9  ;;  %vm9771_vm5 = vcmask 1043459   ;;  %vm9779_vm12 = vmmov %vm9761_vm0 }
 0x67f   :  { %v9772_v57 = vrot.slane %v7383_v32, %v6038_v9  ;;  %vm9773_vm6 = vmmov %vm9771_vm5  ;;  %v9774_v3 = vrot.slane %v7248_v19, %v6038_v9  ;;  %v2167_v4 = vadd.f32 %v7220_v22, %v2119_v31  ;;  %v9776_v1 = vrot.slane %v7290_v21, %v6038_v9 }
 0x680   :  { %v2730_v47 = vsel %vm9771_vm5, %v9770_v39, %v2729_v52  ;;  %v9778_v12 = vrot.slane %v7266_v51, %v6038_v9  ;;  %v9780_v32 = vrot.slane %v7264_v55, %v6038_v9  ;;  %v9781_v19 = vrot.slane %v7322_v37, %v6038_v9  ;;  %vm9782_vm4 = vmmov %vm9761_vm0 }
 0x681   :  { %v2737_v58 = vsel %vm9773_vm6, %v9772_v57, %v2736_v7  ;;  %v2756_v41 = vsel %vm9775_vm10, %v2607_v17, %v9774_v3  ;;  %v9783_v21 = vrot.slane %v7386_v54, %v6038_v9  ;;  %vm9784_vm2 = vmmov %vm9771_vm5  ;;  %v9785_v51 = vrot.slane %v7389_v15, %v6038_v9 }
 0x682   :  { %v2757_v2 = vsel %vm9777_vm11, %v9776_v1, %v2756_v41  ;;  %v2763_v25 = vsel %vm9779_vm12, %v2639_v60, %v9778_v12  ;;  %v2770_v44 = vsel %vm9761_vm0, %v2671_v26, %v9780_v32  ;;  %v2777_v18 = vsel %vm9782_vm4, %v2703_v30, %v9781_v19  ;;  %vm9786_vm13 = vmmov %vm9784_vm2 }
 0x683   :  { %v2744_v17 = vsel %vm9784_vm2, %v9783_v21, %v2743_v53  ;;  %v2751_v60 = vsel %vm9786_vm13, %v9785_v51, %v2750_v23  ;;  %v9787_v55 = vrot.slane %v7293_v38, %v6038_v9  ;;  %vm9788_vm15 = vmmov %vm9777_vm11  ;;  %v9789_v37 = vrot.slane %v7296_v6, %v6038_v9  ;;  %v2116_v51 = vpop.xlane.xlu0 %2115 }
 0x684   :  { %vm9790_vm5 = vmmov %vm9777_vm11  ;;  %v9791_v54 = vrot.slane %v7392_v0, %v6038_v9  ;;  %v9793_v15 = vrot.slane %v7395_v61, %v6038_v9  ;;  %v9795_v38 = vrot.slane %v7325_v42, %v6038_v9  ;;  %v2175_v52 = vadd.f32 %v7218_v11, %v2119_v31 }
 0x685   :  { %v2764_v26 = vsel %vm9788_vm15, %v9787_v55, %v2763_v25  ;;  %v2771_v30 = vsel %vm9790_vm5, %v9789_v37, %v2770_v44  ;;  %vm9792_vm6 = vmmov %vm9784_vm2  ;;  %v2183_v6 = vadd.f32 %v7228_v56, %v2119_v31  ;;  %v2191_v14 = vadd.f32 %v7226_v59, %v2119_v31 }
 0x686   :  { %v2758_v36 = vsel %vm9792_vm6, %v9791_v54, %v2757_v2  ;;  %vm9794_vm10 = vmmov %vm9784_vm2  ;;  %v2199_v0 = vadd.f32 %v7238_v24, %v2119_v31  ;;  %v2207_v63 = vadd.f32 %v7236_v8, %v2119_v31  ;;  %v9797_v61 = vrot.slane %v7398_v43, %v6038_v9 }
 0x687   :  { %v2765_v45 = vsel %vm9794_vm10, %v9793_v15, %v2764_v26  ;;  %vm9796_vm11 = vmmov %vm9790_vm5  ;;  %v2215_v49 = vadd.f32 %v7279_v48, %v2119_v31  ;;  %vm2223_vm0 = vcmp.gt.f32.partialorder %v2159_v40, 0.0  ;;  %vm2231_vm4 = vcmp.gt.f32.partialorder %v2167_v4, 0.0  ;;  %v9809_v15 = vld [vmem:[#allocation50_spill] sm:$0xff] }
 0x688   :  { %v2778_v62 = vsel %vm9796_vm11, %v9795_v38, %v2777_v18  ;;  %vm9798_vm12 = vmmov %vm9784_vm2  ;;  %vm2239_vm2 = vcmp.gt.f32.partialorder %v2175_v52, 0.0  ;;  %vm2247_vm13 = vcmp.gt.f32.partialorder %v2183_v6, 0.0  ;;  %vm2255_vm15 = vcmp.gt.f32.partialorder %v2191_v14, 0.0 }
 0x689   :  { %v2772_v16 = vsel %vm9798_vm12, %v9797_v61, %v2771_v30  ;;  %vm2263_vm5 = vcmp.gt.f32.partialorder %v2199_v0, 0.0  ;;  %vm2271_vm6 = vcmp.gt.f32.partialorder %v2207_v63, 0.0  ;;  %vm2279_vm10 = vcmp.gt.f32.partialorder %v2215_v49, 0.0 }
 0x68a   :  { %v2287_v42 = vmul.f32 0.2, %v2159_v40  ;;  %v2295_v13 = vmul.f32 0.2, %v2167_v4  ;;  %v2303_v10 = vmul.f32 0.2, %v2175_v52  ;;  %v9799_v43 = vrot.slane %v7332_v28, %v6038_v9 }
 0x68b   :  { %v2311_v27 = vmul.f32 0.2, %v2183_v6  ;;  %v2319_v7 = vmul.f32 0.2, %v2191_v14  ;;  %vm9800_vm11 = vcmask 1044484   ;;  %v9801_v28 = vrot.slane %v7403_v34, %v6038_v9 }
 0x68c   :  { %v2731_v35 = vsel %vm9800_vm11, %v9799_v43, %v2730_v47  ;;  %v2327_v53 = vmul.f32 0.2, %v2199_v0  ;;  %v2335_v31 = vmul.f32 0.2, %v2207_v63  ;;  %v2343_v29 = vmul.f32 0.2, %v2215_v49 }
 0x68d   :  { %v7596_v23 = vsel %vm2223_vm0, %v2159_v40, %v2287_v42  ;;  %v7599_v39 = vsel %vm2231_vm4, %v2167_v4, %v2295_v13  ;;  %v7602_v57 = vsel %vm2239_vm2, %v2175_v52, %v2303_v10  ;;  %v7605_v3 = vsel %vm2247_vm13, %v2183_v6, %v2311_v27  ;;  %vm9804_vm0 = vmmov %vm9800_vm11  ;;  %v9814_v6 = vld [vmem:[#allocation56_spill] sm:$0xff]  ;;  %v9823_v10 = vld [vmem:[#allocation53_spill] sm:$0xff] }
 0x68e   :  { %v7608_v41 = vsel %vm2255_vm15, %v2191_v14, %v2319_v7  ;;  %v2779_v47 = vsel %vm9798_vm12, %v9801_v28, %v2778_v62  ;;  %v7615_v40 = vsel %vm2263_vm5, %v2199_v0, %v2327_v53  ;;  %v7618_v4 = vsel %vm2271_vm6, %v2207_v63, %v2335_v31  ;;  %vm9806_vm4 = vmmov %vm9804_vm0  ;;  %v9812_v62 = vld [vmem:[#allocation58_spill] sm:$0xff]  ;;  %v9816_v14 = vld [vmem:[#allocation55_spill] sm:$0xff] }
 0x68f   :  { %v9802_v1 = vrot.slane %v7428_v5, %v6038_v9  ;;  %v7627_v12 = vsel %vm2279_vm10, %v2215_v49, %v2343_v29  ;;  %v2503_v34 = vrot.slane %v7596_v23, %v6038_v9  ;;  %v2535_v25 = vrot.slane %v7599_v39, %v6038_v9  ;;  %vm9808_vm2 = vmmov %vm9804_vm0  ;;  %v9819_v63 = vld [vmem:[#allocation57_spill] sm:$0xff]  ;;  %v9821_v49 = vld [vmem:[#allocation59_spill] sm:$0xff] }
 0x690   :  { %v2567_v32 = vrot.slane %v7602_v57, %v6038_v9  ;;  %v2599_v44 = vrot.slane %v7605_v3, %v6038_v9  ;;  %v2631_v5 = vrot.slane %v7608_v41, %v6038_v9  ;;  %v2663_v19 = vrot.slane %v7615_v40, %v6038_v9  ;;  %vm9811_vm13 = vmmov %vm9804_vm0  ;;  %v9828_v31 = vld [vmem:[#allocation54_spill] sm:$0xff]  ;;  %v9837_v40 = vld [vmem:[#allocation35_spill] sm:$0xff] }
 0x691   :  { %v7624_v2 = vsel %vm967_vm3, %v9802_v1, %v2731_v35  ;;  %v9803_v18 = vrot.slane %v7335_v50, %v6038_v9  ;;  %v2695_v55 = vrot.slane %v7618_v4, %v6038_v9  ;;  %v9805_v26 = vrot.slane %v7338_v46, %v6038_v9  ;;  %vm9818_vm15 = vmmov %vm9804_vm0  ;;  %v9826_v35 = vld [vmem:[#allocation60_spill] sm:$0xff] }
 0x692   :  { %v9807_v30 = vrot.slane %v7341_v33, %v6038_v9  ;;  %v9810_v38 = vrot.slane %v9809_v15, %v6038_v9  ;;  %v9813_v52 = vrot.slane %v9812_v62, %v6038_v9  ;;  %v9822_v42 = vrot.slane %v9821_v49, %v6038_v9  ;;  %vm9825_vm5 = vmmov %vm9804_vm0 }
 0x693   :  { %v2738_v21 = vsel %vm9804_vm0, %v9803_v18, %v2737_v58  ;;  %v2745_v37 = vsel %vm9806_vm4, %v9805_v26, %v2744_v17  ;;  %v2727_v58 = vrot.slane %v7627_v12, %v6038_v9  ;;  %v9815_v17 = vrot.slane %v9814_v6, %v6038_v9  ;;  %vm9830_vm6 = vmmov %vm9804_vm0 }
 0x694   :  { %v2752_v54 = vsel %vm9808_vm2, %v9807_v30, %v2751_v60  ;;  %v2759_v50 = vsel %vm9811_vm13, %v9810_v38, %v2758_v36  ;;  %v2739_v46 = vsel %vm967_vm3, %v9813_v52, %v2738_v21  ;;  %v9817_v60 = vrot.slane %v9816_v14, %v6038_v9 }
 0x695   :  { %v2746_v33 = vsel %vm967_vm3, %v9815_v17, %v2745_v37  ;;  %v9820_v36 = vrot.slane %v9819_v63, %v6038_v9  ;;  %v2760_v13 = vsel %vm967_vm3, %v9822_v42, %v2759_v50  ;;  %v9824_v27 = vrot.slane %v9823_v10, %v6038_v9  ;;  %v9831_v37 = vld [vmem:[#allocation42_spill] sm:$0xff] }
 0x696   :  { %v2766_v0 = vsel %vm9818_vm15, %v9817_v60, %v2765_v45  ;;  %v2158_v43 = vadd.f32 %v7212_v20, %v2116_v51  ;;  %v9827_v45 = vrot.slane %v9826_v35, %v6038_v9  ;;  %v9829_v29 = vrot.slane %v9828_v31, %v6038_v9 }
 0x697   :  { %v2753_v61 = vsel %vm967_vm3, %v9820_v36, %v2752_v54  ;;  %v2773_v7 = vsel %vm9825_vm5, %v9824_v27, %v2772_v16  ;;  %v2166_v1 = vadd.f32 %v7220_v22, %v2116_v51  ;;  %v2174_v18 = vadd.f32 %v7218_v11, %v2116_v51 }
 0x698   :  { %v2767_v53 = vsel %vm967_vm3, %v9827_v45, %v2766_v0  ;;  %v2780_v28 = vsel %vm9830_vm6, %v9829_v29, %v2779_v47  ;;  %v2182_v21 = vadd.f32 %v7228_v56, %v2116_v51  ;;  %v2190_v16 = vadd.f32 %v7226_v59, %v2116_v51  ;;  %v9833_v59 = vld [vmem:[#allocation45_spill] sm:$0xff] }
 0x699   :  { %v2198_v20 = vadd.f32 %v7238_v24, %v2116_v51  ;;  %v2206_v26 = vadd.f32 %v7236_v8, %v2116_v51  ;;  %v9832_v30 = vrot.slane %v9831_v37, %v6038_v9  ;;  %v2214_v15 = vadd.f32 %v7279_v48, %v2116_v51 }
 0x69a   :  { %vm2222_vm10 = vcmp.gt.f32.partialorder %v2158_v43, 0.0  ;;  %vm2230_vm11 = vcmp.gt.f32.partialorder %v2166_v1, 0.0  ;;  %vm2238_vm12 = vcmp.gt.f32.partialorder %v2174_v18, 0.0  ;;  %vm2246_vm0 = vcmp.gt.f32.partialorder %v2182_v21, 0.0 }
 0x69b   :  { %v2774_v54 = vsel %vm967_vm3, %v9832_v30, %v2773_v7  ;;  %vm2254_vm4 = vcmp.gt.f32.partialorder %v2190_v16, 0.0  ;;  %vm2262_vm2 = vcmp.gt.f32.partialorder %v2198_v20, 0.0  ;;  %vm2270_vm13 = vcmp.gt.f32.partialorder %v2206_v26, 0.0 }
 0x69c   :  { %vm2278_vm15 = vcmp.gt.f32.partialorder %v2214_v15, 0.0  ;;  %v2286_v11 = vmul.f32 0.2, %v2158_v43  ;;  %v2294_v22 = vmul.f32 0.2, %v2166_v1  ;;  %v9834_v56 = vrot.slane %v9833_v59, %v6038_v9 }
 0x69d   :  { %v2302_v24 = vmul.f32 0.2, %v2174_v18  ;;  %v2310_v47 = vmul.f32 0.2, %v2182_v21  ;;  %v2318_v38 = vmul.f32 0.2, %v2190_v16 }
 0x69e   :  { %v2781_v8 = vsel %vm967_vm3, %v9834_v56, %v2780_v28  ;;  %v2326_v50 = vmul.f32 0.2, %v2198_v20  ;;  %v2334_v48 = vmul.f32 0.2, %v2206_v26  ;;  %v2342_v51 = vmul.f32 0.2, %v2214_v15 }
 0x69f   :  { %v2350_v62 = vsel %vm2222_vm10, %v2158_v43, %v2286_v11  ;;  %v2358_v52 = vsel %vm2230_vm11, %v2166_v1, %v2294_v22  ;;  %v2366_v6 = vsel %vm2238_vm12, %v2174_v18, %v2302_v24  ;;  %v2374_v17 = vsel %vm2246_vm0, %v2182_v21, %v2310_v47  ;;  %v9844_v21 = vld [vmem:[#allocation39_spill] sm:$0xff] }
 0x6a0   :  { %v2382_v14 = vsel %vm2254_vm4, %v2190_v16, %v2318_v38  ;;  %v2390_v60 = vsel %vm2262_vm2, %v2198_v20, %v2326_v50  ;;  %v2398_v0 = vsel %vm2270_vm13, %v2206_v26, %v2334_v48  ;;  %v2406_v63 = vsel %vm2278_vm15, %v2214_v15, %v2342_v51  ;;  %v9846_v20 = vld [vmem:[#allocation44_spill] sm:$0xff] }
 0x6a1   :  { %v2499_v36 = vrot.slane %v2350_v62, %v6038_v9  ;;  %v2531_v49 = vrot.slane %v2358_v52, %v6038_v9  ;;  %v2563_v42 = vrot.slane %v2366_v6, %v6038_v9  ;;  %v2595_v10 = vrot.slane %v2374_v17, %v6038_v9 }
 0x6a2   :  { %v2627_v27 = vrot.slane %v2382_v14, %v6038_v9  ;;  %v2659_v7 = vrot.slane %v2390_v60, %v6038_v9  ;;  %v2691_v43 = vrot.slane %v2398_v0, %v6038_v9  ;;  %v2723_v35 = vrot.slane %v2406_v63, %v6038_v9 }
 0x6a3   :  { %v2733_v45 = vsel %vm969_vm8, %v2499_v36, %v7624_v2  ;;  %v2740_v29 = vsel %vm969_vm8, %v2531_v49, %v2739_v46  ;;  %v2747_v28 = vsel %vm969_vm8, %v2563_v42, %v2746_v33  ;;  %v2754_v1 = vsel %vm969_vm8, %v2595_v10, %v2753_v61 }
 0x6a4   :  { %v2734_v31 = vsel %vm971_vm1, %v2503_v34, %v2733_v45  ;;  %v2741_v18 = vsel %vm971_vm1, %v2535_v25, %v2740_v29  ;;  %v2748_v2 = vsel %vm971_vm1, %v2567_v32, %v2747_v28  ;;  %v2755_v23 = vsel %vm971_vm1, %v2599_v44, %v2754_v1 }
 0x6a5   :  { %v2761_v34 = vsel %vm969_vm8, %v2627_v27, %v2760_v13  ;;  %v2768_v39 = vsel %vm969_vm8, %v2659_v7, %v2767_v53  ;;  %v2775_v25 = vsel %vm969_vm8, %v2691_v43, %v2774_v54  ;;  %v2782_v57 = vsel %vm969_vm8, %v2723_v35, %v2781_v8  ;;  %v9840_v13 = vld [vmem:[#allocation37_spill] sm:$0xff] }
 0x6a6   :  { %v2762_v46 = vsel %vm971_vm1, %v2631_v5, %v2761_v34  ;;  %v2769_v3 = vsel %vm971_vm1, %v2663_v19, %v2768_v39  ;;  %v2776_v32 = vsel %vm971_vm1, %v2695_v55, %v2775_v25  ;;  %v2783_v41 = vsel %vm971_vm1, %v2727_v58, %v2782_v57  ;;  %v9842_v58 = vld [vmem:[#allocation38_spill] sm:$0xff] }
 0x6a7   :  { %v7768_v5 = vsel %vm613_vm9, %v2734_v31, -1e+30  ;;  %v7772_v61 = vsel %vm614_vm7, %v2741_v18, -1e+30  ;;  %vm9838_vm5 = vcmp.gt.f32.partialorder %v9837_v40, 0.0  ;;  %vm9841_vm6 = vcmp.gt.f32.partialorder %v9840_v13, 0.0 }
 0x6a8   :  { %v7776_v19 = vsel %vm9838_vm5, %v2748_v2, -1e+30  ;;  %v7780_v55 = vsel %vm616_vm14, %v2755_v23, -1e+30  ;;  %v7784_v12 = vsel %vm9841_vm6, %v2762_v46, -1e+30 }
 0x6a9   :  { %vm9843_vm10 = vcmp.gt.f32.partialorder %v9842_v58, 0.0  ;;  %vm9845_vm11 = vcmp.gt.f32.partialorder %v9844_v21, 0.0  ;;  %vm9847_vm12 = vcmp.gt.f32.partialorder %v9846_v20, 0.0  ;;  %vm9848_vm0 = vcmask 31744  }
 0x6aa   :  { %v7788_v53 = vsel %vm9843_vm10, %v2769_v3, -1e+30  ;;  %v7792_v16 = vsel %vm9845_vm11, %v2776_v32, -1e+30  ;;  %v7796_v26 = vsel %vm9847_vm12, %v2783_v41, -1e+30  ;;  %vm9849_vm4 = vmmov %vm9848_vm0 }
 0x6ab   :  { %v2800_v37 = vsel %vm9848_vm0, %v7768_v5, -inf  ;;  %v2807_v30 = vsel %vm9849_vm4, %v7772_v61, -inf  ;;  %vm9850_vm2 = vmmov %vm9848_vm0 }
 0x6ac   :  { %v2814_v54 = vsel %vm9850_vm2, %v7776_v19, -inf  ;;  %v2801_v15 = vrot.slane %v2800_v37, 4  ;;  %v2808_v11 = vrot.slane %v2807_v30, 4  ;;  %vm9851_vm13 = vmmov %vm9848_vm0 }
 0x6ad   :  { %v2815_v22 = vrot.slane %v2814_v54, 4  ;;  %v2821_v59 = vsel %vm9851_vm13, %v7780_v55, -inf  ;;  %vm9852_vm15 = vmmov %vm9848_vm0  ;;  %vm9860_vm13 = vcmp.gt.f32.partialorder %v9840_v13, 0.0 }
 0x6ae   :  { %v2822_v56 = vrot.slane %v2821_v59, 4  ;;  %v2828_v8 = vsel %vm9852_vm15, %v7784_v12, -inf  ;;  %vm9853_vm5 = vmmov %vm9848_vm0  ;;  %v2802_v38 = vmax.f32 %v2800_v37, %v2801_v15  ;;  %v2809_v50 = vmax.f32 %v2807_v30, %v2808_v11 }
 0x6af   :  { %v2835_v24 = vsel %vm9853_vm5, %v7788_v53, -inf  ;;  %vm9854_vm6 = vmmov %vm9848_vm0  ;;  %v2816_v48 = vmax.f32 %v2814_v54, %v2815_v22  ;;  %v2829_v51 = vrot.slane %v2828_v8, 4  ;;  %vm9862_vm5 = vcmp.gt.f32.partialorder %v9842_v58, 0.0 }
 0x6b0   :  { %v2842_v47 = vsel %vm9854_vm6, %v7792_v16, -inf  ;;  %v2823_v62 = vmax.f32 %v2821_v59, %v2822_v56  ;;  %v2836_v52 = vrot.slane %v2835_v24, 4  ;;  %vm9855_vm10 = vmmov %vm9848_vm0  ;;  %v2803_v14 = vrot.slane %v2802_v38, 2 }
 0x6b1   :  { %v2843_v6 = vrot.slane %v2842_v47, 4  ;;  %v2849_v17 = vsel %vm9855_vm10, %v7796_v26, -inf  ;;  %v2810_v60 = vrot.slane %v2809_v50, 2  ;;  %v2817_v0 = vrot.slane %v2816_v48, 2  ;;  %vm9856_vm11 = vmmov %vm9848_vm0 }
 0x6b2   :  { %v2830_v63 = vmax.f32 %v2828_v8, %v2829_v51  ;;  %v2824_v36 = vrot.slane %v2823_v62, 2  ;;  %v2837_v49 = vmax.f32 %v2835_v24, %v2836_v52  ;;  %v2850_v10 = vrot.slane %v2849_v17, 4  ;;  %vm9857_vm12 = vmmov %vm9848_vm0 }
 0x6b3   :  { %v2844_v42 = vmax.f32 %v2842_v47, %v2843_v6  ;;  %v2804_v27 = vmax.f32 %v2802_v38, %v2803_v14  ;;  %v2811_v7 = vmax.f32 %v2809_v50, %v2810_v60  ;;  %v2818_v43 = vmax.f32 %v2816_v48, %v2817_v0  ;;  %vm9859_vm4 = vmmov %vm9850_vm2 }
 0x6b4   :  { %v2831_v35 = vrot.slane %v2830_v63, 2  ;;  %v2825_v45 = vmax.f32 %v2823_v62, %v2824_v36  ;;  %v2838_v31 = vrot.slane %v2837_v49, 2  ;;  %v2851_v28 = vmax.f32 %v2849_v17, %v2850_v10  ;;  %vm9861_vm15 = vmmov %vm9850_vm2 }
 0x6b5   :  { %v2845_v29 = vrot.slane %v2844_v42, 2  ;;  %v2805_v1 = vrot.slane %v2804_v27, 1  ;;  %v2812_v18 = vrot.slane %v2811_v7, 1  ;;  %v2819_v2 = vrot.slane %v2818_v43, 1  ;;  %vm9863_vm6 = vmmov %vm9850_vm2 }
 0x6b6   :  { %v2832_v23 = vmax.f32 %v2830_v63, %v2831_v35  ;;  %v2826_v34 = vrot.slane %v2825_v45, 1  ;;  %v2839_v46 = vmax.f32 %v2837_v49, %v2838_v31  ;;  %v2852_v25 = vrot.slane %v2851_v28, 2 }
 0x6b7   :  { %v2846_v39 = vmax.f32 %v2844_v42, %v2845_v29  ;;  %v2806_v57 = vmax.f32 %v2804_v27, %v2805_v1  ;;  %v2813_v3 = vmax.f32 %v2811_v7, %v2812_v18  ;;  %v2820_v32 = vmax.f32 %v2818_v43, %v2819_v2 }
 0x6b8   :  { %v2833_v41 = vrot.slane %v2832_v23, 1  ;;  %v2827_v37 = vmax.f32 %v2825_v45, %v2826_v34  ;;  %v2840_v30 = vrot.slane %v2839_v46, 1  ;;  %v2853_v15 = vmax.f32 %v2851_v28, %v2852_v25 }
 0x6b9   :  { %v2847_v54 = vrot.slane %v2846_v39, 1  ;;  %v2856_v22 = vsub.f32 %v7768_v5, %v2806_v57  ;;  %v2857_v59 = vsub.f32 %v7772_v61, %v2813_v3  ;;  %v2858_v56 = vsub.f32 %v7776_v19, %v2820_v32 }
 0x6ba   :  { %v2834_v11 = vmax.f32 %v2832_v23, %v2833_v41  ;;  %v2841_v8 = vmax.f32 %v2839_v46, %v2840_v30  ;;  %v2854_v47 = vrot.slane %v2853_v15, 1  ;;  %v2859_v38 = vsub.f32 %v7780_v55, %v2827_v37 }
 0x6bb   :  { %v2848_v24 = vmax.f32 %v2846_v39, %v2847_v54  ;;  %v2864_v48 = vmul.f32 1.442695, %v2856_v22  ;;  %v2866_v51 = vmul.f32 1.442695, %v2857_v59  ;;  %v2868_v62 = vmul.f32 1.442695, %v2858_v56 }
 0x6bc   :  { %v2860_v50 = vsub.f32 %v7784_v12, %v2834_v11  ;;  %v2855_v52 = vmax.f32 %v2853_v15, %v2854_v47  ;;  %v2861_v6 = vsub.f32 %v7788_v53, %v2841_v8  ;;  %v2870_v5 = vmul.f32 1.442695, %v2859_v38 }
 0x6bd   :  { %v2862_v17 = vsub.f32 %v7792_v16, %v2848_v24  ;;  %5587 = vpow2.f32 %v2864_v48  ;;  %vm9858_vm0 = vcmp.gt.f32.partialorder %v9837_v40, 0.0  ;;  %vm9864_vm10 = vcmp.gt.f32.partialorder %v9844_v21, 0.0 }
 0x6be   :  { %v2872_v61 = vmul.f32 1.442695, %v2860_v50  ;;  %v2863_v19 = vsub.f32 %v7796_v26, %v2855_v52  ;;  %5589 = vpow2.f32 %v2866_v51  ;;  %v2874_v14 = vmul.f32 1.442695, %v2861_v6 }
 0x6bf   :  { %5591 = vpow2.f32 %v2868_v62  ;;  %v2876_v60 = vmul.f32 1.442695, %v2862_v17 }
 0x6c0   :  { %5593 = vpow2.f32 %v2870_v5  ;;  %v2878_v55 = vmul.f32 1.442695, %v2863_v19 }
 0x6c1   :  { %5595 = vpow2.f32 %v2872_v61 }
 0x6c2   :  { %5597 = vpow2.f32 %v2874_v14 }
 0x6c3   :  { %5599 = vpow2.f32 %v2876_v60 }
 0x6c4   :  { %5601 = vpow2.f32 %v2878_v55 }
 0x6c7   :  { %v5588_v12 = vpop.eup %5587 }
 0x6c8   :  { %v5590_v0 = vpop.eup %5589  ;;  %v7824_v53 = vsel %vm613_vm9, %v5588_v12, 0.0 }
 0x6c9   :  { %v5592_v16 = vpop.eup %5591  ;;  %v2888_v26 = vsel %vm9856_vm11, %v7824_v53, 0.0  ;;  %v7830_v63 = vsel %vm614_vm7, %v5590_v0, 0.0  ;;  %vm9865_vm11 = vmmov %vm9850_vm2 }
 0x6ca   :  { %v5594_v36 = vpop.eup %5593  ;;  %v2889_v49 = vrot.slane %v2888_v26, 4  ;;  %v2895_v42 = vsel %vm9857_vm12, %v7830_v63, 0.0  ;;  %v7836_v10 = vsel %vm9858_vm0, %v5592_v16, 0.0  ;;  %vm9866_vm12 = vcmp.gt.f32.partialorder %v9846_v20, 0.0  ;;  %vm9867_vm0 = vmmov %vm9850_vm2 }
 0x6cb   :  { %v5596_v27 = vpop.eup %5595  ;;  %v2896_v7 = vrot.slane %v2895_v42, 4  ;;  %v2902_v43 = vsel %vm9859_vm4, %v7836_v10, 0.0  ;;  %v7842_v35 = vsel %vm616_vm14, %v5594_v36, 0.0  ;;  %vm9878_vm4 = vcmask 60416  }
 0x6cc   :  { %v5598_v45 = vpop.eup %5597  ;;  %v2890_v31 = vadd.f32 %v2889_v49, %v2888_v26  ;;  %v2903_v29 = vrot.slane %v2902_v43, 4  ;;  %v2909_v28 = vsel %vm9850_vm2, %v7842_v35, 0.0  ;;  %v7848_v1 = vsel %vm9860_vm13, %v5596_v27, 0.0  ;;  %vm9879_vm2 = vmmov %vm9878_vm4 }
 0x6cd   :  { %v5600_v18 = vpop.eup %5599  ;;  %v2897_v2 = vadd.f32 %v2896_v7, %v2895_v42  ;;  %v2910_v23 = vrot.slane %v2909_v28, 4  ;;  %v2916_v34 = vsel %vm9861_vm15, %v7848_v1, 0.0  ;;  %v7854_v46 = vsel %vm9862_vm5, %v5598_v45, 0.0  ;;  %vm9881_vm13 = vmmov %vm9879_vm2 }
 0x6ce   :  { %v2891_v39 = vrot.slane %v2890_v31, 2  ;;  %v2904_v25 = vadd.f32 %v2903_v29, %v2902_v43  ;;  %v2917_v57 = vrot.slane %v2916_v34, 4  ;;  %v2923_v3 = vsel %vm9863_vm6, %v7854_v46, 0.0  ;;  %v5602_v32 = vpop.eup %5601  ;;  %vm9882_vm15 = vmmov %vm9879_vm2 }
 0x6cf   :  { %v2898_v41 = vrot.slane %v2897_v2, 2  ;;  %v2911_v37 = vadd.f32 %v2910_v23, %v2909_v28  ;;  %v2924_v30 = vrot.slane %v2923_v3, 4  ;;  %v7860_v54 = vsel %vm9864_vm10, %v5600_v18, 0.0  ;;  %vm9883_vm5 = vmmov %vm9879_vm2 }
 0x6d0   :  { %v2892_v15 = vadd.f32 %v2891_v39, %v2890_v31  ;;  %v2905_v11 = vrot.slane %v2904_v25, 2  ;;  %v2918_v22 = vadd.f32 %v2917_v57, %v2916_v34  ;;  %v2930_v59 = vsel %vm9865_vm11, %v7860_v54, 0.0  ;;  %v9868_v34 = vld [vmem:[#allocation15_spill] sm:$0xff]  ;;  %vm9884_vm6 = vmmov %vm9879_vm2 }
 0x6d1   :  { %v2899_v56 = vadd.f32 %v2898_v41, %v2897_v2  ;;  %v2912_v8 = vrot.slane %v2911_v37, 2  ;;  %v2925_v24 = vadd.f32 %v2924_v30, %v2923_v3  ;;  %v2931_v47 = vrot.slane %v2930_v59, 4  ;;  %vm9885_vm10 = vmmov %vm9879_vm2 }
 0x6d2   :  { %v2893_v38 = vrot.slane %v2892_v15, 1  ;;  %v2906_v50 = vadd.f32 %v2905_v11, %v2904_v25  ;;  %v2919_v48 = vrot.slane %v2918_v22, 2  ;;  %v7866_v51 = vsel %vm9866_vm12, %v5602_v32, 0.0  ;;  %v9869_v25 = vld [vmem:[#allocation17_spill] sm:$0xff]  ;;  %vm9886_vm11 = vmmov %vm9879_vm2 }
 0x6d3   :  { %v2900_v62 = vrot.slane %v2899_v56, 1  ;;  %v2913_v52 = vadd.f32 %v2912_v8, %v2911_v37  ;;  %v2937_v5 = vsel %vm9867_vm0, %v7866_v51, 0.0  ;;  %v2926_v14 = vrot.slane %v2925_v24, 2  ;;  %vm9887_vm12 = vmmov %vm9879_vm2 }
 0x6d4   :  { %v2894_v6 = vadd.f32 %v2893_v38, %v2892_v15  ;;  %v2907_v17 = vrot.slane %v2906_v50, 1  ;;  %v2920_v19 = vadd.f32 %v2919_v48, %v2918_v22  ;;  %v2932_v60 = vadd.f32 %v2931_v47, %v2930_v59  ;;  %vm9888_vm0 = vmmov %vm9879_vm2 }
 0x6d5   :  { %v2901_v61 = vadd.f32 %v2900_v62, %v2899_v56  ;;  %v2914_v12 = vrot.slane %v2913_v52, 1  ;;  %v2938_v0 = vrot.slane %v2937_v5, 4  ;;  %v2927_v16 = vadd.f32 %v2926_v14, %v2925_v24  ;;  %v9870_v14 = vld [vmem:[#allocation16_spill] sm:$0xff] }
 0x6d6   :  { %5603 = vrcp.f32 %v2894_v6  ;;  %v2908_v55 = vadd.f32 %v2907_v17, %v2906_v50  ;;  %v2933_v26 = vrot.slane %v2932_v60, 2  ;;  %v2921_v49 = vrot.slane %v2920_v19, 1 }
 0x6d7   :  { %5605 = vrcp.f32 %v2901_v61  ;;  %v2915_v36 = vadd.f32 %v2914_v12, %v2913_v52  ;;  %v2939_v42 = vadd.f32 %v2938_v0, %v2937_v5  ;;  %v2928_v27 = vrot.slane %v2927_v16, 1 }
 0x6d8   :  { %5607 = vrcp.f32 %v2908_v55  ;;  %v2922_v7 = vadd.f32 %v2921_v49, %v2920_v19  ;;  %v2934_v43 = vadd.f32 %v2933_v26, %v2932_v60  ;;  %v9871_v49 = vld [vmem:[#allocation19_spill] sm:$0xff] }
 0x6d9   :  { %5609 = vrcp.f32 %v2915_v36  ;;  %v2940_v45 = vrot.slane %v2939_v42, 2  ;;  %v2929_v18 = vadd.f32 %v2928_v27, %v2927_v16 }
 0x6da   :  { %5611 = vrcp.f32 %v2922_v7  ;;  %v2935_v2 = vrot.slane %v2934_v43, 1 }
 0x6db   :  { %v2941_v23 = vadd.f32 %v2940_v45, %v2939_v42  ;;  %5613 = vrcp.f32 %v2929_v18 }
 0x6dc   :  { %v2936_v41 = vadd.f32 %v2935_v2, %v2934_v43  ;;  %v9872_v2 = vld [vmem:[#allocation18_spill] sm:$0xff] }
 0x6de   :  { %5615 = vrcp.f32 %v2936_v41 }
 0x6e0   :  { %v5604_v31 = vpop.eup %5603 }
 0x6e1   :  { %v5606_v29 = vpop.eup %5605  ;;  %v7871_v28 = vmul.f32 %v5604_v31, %v7824_v53  ;;  %v2942_v53 = vrot.slane %v2941_v23, 1 }
 0x6e2   :  { %v7878_v3 = vmul.f32 %v5606_v29, %v7830_v63  ;;  %v5608_v32 = vpop.eup %5607 }
 0x6e3   :  { %v2970_v39 = vrot.slane %v7871_v28, %v9868_v34  ;;  %v2963_v57 = vrot.slane %v7871_v28, %v9869_v25  ;;  %v7885_v15 = vmul.f32 %v5608_v32, %v7836_v10  ;;  %v5610_v11 = vpop.eup %5609  ;;  %v2943_v63 = vadd.f32 %v2942_v53, %v2941_v23 }
 0x6e4   :  { %v3019_v37 = vrot.slane %v7878_v3, %v9869_v25  ;;  %v3026_v30 = vrot.slane %v7878_v3, %v9868_v34  ;;  %v7892_v56 = vmul.f32 %v5610_v11, %v7842_v35  ;;  %v5612_v8 = vpop.eup %5611  ;;  %v2977_v60 = vrot.slane %v7871_v28, %v9870_v14  ;;  %v9873_v11 = vld [vmem:[#allocation21_spill] sm:$0xff] }
 0x6e5   :  { %2972 = vbcast.lane.b32.xlu1 %v2970_v39, 256  ;;  %2965 = vbcast.lane.b32.xlu0 %v2963_v57, 256  ;;  %v3075_v22 = vrot.slane %v7885_v15, %v9869_v25  ;;  %v3082_v59 = vrot.slane %v7885_v15, %v9868_v34  ;;  %5617 = vrcp.f32 %v2943_v63  ;;  %v7899_v47 = vmul.f32 %v5612_v8, %v7848_v1  ;;  %v5614_v38 = vpop.eup %5613 }
 0x6e6   :  { %v3131_v10 = vrot.slane %v7892_v56, %v9869_v25  ;;  %v3138_v24 = vrot.slane %v7892_v56, %v9868_v34  ;;  %v7906_v48 = vmul.f32 %v5614_v38, %v7854_v46  ;;  %v3033_v55 = vrot.slane %v7878_v3, %v9870_v14 }
 0x6e7   :  { %v3187_v35 = vrot.slane %v7899_v47, %v9869_v25  ;;  %v3194_v50 = vrot.slane %v7899_v47, %v9868_v34  ;;  %v3145_v12 = vrot.slane %v7892_v56, %v9870_v14  ;;  %v3201_v0 = vrot.slane %v7899_v47, %v9870_v14 }
 0x6e8   :  { %v5616_v62 = vpop.eup %5615  ;;  %v3243_v52 = vrot.slane %v7906_v48, %v9869_v25  ;;  %v3250_v1 = vrot.slane %v7906_v48, %v9868_v34  ;;  %v3257_v16 = vrot.slane %v7906_v48, %v9870_v14  ;;  %v2984_v42 = vrot.slane %v7871_v28, %v9871_v49 }
 0x6e9   :  { %3021 = vbcast.lane.b32.xlu1 %v3019_v37, 256  ;;  %3028 = vbcast.lane.b32.xlu0 %v3026_v30, 256  ;;  %v7913_v6 = vmul.f32 %v5616_v62, %v7860_v54  ;;  %v3040_v27 = vrot.slane %v7878_v3, %v9871_v49  ;;  %v3096_v7 = vrot.slane %v7885_v15, %v9871_v49 }
 0x6ea   :  { %v3152_v43 = vrot.slane %v7892_v56, %v9871_v49  ;;  %v3208_v45 = vrot.slane %v7899_v47, %v9871_v49  ;;  %v3264_v31 = vrot.slane %v7906_v48, %v9871_v49  ;;  %v2991_v23 = vrot.slane %v7871_v28, %v9872_v2 }
 0x6eb   :  { %v3299_v5 = vrot.slane %v7913_v6, %v9869_v25  ;;  %v3306_v46 = vrot.slane %v7913_v6, %v9868_v34  ;;  %v3313_v26 = vrot.slane %v7913_v6, %v9870_v14  ;;  %v3320_v29 = vrot.slane %v7913_v6, %v9871_v49 }
 0x6ec   :  { %v3047_v39 = vrot.slane %v7878_v3, %v9872_v2  ;;  %v3103_v57 = vrot.slane %v7885_v15, %v9872_v2  ;;  %v3159_v32 = vrot.slane %v7892_v56, %v9872_v2  ;;  %v3215_v41 = vrot.slane %v7899_v47, %v9872_v2 }
 0x6ed   :  { %3077 = vbcast.lane.b32.xlu1 %v3075_v22, 256  ;;  %3084 = vbcast.lane.b32.xlu0 %v3082_v59, 256  ;;  %v3271_v53 = vrot.slane %v7906_v48, %v9872_v2  ;;  %v3327_v37 = vrot.slane %v7913_v6, %v9872_v2  ;;  %v2998_v63 = vrot.slane %v7871_v28, %v9873_v11 }
 0x6ee   :  { %v3054_v22 = vrot.slane %v7878_v3, %v9873_v11  ;;  %v3110_v59 = vrot.slane %v7885_v15, %v9873_v11  ;;  %v3166_v8 = vrot.slane %v7892_v56, %v9873_v11  ;;  %v3334_v38 = vrot.slane %v7913_v6, %v9873_v11 }
 0x6ef   :  { %v5618_v17 = vpop.eup %5617 }
 0x6f0   :  { %v7920_v61 = vmul.f32 %v5618_v17, %v7866_v51  ;;  %v3089_v51 = vrot.slane %v7885_v15, %v9870_v14 }
 0x6f1   :  { %3133 = vbcast.lane.b32.xlu1 %v3131_v10, 256  ;;  %3140 = vbcast.lane.b32.xlu0 %v3138_v24, 256  ;;  %v3222_v10 = vrot.slane %v7899_v47, %v9873_v11  ;;  %v3278_v24 = vrot.slane %v7906_v48, %v9873_v11 }
 0x6f2   :  { %v3355_v19 = vrot.slane %v7920_v61, %v9869_v25  ;;  %v3362_v54 = vrot.slane %v7920_v61, %v9868_v34  ;;  %v3369_v36 = vrot.slane %v7920_v61, %v9870_v14  ;;  %v3376_v18 = vrot.slane %v7920_v61, %v9871_v49 }
 0x6f3   :  { %v3383_v30 = vrot.slane %v7920_v61, %v9872_v2 }
 0x6f5   :  { %3189 = vbcast.lane.b32.xlu1 %v3187_v35, 256  ;;  %3196 = vbcast.lane.b32.xlu0 %v3194_v50, 256  ;;  %v3390_v35 = vrot.slane %v7920_v61, %v9873_v11  ;;  %v9874_v50 = vld [vmem:[#allocation20_spill] sm:$0xff] }
 0x6f6   :  { %v3005_v62 = vrot.slane %v7871_v28, %v9874_v50  ;;  %v3173_v17 = vrot.slane %v7892_v56, %v9874_v50 }
 0x6f9   :  { %3245 = vbcast.lane.b32.xlu1 %v3243_v52, 256  ;;  %3252 = vbcast.lane.b32.xlu0 %v3250_v1, 256  ;;  %v3061_v52 = vrot.slane %v7878_v3, %v9874_v50  ;;  %v3117_v1 = vrot.slane %v7885_v15, %v9874_v50 }
 0x6fd   :  { %3301 = vbcast.lane.b32.xlu1 %v3299_v5, 256  ;;  %3308 = vbcast.lane.b32.xlu0 %v3306_v46, 256  ;;  %v3229_v5 = vrot.slane %v7899_v47, %v9874_v50  ;;  %v3285_v46 = vrot.slane %v7906_v48, %v9874_v50 }
 0x701   :  { %3357 = vbcast.lane.b32.xlu1 %v3355_v19, 256  ;;  %3364 = vbcast.lane.b32.xlu0 %v3362_v54, 256  ;;  %v3341_v19 = vrot.slane %v7913_v6, %v9874_v50  ;;  %v3397_v54 = vrot.slane %v7920_v61, %v9874_v50 }
 0x705   :  { %2979 = vbcast.lane.b32.xlu1 %v2977_v60, 256  ;;  %3035 = vbcast.lane.b32.xlu0 %v3033_v55, 256  ;;  %v9875_v60 = vld [vmem:[#allocation32_spill] sm:$0xff] }
 0x706   :  { %v3012_v55 = vrot.slane %v7871_v28, %v9875_v60  ;;  %v3236_v28 = vrot.slane %v7899_v47, %v9875_v60 }
 0x709   :  { %3091 = vbcast.lane.b32.xlu1 %v3089_v51, 256  ;;  %3147 = vbcast.lane.b32.xlu0 %v3145_v12, 256  ;;  %v3068_v51 = vrot.slane %v7878_v3, %v9875_v60  ;;  %v3292_v3 = vrot.slane %v7906_v48, %v9875_v60 }
 0x70d   :  { %3203 = vbcast.lane.b32.xlu1 %v3201_v0, 256  ;;  %3259 = vbcast.lane.b32.xlu0 %v3257_v16, 256  ;;  %v3124_v16 = vrot.slane %v7885_v15, %v9875_v60  ;;  %v3348_v15 = vrot.slane %v7913_v6, %v9875_v60 }
 0x711   :  { %3315 = vbcast.lane.b32.xlu1 %v3313_v26, 256  ;;  %3371 = vbcast.lane.b32.xlu0 %v3369_v36, 256  ;;  %v3180_v26 = vrot.slane %v7892_v56, %v9875_v60  ;;  %v3404_v56 = vrot.slane %v7920_v61, %v9875_v60 }
 0x715   :  { %2986 = vbcast.lane.b32.xlu1 %v2984_v42, 256  ;;  %3042 = vbcast.lane.b32.xlu0 %v3040_v27, 256 }
 0x719   :  { %3098 = vbcast.lane.b32.xlu1 %v3096_v7, 256  ;;  %3154 = vbcast.lane.b32.xlu0 %v3152_v43, 256 }
 0x71d   :  { %3210 = vbcast.lane.b32.xlu1 %v3208_v45, 256  ;;  %3266 = vbcast.lane.b32.xlu0 %v3264_v31, 256 }
 0x721   :  { %3322 = vbcast.lane.b32.xlu1 %v3320_v29, 256  ;;  %3378 = vbcast.lane.b32.xlu0 %v3376_v18, 256 }
 0x725   :  { %2993 = vbcast.lane.b32.xlu1 %v2991_v23, 256  ;;  %3049 = vbcast.lane.b32.xlu0 %v3047_v39, 256 }
 0x729   :  { %3105 = vbcast.lane.b32.xlu1 %v3103_v57, 256  ;;  %3161 = vbcast.lane.b32.xlu0 %v3159_v32, 256 }
 0x72d   :  { %3217 = vbcast.lane.b32.xlu1 %v3215_v41, 256  ;;  %3273 = vbcast.lane.b32.xlu0 %v3271_v53, 256 }
 0x731   :  { %3329 = vbcast.lane.b32.xlu1 %v3327_v37, 256  ;;  %3385 = vbcast.lane.b32.xlu0 %v3383_v30, 256 }
 0x735   :  { %3000 = vbcast.lane.b32.xlu1 %v2998_v63, 256  ;;  %3056 = vbcast.lane.b32.xlu0 %v3054_v22, 256 }
 0x739   :  { %3112 = vbcast.lane.b32.xlu1 %v3110_v59, 256  ;;  %3168 = vbcast.lane.b32.xlu0 %v3166_v8, 256 }
 0x73d   :  { %3224 = vbcast.lane.b32.xlu1 %v3222_v10, 256  ;;  %3280 = vbcast.lane.b32.xlu0 %v3278_v24, 256 }
 0x741   :  { %3336 = vbcast.lane.b32.xlu1 %v3334_v38, 256  ;;  %3392 = vbcast.lane.b32.xlu0 %v3390_v35, 256 }
 0x745   :  { %3007 = vbcast.lane.b32.xlu1 %v3005_v62, 256  ;;  %3063 = vbcast.lane.b32.xlu0 %v3061_v52, 256 }
 0x749   :  { %3119 = vbcast.lane.b32.xlu1 %v3117_v1, 256  ;;  %3175 = vbcast.lane.b32.xlu0 %v3173_v17, 256 }
 0x74d   :  { %3231 = vbcast.lane.b32.xlu1 %v3229_v5, 256  ;;  %3287 = vbcast.lane.b32.xlu0 %v3285_v46, 256 }
 0x751   :  { %3343 = vbcast.lane.b32.xlu1 %v3341_v19, 256  ;;  %3399 = vbcast.lane.b32.xlu0 %v3397_v54, 256 }
 0x755   :  { %3014 = vbcast.lane.b32.xlu1 %v3012_v55, 256  ;;  %3070 = vbcast.lane.b32.xlu0 %v3068_v51, 256  ;;  %v9876_v51 = vld [vmem:[#allocation51_spill] sm:$0xff] }
 0x757   :  { %v2973_v12 = vpop.permute.xlu1 %2972  ;;  %v2966_v0 = vpop.permute.xlu0 %2965 }
 0x759   :  { %3126 = vbcast.lane.b32.xlu1 %v3124_v16, 256  ;;  %3182 = vbcast.lane.b32.xlu0 %v3180_v26, 256  ;;  %v3409_v16 = vmul.f32 %v2973_v12, %v9876_v51  ;;  %v9877_v26 = vld [vmem:[#allocation41_spill] sm:$0xff] }
 0x75b   :  { %v3022_v36 = vpop.permute.xlu1 %3021  ;;  %v3029_v42 = vpop.permute.xlu0 %3028 }
 0x75c   :  { %v3416_v50 = vmul.f32 %v3022_v36, %v9877_v26  ;;  %v3417_v11 = vmul.f32 %v3029_v42, %v9876_v51 }
 0x75d   :  { %3238 = vbcast.lane.b32.xlu1 %v3236_v28, 256  ;;  %3294 = vbcast.lane.b32.xlu0 %v3292_v3, 256  ;;  %v3408_v28 = vmul.f32 %v2966_v0, %v9877_v26 }
 0x75e   :  { %v3487_v20 = vsel %vm9881_vm13, %v3416_v50, 0.0  ;;  %v3488_v21 = vsel %vm9882_vm15, %v3417_v11, 0.0  ;;  %vm9891_vm13 = vmmov %vm9888_vm0 }
 0x75f   :  { %v3078_v27 = vpop.permute.xlu1 %3077  ;;  %v3085_v7 = vpop.permute.xlu0 %3084  ;;  %v3472_v60 = vsel %vm9879_vm2, %v3408_v28, 0.0  ;;  %v9880_v28 = vld [vmem:[#allocation43_spill] sm:$0xff]  ;;  %vm9890_vm2 = vmmov %vm9888_vm0 }
 0x760   :  { %v3424_v2 = vmul.f32 %v3078_v27, %v9877_v26  ;;  %v3425_v49 = vmul.f32 %v3085_v7, %v9876_v51  ;;  %vm9892_vm15 = vmmov %vm9888_vm0 }
 0x761   :  { %3350 = vbcast.lane.b32.xlu1 %v3348_v15, 256  ;;  %3406 = vbcast.lane.b32.xlu0 %v3404_v56, 256  ;;  %v3473_v56 = vsel %vm9878_vm4, %v3409_v16, 0.0  ;;  %vm9889_vm4 = vmmov %vm9888_vm0 }
 0x763   :  { %v3134_v43 = vpop.permute.xlu1 %3133  ;;  %v3141_v45 = vpop.permute.xlu0 %3140 }
 0x764   :  { %v3432_v12 = vmul.f32 %v3134_v43, %v9877_v26  ;;  %v3433_v0 = vmul.f32 %v3141_v45, %v9876_v51 }
 0x767   :  { %v3190_v31 = vpop.permute.xlu1 %3189  ;;  %v3197_v29 = vpop.permute.xlu0 %3196 }
 0x768   :  { %v3440_v14 = vmul.f32 %v3190_v31, %v9877_v26  ;;  %v3441_v25 = vmul.f32 %v3197_v29, %v9876_v51 }
 0x76b   :  { %v3246_v47 = vpop.permute.xlu1 %3245  ;;  %v3253_v18 = vpop.permute.xlu0 %3252 }
 0x76c   :  { %v3448_v36 = vmul.f32 %v3246_v47, %v9877_v26  ;;  %v3449_v42 = vmul.f32 %v3253_v18, %v9876_v51  ;;  %v3502_v47 = vsel %vm9883_vm5, %v3424_v2, 0.0  ;;  %v3503_v18 = vsel %vm9884_vm6, %v3425_v49, 0.0  ;;  %vm9893_vm5 = vmmov %vm9888_vm0 }
 0x76d   :  { %vm9894_vm6 = vmmov %vm9888_vm0 }
 0x76e   :  { %v3547_v50 = vsel %vm9889_vm4, %v3448_v36, 0.0  ;;  %v3548_v11 = vsel %vm9890_vm2, %v3449_v42, 0.0  ;;  %vm9898_vm4 = vmmov %vm9888_vm0 }
 0x76f   :  { %v3302_v23 = vpop.permute.xlu1 %3301  ;;  %v3309_v48 = vpop.permute.xlu0 %3308  ;;  %v3549_v13 = vadd.f32 %v3548_v11, %v3547_v50  ;;  %vm9899_vm2 = vmmov %vm9888_vm0 }
 0x770   :  { %v3456_v27 = vmul.f32 %v3302_v23, %v9877_v26  ;;  %v3457_v7 = vmul.f32 %v3309_v48, %v9876_v51  ;;  %v3517_v23 = vsel %vm9885_vm10, %v3432_v12, 0.0  ;;  %v3518_v48 = vsel %vm9886_vm11, %v3433_v0, 0.0  ;;  %vm9895_vm10 = vmmov %vm9888_vm0 }
 0x771   :  { %vm9896_vm11 = vmmov %vm9888_vm0 }
 0x772   :  { %v3562_v2 = vsel %vm9891_vm13, %v3456_v27, 0.0  ;;  %v3563_v49 = vsel %vm9892_vm15, %v3457_v7, 0.0  ;;  %v3474_v27 = vadd.f32 %v3473_v56, %v3472_v60  ;;  %v3489_v7 = vadd.f32 %v3488_v21, %v3487_v20  ;;  %vm9900_vm13 = vmmov %vm9888_vm0 }
 0x773   :  { %v3358_v39 = vpop.permute.xlu1 %3357  ;;  %v3365_v57 = vpop.permute.xlu0 %3364  ;;  %vm9901_vm15 = vmmov %vm9888_vm0 }
 0x774   :  { %v3464_v43 = vmul.f32 %v3358_v39, %v9877_v26  ;;  %v3465_v45 = vmul.f32 %v3365_v57, %v9876_v51  ;;  %v3532_v39 = vsel %vm9887_vm12, %v3440_v14, 0.0  ;;  %v3533_v57 = vsel %vm9888_vm0, %v3441_v25, 0.0  ;;  %vm9897_vm12 = vmmov %vm9888_vm0 }
 0x775   :  { %v3534_v58 = vadd.f32 %v3533_v57, %v3532_v39 }
 0x776   :  { %v3578_v26 = vsel %vm9894_vm6, %v3465_v45, 0.0  ;;  %vm9904_vm6 = vmmov %vm9888_vm0 }
 0x777   :  { %v2980_v32 = vpop.permute.xlu1 %2979  ;;  %v3036_v41 = vpop.permute.xlu0 %3035 }
 0x778   :  { %v3410_v31 = vmul.f32 %v2980_v32, %v9880_v28  ;;  %v3418_v29 = vmul.f32 %v3036_v41, %v9880_v28  ;;  %v3577_v41 = vsel %vm9893_vm5, %v3464_v43, 0.0  ;;  %vm9903_vm5 = vmmov %vm9888_vm0 }
 0x779   :  { %v3579_v4 = vadd.f32 %v3578_v26, %v3577_v41 }
 0x77a   :  { %v3475_v14 = vsel %vm9895_vm10, %v3410_v31, 0.0  ;;  %v3490_v25 = vsel %vm9896_vm11, %v3418_v29, 0.0  ;;  %v3504_v29 = vadd.f32 %v3503_v18, %v3502_v47  ;;  %vm9906_vm10 = vmmov %vm9888_vm0 }
 0x77b   :  { %v8022_v53 = vpop.permute.xlu1 %3091  ;;  %v8024_v6 = vpop.permute.xlu0 %3147  ;;  %v3476_v40 = vadd.f32 %v3475_v14, %v3474_v27  ;;  %vm9907_vm11 = vmmov %vm9888_vm0 }
 0x77c   :  { %v3426_v12 = vmul.f32 %v8022_v53, %v9880_v28  ;;  %v3434_v0 = vmul.f32 %v8024_v6, %v9880_v28  ;;  %v3519_v6 = vadd.f32 %v3518_v48, %v3517_v23 }
 0x77e   :  { %v3505_v21 = vsel %vm9897_vm12, %v3426_v12, 0.0  ;;  %v3520_v20 = vsel %vm9888_vm0, %v3434_v0, 0.0  ;;  %vm9908_vm12 = vmmov %vm9888_vm0 }
 0x77f   :  { %v8026_v37 = vpop.permute.xlu1 %3203  ;;  %v8028_v61 = vpop.permute.xlu0 %3259 }
 0x780   :  { %v3442_v36 = vmul.f32 %v8026_v37, %v9880_v28  ;;  %v3450_v42 = vmul.f32 %v8028_v61, %v9880_v28  ;;  %v3564_v37 = vadd.f32 %v3563_v49, %v3562_v2  ;;  %v3491_v61 = vadd.f32 %v3490_v25, %v3489_v7 }
 0x781   :  { %v3506_v2 = vadd.f32 %v3505_v21, %v3504_v29  ;;  %v3521_v49 = vadd.f32 %v3520_v20, %v3519_v6 }
 0x782   :  { %v3535_v60 = vsel %vm9898_vm4, %v3442_v36, 0.0  ;;  %vm9909_vm4 = vmmov %vm9888_vm0 }
 0x783   :  { %v8030_v30 = vpop.permute.xlu1 %3315  ;;  %v8032_v63 = vpop.permute.xlu0 %3371  ;;  %v3536_v41 = vadd.f32 %v3535_v60, %v3534_v58 }
 0x784   :  { %v3458_v43 = vmul.f32 %v8030_v30, %v9880_v28  ;;  %v3466_v45 = vmul.f32 %v8032_v63, %v9880_v28  ;;  %v3550_v30 = vsel %vm9899_vm2, %v3450_v42, 0.0  ;;  %v9902_v28 = vld [vmem:[#allocation46_spill] sm:$0xff]  ;;  %vm9910_vm2 = vmmov %vm9888_vm0 }
 0x785   :  { %v3551_v26 = vadd.f32 %v3550_v30, %v3549_v13 }
 0x786   :  { %v3565_v63 = vsel %vm9900_vm13, %v3458_v43, 0.0  ;;  %v3580_v56 = vsel %vm9901_vm15, %v3466_v45, 0.0  ;;  %vm9911_vm13 = vmmov %vm9888_vm0 }
 0x787   :  { %v8034_v22 = vpop.permute.xlu1 %2986  ;;  %v8036_v59 = vpop.permute.xlu0 %3042  ;;  %v3581_v14 = vadd.f32 %v3580_v56, %v3579_v4  ;;  %vm9912_vm15 = vmmov %vm9888_vm0 }
 0x788   :  { %v3411_v47 = vmul.f32 %v8034_v22, %v9902_v28  ;;  %v3419_v18 = vmul.f32 %v8036_v59, %v9902_v28 }
 0x78a   :  { %v3492_v25 = vsel %vm9904_vm6, %v3419_v18, 0.0  ;;  %vm9914_vm6 = vmmov %vm9888_vm0 }
 0x78b   :  { %v8038_v8 = vpop.permute.xlu1 %3098  ;;  %v8040_v10 = vpop.permute.xlu0 %3154  ;;  %v3493_v7 = vadd.f32 %v3492_v25, %v3491_v61  ;;  %v9915_v61 = vld [vmem:[#allocation52_spill] sm:$0xff] }
 0x78c   :  { %v3427_v39 = vmul.f32 %v8038_v8, %v9902_v28  ;;  %v3435_v57 = vmul.f32 %v8040_v10, %v9902_v28  ;;  %v3566_v8 = vadd.f32 %v3565_v63, %v3564_v37  ;;  %v3477_v10 = vsel %vm9903_vm5, %v3411_v47, 0.0  ;;  %vm9913_vm5 = vmmov %vm9888_vm0 }
 0x78d   :  { %v3478_v27 = vadd.f32 %v3477_v10, %v3476_v40 }
 0x78f   :  { %v8042_v24 = vpop.permute.xlu1 %3210  ;;  %v8044_v38 = vpop.permute.xlu0 %3266 }
 0x790   :  { %v3443_v50 = vmul.f32 %v8042_v24, %v9902_v28  ;;  %v3451_v11 = vmul.f32 %v8044_v38, %v9902_v28  ;;  %v9905_v24 = vld [vmem:[#allocation48_spill] sm:$0xff] }
 0x792   :  { %v3537_v13 = vsel %vm9908_vm12, %v3443_v50, 0.0  ;;  %v3552_v4 = vsel %vm9888_vm0, %v3451_v11, 0.0  ;;  %vm9919_vm12 = vmmov %vm9888_vm0 }
 0x793   :  { %v8046_v35 = vpop.permute.xlu1 %3322  ;;  %v8048_v62 = vpop.permute.xlu0 %3378  ;;  %v3553_v30 = vadd.f32 %v3552_v4, %v3551_v26  ;;  %v9928_v4 = vld [vmem:[#allocation49_spill] sm:$0xff] }
 0x794   :  { %v3459_v22 = vmul.f32 %v8046_v35, %v9902_v28  ;;  %v3467_v59 = vmul.f32 %v8048_v62, %v9902_v28  ;;  %v3507_v35 = vsel %vm9906_vm10, %v3427_v39, 0.0  ;;  %v3522_v62 = vsel %vm9907_vm11, %v3435_v57, 0.0  ;;  %vm9916_vm10 = vmmov %vm9888_vm0 }
 0x795   :  { %v3508_v29 = vadd.f32 %v3507_v35, %v3506_v2  ;;  %v3523_v6 = vadd.f32 %v3522_v62, %v3521_v49  ;;  %vm9917_vm11 = vmmov %vm9888_vm0 }
 0x796   :  { %v3567_v58 = vsel %vm9909_vm4, %v3459_v22, 0.0  ;;  %v3582_v42 = vsel %vm9910_vm2, %v3467_v59, 0.0  ;;  %v9918_v59 = vld [vmem:[#allocation47_spill] sm:$0xff]  ;;  %vm9920_vm4 = vmmov %vm9888_vm0 }
 0x797   :  { %v8050_v52 = vpop.permute.xlu1 %2993  ;;  %v8052_v1 = vpop.permute.xlu0 %3049  ;;  %v8174_v63 = vadd.f32 %v3567_v58, %v3566_v8  ;;  %v8176_v40 = vadd.f32 %v3582_v42, %v3581_v14  ;;  %vm9921_vm2 = vmmov %vm9888_vm0 }
 0x798   :  { %v3412_v12 = vmul.f32 %v8050_v52, %v9905_v24  ;;  %v3420_v38 = vmul.f32 %v8052_v1, %v9905_v24 }
 0x79a   :  { %v3479_v37 = vsel %vm9911_vm13, %v3412_v12, 0.0  ;;  %v3494_v21 = vsel %vm9912_vm15, %v3420_v38, 0.0  ;;  %vm9922_vm13 = vmmov %vm9888_vm0 }
 0x79b   :  { %v8054_v17 = vpop.permute.xlu1 %3105  ;;  %v8056_v5 = vpop.permute.xlu0 %3161  ;;  %v3480_v28 = vadd.f32 %v3479_v37, %v3478_v27  ;;  %v3495_v47 = vadd.f32 %v3494_v21, %v3493_v7  ;;  %vm9923_vm15 = vmmov %vm9888_vm0 }
 0x79c   :  { %v3428_v52 = vmul.f32 %v8054_v17, %v9905_v24  ;;  %v3436_v1 = vmul.f32 %v8056_v5, %v9905_v24  ;;  %v3538_v17 = vadd.f32 %v3537_v13, %v3536_v41 }
 0x79e   :  { %v3509_v5 = vsel %vm9913_vm5, %v3428_v52, 0.0  ;;  %vm9924_vm5 = vmmov %vm9888_vm0 }
 0x79f   :  { %v8058_v46 = vpop.permute.xlu1 %3217  ;;  %v8060_v19 = vpop.permute.xlu0 %3273  ;;  %v3510_v49 = vadd.f32 %v3509_v5, %v3508_v29 }
 0x7a0   :  { %v3444_v43 = vmul.f32 %v8058_v46, %v9905_v24  ;;  %v3452_v45 = vmul.f32 %v8060_v19, %v9905_v24  ;;  %v3524_v46 = vsel %vm9914_vm6, %v3436_v1, 0.0  ;;  %vm9925_vm6 = vmmov %vm9888_vm0 }
 0x7a1   :  { %v3525_v22 = vadd.f32 %v3524_v46, %v3523_v6 }
 0x7a2   :  { %v3539_v18 = vsel %vm9916_vm10, %v3444_v43, 0.0  ;;  %v3554_v39 = vsel %vm9917_vm11, %v3452_v45, 0.0  ;;  %vm9926_vm10 = vmmov %vm9888_vm0 }
 0x7a3   :  { %v8062_v54 = vpop.permute.xlu1 %3329  ;;  %v8064_v55 = vpop.permute.xlu0 %3385  ;;  %v3555_v10 = vadd.f32 %v3554_v39, %v3553_v30  ;;  %vm9927_vm11 = vmmov %vm9888_vm0 }
 0x7a4   :  { %v3460_v57 = vmul.f32 %v8062_v54, %v9905_v24  ;;  %v3468_v50 = vmul.f32 %v8064_v55, %v9905_v24 }
 0x7a7   :  { %v8068_v3 = vpop.permute.xlu1 %3000  ;;  %v8070_v15 = vpop.permute.xlu0 %3056 }
 0x7a8   :  { %v3413_v19 = vmul.f32 %v8068_v3, %v9915_v61  ;;  %v3421_v56 = vmul.f32 %v8070_v15, %v9915_v61 }
 0x7aa   :  { %v3481_v8 = vsel %vm9919_vm12, %v3413_v19, 0.0  ;;  %v3496_v54 = vsel %vm9888_vm0, %v3421_v56, 0.0  ;;  %vm9929_vm12 = vmmov %vm9888_vm0 }
 0x7ab   :  { %v8082_v34 = vpop.permute.xlu1 %3112  ;;  %v8084_v16 = vpop.permute.xlu0 %3168  ;;  %v3482_v35 = vadd.f32 %v3481_v8, %v3480_v28 }
 0x7ac   :  { %v3429_v11 = vmul.f32 %v8082_v34, %v9915_v61  ;;  %v3437_v3 = vmul.f32 %v8084_v16, %v9915_v61  ;;  %v3540_v34 = vadd.f32 %v3539_v18, %v3538_v17 }
 0x7ae   :  { %v3511_v24 = vsel %vm9922_vm13, %v3429_v11, 0.0  ;;  %v3526_v12 = vsel %vm9923_vm15, %v3437_v3, 0.0  ;;  %vm9932_vm13 = vmmov %vm9888_vm0 }
 0x7af   :  { %v8102_v51 = vpop.permute.xlu1 %3224  ;;  %v8104_v32 = vpop.permute.xlu0 %3280  ;;  %v3512_v52 = vadd.f32 %v3511_v24, %v3510_v49  ;;  %v3527_v1 = vadd.f32 %v3526_v12, %v3525_v22  ;;  %vm9933_vm15 = vmmov %vm9888_vm0 }
 0x7b0   :  { %v3445_v16 = vmul.f32 %v8102_v51, %v9915_v61  ;;  %v3453_v25 = vmul.f32 %v8104_v32, %v9915_v61 }
 0x7b2   :  { %v3541_v27 = vsel %vm9929_vm12, %v3445_v16, 0.0  ;;  %v3556_v7 = vsel %vm9888_vm0, %v3453_v25, 0.0  ;;  %vm9938_vm12 = vmmov %vm9888_vm0 }
 0x7b3   :  { %v8126_v31 = vpop.permute.xlu1 %3336  ;;  %v8128_v53 = vpop.permute.xlu0 %3392  ;;  %v3542_v16 = vadd.f32 %v3541_v27, %v3540_v34  ;;  %v3557_v25 = vadd.f32 %v3556_v7, %v3555_v10 }
 0x7b4   :  { %v3461_v43 = vmul.f32 %v8126_v31, %v9915_v61  ;;  %v3469_v45 = vmul.f32 %v8128_v53, %v9915_v61 }
 0x7b7   :  { %v3008_v23 = vpop.permute.xlu1 %3007  ;;  %v3064_v48 = vpop.permute.xlu0 %3063 }
 0x7b8   :  { %v3414_v41 = vmul.f32 %v3008_v23, %v9918_v59  ;;  %v3422_v26 = vmul.f32 %v3064_v48, %v9918_v59  ;;  %v3569_v23 = vsel %vm9920_vm4, %v3460_v57, 0.0  ;;  %v3584_v48 = vsel %vm9921_vm2, %v3468_v50, 0.0  ;;  %vm9930_vm4 = vmmov %vm9888_vm0 }
 0x7b9   :  { %vm9931_vm2 = vmmov %vm9888_vm0 }
 0x7ba   :  { %v3483_v62 = vsel %vm9924_vm5, %v3414_v41, 0.0  ;;  %v3498_v13 = vsel %vm9925_vm6, %v3422_v26, 0.0  ;;  %vm9934_vm5 = vmmov %vm9888_vm0 }
 0x7bb   :  { %v3120_v0 = vpop.permute.xlu1 %3119  ;;  %v3176_v36 = vpop.permute.xlu0 %3175  ;;  %v3484_v29 = vadd.f32 %v3483_v62, %v3482_v35  ;;  %v3571_v39 = vsel %vm9934_vm5, %v3461_v43, 0.0  ;;  %vm9935_vm6 = vmmov %vm9888_vm0  ;;  %vm9946_vm5 = vcmask 64512  }
 0x7bc   :  { %v3430_v55 = vmul.f32 %v3120_v0, %v9918_v59  ;;  %v3438_v14 = vmul.f32 %v3176_v36, %v9918_v59  ;;  %v3497_v36 = vadd.f32 %v3496_v54, %v3495_v47  ;;  %v3586_v57 = vsel %vm9935_vm6, %v3469_v45, 0.0 }
 0x7bd   :  { %vm9947_vm6 = vcmask 130048  }
 0x7be   :  { %v3513_v51 = vsel %vm9926_vm10, %v3430_v55, 0.0  ;;  %v3528_v32 = vsel %vm9927_vm11, %v3438_v14, 0.0  ;;  %v3499_v6 = vadd.f32 %v3498_v13, %v3497_v36  ;;  %vm9936_vm10 = vmmov %vm9888_vm0 }
 0x7bf   :  { %v3232_v20 = vpop.permute.xlu1 %3231  ;;  %v3288_v60 = vpop.permute.xlu0 %3287  ;;  %v3514_v17 = vadd.f32 %v3513_v51, %v3512_v52  ;;  %v3529_v30 = vadd.f32 %v3528_v32, %v3527_v1  ;;  %vm9937_vm11 = vmmov %vm9888_vm0  ;;  %v9941_v51 = vld [vmem:[#allocation22_spill] sm:$0xff] }
 0x7c0   :  { %v3446_v19 = vmul.f32 %v3232_v20, %v9918_v59  ;;  %v3454_v56 = vmul.f32 %v3288_v60, %v9918_v59 }
 0x7c2   :  { %v3543_v41 = vsel %vm9936_vm10, %v3446_v19, 0.0  ;;  %v3558_v26 = vsel %vm9937_vm11, %v3454_v56, 0.0  ;;  %v3685_v56 = vld [vmem:[#allocation7 + $0x40] sm:$0xff]  ;;  %vm9948_vm10 = vcmask 195584   ;;  %vm9949_vm11 = vcmask 261120  }
 0x7c3   :  { %v3344_v2 = vpop.permute.xlu1 %3343  ;;  %v3400_v15 = vpop.permute.xlu0 %3399  ;;  %v3544_v35 = vadd.f32 %v3543_v41, %v3542_v16  ;;  %v3559_v36 = vadd.f32 %v3558_v26, %v3557_v25  ;;  %v5652_v26 = vld [vmem:[#allocation2] sm:$0xff] }
 0x7c4   :  { %v3462_v53 = vmul.f32 %v3344_v2, %v9918_v59  ;;  %v3470_v61 = vmul.f32 %v3400_v15, %v9918_v59  ;;  %v3570_v15 = vadd.f32 %v3569_v23, %v8174_v63  ;;  %v3585_v59 = vadd.f32 %v3584_v48, %v8176_v40 }
 0x7c6   :  { %v3573_v8 = vsel %vm9938_vm12, %v3462_v53, 0.0  ;;  %v3588_v54 = vsel %vm9888_vm0, %v3470_v61, 0.0  ;;  %v3572_v24 = vadd.f32 %v3571_v39, %v3570_v15  ;;  %v3587_v12 = vadd.f32 %v3586_v57, %v3585_v59  ;;  %v3688_v61 = vld [vmem:[#allocation7 + $0x58] sm:$0xff]  ;;  %vm9955_vm12 = vmmov %vm9888_vm0 }
 0x7c7   :  { %v3015_v38 = vpop.permute.xlu1 %3014  ;;  %v3071_v0 = vpop.permute.xlu0 %3070 }
 0x7c8   :  { %v3415_v58 = vmul.f32 %v3015_v38, %v9928_v4  ;;  %v3423_v42 = vmul.f32 %v3071_v0, %v9928_v4  ;;  %v3574_v62 = vadd.f32 %v3573_v8, %v3572_v24  ;;  %v3589_v13 = vadd.f32 %v3588_v54, %v3587_v12 }
 0x7ca   :  { %v3485_v28 = vsel %vm9930_vm4, %v3415_v58, 0.0  ;;  %v3500_v31 = vsel %vm9931_vm2, %v3423_v42, 0.0  ;;  %vm9939_vm4 = vmmov %vm9888_vm0 }
 0x7cb   :  { %v3127_v37 = vpop.permute.xlu1 %3126  ;;  %v3183_v21 = vpop.permute.xlu0 %3182  ;;  %v3486_v3 = vadd.f32 %v3485_v28, %v3484_v29  ;;  %v3501_v49 = vadd.f32 %v3500_v31, %v3499_v6  ;;  %vm9940_vm2 = vmmov %vm9888_vm0  ;;  %v3686_v28 = vld [vmem:[#allocation7 + $0x48] sm:$0xff]  ;;  %v3687_v31 = vld [vmem:[#allocation7 + $0x50] sm:$0xff] }
 0x7cc   :  { %v3431_v5 = vmul.f32 %v3127_v37, %v9928_v4  ;;  %v3439_v46 = vmul.f32 %v3183_v21, %v9928_v4  ;;  %v5531_v53 = vpack.c.bf16 %v3686_v28, %v3685_v56  ;;  %v5534_v57 = vpack.c.bf16 %v3688_v61, %v3687_v31 }
 0x7ce   :  { %v3515_v47 = vsel %vm9932_vm13, %v3431_v5, 0.0  ;;  %v3530_v18 = vsel %vm9933_vm15, %v3439_v46, 0.0  ;;  %vm9942_vm13 = vmmov %vm9888_vm0  ;;  %5532 = vmatpush3.bf16.msra.mxu0 %v5531_v53 }
 0x7cf   :  { %v3516_v50 = vadd.f32 %v3515_v47, %v3514_v17  ;;  %v3531_v20 = vadd.f32 %v3530_v18, %v3529_v30  ;;  %v3239_v11 = vpop.permute.xlu1 %3238  ;;  %v3295_v60 = vpop.permute.xlu0 %3294  ;;  %vm9943_vm15 = vmmov %vm9888_vm0  ;;  %v9944_v17 = vld [vmem:[#allocation23_spill] sm:$0xff] }
 0x7d0   :  { %v3447_v22 = vmul.f32 %v3239_v11, %v9928_v4  ;;  %v3455_v2 = vmul.f32 %v3295_v60, %v9928_v4 }
 0x7d1   :  { %v3592_v55 = vcombine.low %v3486_v3, %v3516_v50  ;;  %v3600_v14 = vcombine.low %v3501_v49, %v3531_v20  ;;  %v9945_v50 = vmov 0.0|0.0   ;;  %v5465_v49 = vld [vmem:[%s9329_s5 + $0x1] ss:$0 sm:$0xff] }
 0x7d2   :  { %v3545_v63 = vsel %vm9939_vm4, %v3447_v22, 0.0  ;;  %v3560_v40 = vsel %vm9940_vm2, %v3455_v2, 0.0  ;;  %5533 = vmatprep.subr.bf16.mxu0 %v9945_v50  ;;  %vm9958_vm4 = vmmov %vm9888_vm0 }
 0x7d3   :  { %v3351_v38 = vpop.permute.xlu1 %3350  ;;  %v3407_v0 = vpop.permute.xlu0 %3406  ;;  %v3599_v32 = vrot.slane %v3592_v55, %v9941_v51  ;;  %v3607_v34 = vrot.slane %v3600_v14, %v9941_v51  ;;  %v3546_v42 = vadd.f32 %v3545_v63, %v3544_v35  ;;  %v3561_v52 = vadd.f32 %v3560_v40, %v3559_v36  ;;  %5535 = vmatpush3.bf16.msra.mxu0 %v5534_v57  ;;  %vm9959_vm2 = vmmov %vm9888_vm0 }
 0x7d4   :  { %v3463_v23 = vmul.f32 %v3351_v38, %v9928_v4  ;;  %v3471_v48 = vmul.f32 %v3407_v0, %v9928_v4 }
 0x7d5   :  { %v3625_v45 = vcombine.high %v3599_v32, %v3607_v34  ;;  %v3624_v6 = vcombine.low %v3599_v32, %v3607_v34  ;;  %v3690_v32 = vld [vmem:[#allocation8 + $0x8] sm:$0xf] }
 0x7d6   :  { %v3575_v10 = vsel %vm9942_vm13, %v3463_v23, 0.0  ;;  %v3590_v58 = vsel %vm9943_vm15, %v3471_v48, 0.0  ;;  %vm9961_vm13 = vmmov %vm9888_vm0 }
 0x7d7   :  { %v3576_v1 = vadd.f32 %v3575_v10, %v3574_v62  ;;  %v3591_v27 = vadd.f32 %v3590_v58, %v3589_v13  ;;  %v3639_v30 = vrot.slane %v3625_v45, %v9944_v17  ;;  %v3632_v46 = vrot.slane %v3624_v6, %v9944_v17  ;;  %v5466_v13 = vld [vmem:[%s9328_s4 + $0x8] sm:$0xf]  ;;  %vm9962_vm15 = vmmov %vm9888_vm0 }
 0x7d9   :  { %v3608_v7 = vcombine.low %v3546_v42, %v3576_v1  ;;  %v3616_v43 = vcombine.low %v3561_v52, %v3591_v27  ;;  %v9952_v52 = vmov 0.0  }
 0x7db   :  { %v3615_v4 = vrot.slane %v3608_v7, %v9941_v51  ;;  %v3623_v29 = vrot.slane %v3616_v43, %v9941_v51 }
 0x7dd   :  { %v3641_v37 = vcombine.high %v3615_v4, %v3623_v29  ;;  %v3640_v21 = vcombine.low %v3615_v4, %v3623_v29 }
 0x7df   :  { %v3655_v5 = vrot.slane %v3641_v37, %v9944_v17  ;;  %v3648_v19 = vrot.slane %v3640_v21, %v9944_v17 }
 0x7e1   :  { %v3658_v47 = vcombine.low %v3639_v30, %v3655_v5  ;;  %v3657_v18 = vcombine.high %v3632_v46, %v3648_v19  ;;  %v3656_v39 = vcombine.low %v3632_v46, %v3648_v19  ;;  %v3659_v20 = vcombine.high %v3639_v30, %v3655_v5 }
 0x7e3   :  { %3665 = vrot.lane.b32.xlu0 %v3658_v47, %s5788_s26  ;;  %3661 = vrot.lane.b32.xlu1 %v3657_v18, %s5776_s24 }
 0x7e7   :  { %3669 = vrot.lane.b32.xlu1 %v3659_v20, %s5789_s27 }
 0x855   :  { %v3662_v11 = vpop.permute.xlu1 %3661  ;;  %v3666_v60 = vpop.permute.xlu0 %3665 }
 0x856   :  { %v3672_v3 = vsel %vm9946_vm5, %v3656_v39, %v3662_v11  ;;  %vm9964_vm5 = vmmov %vm9888_vm0 }
 0x857   :  { %v3673_v2 = vsel %vm9947_vm6, %v3672_v3, %v3666_v60  ;;  %vm9965_vm6 = vmmov %vm9888_vm0 }
 0x859   :  { %v3670_v22 = vpop.permute.xlu1 %3669 }
 0x85a   :  { %v3674_v15 = vsel %vm9948_vm10, %v3673_v2, %v3670_v22  ;;  %vm9966_vm10 = vmmov %vm9888_vm0 }
 0x85b   :  { %v3681_v59 = vadd.f32 %v5465_v49, %v3674_v15 }
 0x85d   :  { %v3682_v41 = vmax.f32 %v3681_v59, 0.0 }
 0x85f   :  { %v3683_v8 = vadd.f32 %v5652_v26, %v3682_v41 }
 0x861   :  { %5516 = vmatmul.mubr.msk.f32.vlgmr.msra.gmra.mrb[2].mxu0 %vm9949_vm11, %v3683_v8  ;;  %vm9967_vm11 = vmmov %vm9888_vm0 }
 0x934   :  { %v3764_v54 = vpop.f32.mrb[2].mxu0 }
 0x935   :  { %3772 = vrot.lane.b32.xlu1 %v3764_v54, %s5785_s22  ;;  %3769 = vrot.lane.b32.xlu0 %v3764_v54, %s5784_s21  ;;  %v5517_v55 = vpop.f32.mrb[3].mxu0 }
 0x939   :  { %3775 = vrot.lane.b32.xlu0 %v3764_v54, %s5783_s3 }
 0x9a7   :  { %v3773_v14 = vpop.permute.xlu1 %3772  ;;  %v3770_v16 = vpop.permute.xlu0 %3769 }
 0x9a8   :  { %v3778_v25 = vcombine.low %v3764_v54, %v3773_v14  ;;  %v3779_v24 = vcombine.high %v3764_v54, %v3773_v14 }
 0x9aa   :  { %v3786_v63 = vrot.slane %v3778_v25, %v9941_v51  ;;  %v3793_v48 = vrot.slane %v3779_v24, %v9941_v51 }
 0x9ab   :  { %v3776_v12 = vpop.permute.xlu0 %3775 }
 0x9ac   :  { %v3794_v38 = vcombine.low %v3770_v16, %v3776_v12  ;;  %v3795_v0 = vcombine.high %v3770_v16, %v3776_v12 }
 0x9ae   :  { %v3802_v40 = vrot.slane %v3794_v38, %v9941_v51  ;;  %v3809_v23 = vrot.slane %v3795_v0, %v9941_v51 }
 0x9b0   :  { %v3810_v35 = vcombine.low %v3786_v63, %v3802_v40  ;;  %v3811_v36 = vcombine.high %v3786_v63, %v3802_v40  ;;  %v3826_v62 = vcombine.low %v3793_v48, %v3809_v23  ;;  %v3827_v27 = vcombine.high %v3793_v48, %v3809_v23 }
 0x9b2   :  { %v8276_v34 = vrot.slane %v3810_v35, %v9944_v17  ;;  %v8279_v10 = vrot.slane %v3811_v36, %v9944_v17  ;;  %v8288_v7 = vrot.slane %v3826_v62, %v9944_v17  ;;  %v8299_v37 = vrot.slane %v3827_v27, %v9944_v17 }
 0x9b4   :  { %9950 = vst [vmem:[#allocation40_spill] sm:$0xff] %v8276_v34  ;;  %9951 = vst [vmem:[#allocation24_spill] sm:$0xff] %v8279_v10  ;;  %v3878_v58 = vmul.f32 %v5466_v13, %v8276_v34  ;;  %v3846_v42 = vmul.f32 %v8276_v34, %v3690_v32  ;;  %v8285_v1 = vcombine.high %v8276_v34, %v9952_v52 }
 0x9b5   :  { %9954 = vst [vmem:[#allocation25_spill] sm:$0xff] %v8288_v7  ;;  %v3880_v43 = vmul.f32 %v5466_v13, %v8279_v10  ;;  %v8296_v6 = vcombine.high %v8279_v10, %v9952_v52  ;;  %9957 = vst [vmem:[#allocation27_spill] sm:$0xff] %v8299_v37  ;;  %v3882_v21 = vmul.f32 %v5466_v13, %v8288_v7 }
 0x9b6   :  { %9953 = vst [vmem:[#allocation26_spill] sm:$0xff] %v8285_v1  ;;  %v3886_v45 = vsel %vm9955_vm12, %v3878_v58, 0.0  ;;  %v3854_v4 = vsel %vm9888_vm0, %v3846_v42, 0.0  ;;  %v3879_v29 = vmul.f32 %v5466_v13, %v8285_v1  ;;  %v8307_v19 = vcombine.high %v8288_v7, %v9952_v52  ;;  %vm9968_vm12 = vmmov %vm9888_vm0 }
 0x9b7   :  { %9956 = vst [vmem:[#allocation28_spill] sm:$0xff] %v8296_v6  ;;  %3887 = vadd.xlane.f32.xlu0 %v3886_v45  ;;  %3855 = vadd.xlane.f32.xlu1 %v3854_v4  ;;  %v3892_v30 = vsel %vm9958_vm4, %v3880_v43, 0.0  ;;  %v3881_v46 = vmul.f32 %v5466_v13, %v8296_v6  ;;  %v3884_v56 = vmul.f32 %v5466_v13, %v8299_v37  ;;  %v3898_v28 = vsel %vm9961_vm13, %v3882_v21, 0.0  ;;  %vm9969_vm4 = vmmov %vm9888_vm0 }
 0x9b8   :  { %v3889_v5 = vsel %vm9959_vm2, %v3879_v29, 0.0  ;;  %9960 = vst [vmem:[#allocation30_spill] sm:$0xff] %v8307_v19  ;;  %v3883_v53 = vmul.f32 %v5466_v13, %v8307_v19  ;;  %v8315_v61 = vcombine.high %v8299_v37, %v9952_v52  ;;  %v3848_v39 = vmul.f32 %v8279_v10, %v3690_v32  ;;  %vm9970_vm2 = vmmov %vm9888_vm0 }
 0x9b9   :  { %v3895_v31 = vsel %vm9962_vm15, %v3881_v46, 0.0  ;;  %v3904_v47 = vsel %vm9964_vm5, %v3884_v56, 0.0  ;;  %v3850_v11 = vmul.f32 %v8288_v7, %v3690_v32  ;;  %v3849_v60 = vmul.f32 %v8296_v6, %v3690_v32  ;;  %vm9971_vm13 = vmmov %vm9888_vm0 }
 0x9ba   :  { %9963 = vst [vmem:[#allocation29_spill] sm:$0xff] %v8315_v61  ;;  %v3901_v18 = vsel %vm9965_vm6, %v3883_v53, 0.0  ;;  %v3885_v57 = vmul.f32 %v5466_v13, %v8315_v61  ;;  %v3860_v50 = vsel %vm9966_vm10, %v3848_v39, 0.0  ;;  %v3851_v22 = vmul.f32 %v8307_v19, %v3690_v32  ;;  %vm9972_vm15 = vmmov %vm9888_vm0 }
 0x9bb   :  { %3893 = vadd.xlane.f32.xlu0 %v3892_v30  ;;  %3890 = vadd.xlane.f32.xlu1 %v3889_v5  ;;  %v3866_v3 = vsel %vm9968_vm12, %v3850_v11, 0.0  ;;  %v3863_v49 = vsel %vm9888_vm0, %v3849_v60, 0.0  ;;  %v3847_v2 = vmul.f32 %v8285_v1, %v3690_v32  ;;  %v3853_v41 = vmul.f32 %v8315_v61, %v3690_v32 }
 0x9bc   :  { %v3907_v20 = vsel %vm9967_vm11, %v3885_v57, 0.0  ;;  %v3869_v15 = vsel %vm9969_vm4, %v3851_v22, 0.0  ;;  %v3852_v26 = vmul.f32 %v8299_v37, %v3690_v32 }
 0x9bd   :  { %v3857_v59 = vsel %vm9970_vm2, %v3847_v2, 0.0  ;;  %v3875_v8 = vsel %vm9971_vm13, %v3853_v41, 0.0 }
 0x9be   :  { %v3872_v54 = vsel %vm9972_vm15, %v3852_v26, 0.0 }
 0x9bf   :  { %3899 = vadd.xlane.f32.xlu0 %v3898_v28  ;;  %3896 = vadd.xlane.f32.xlu1 %v3895_v31 }
 0x9c3   :  { %3905 = vadd.xlane.f32.xlu0 %v3904_v47  ;;  %3902 = vadd.xlane.f32.xlu1 %v3901_v18 }
 0x9c7   :  { %3861 = vadd.xlane.f32.xlu0 %v3860_v50  ;;  %3908 = vadd.xlane.f32.xlu1 %v3907_v20 }
 0x9cb   :  { %3867 = vadd.xlane.f32.xlu0 %v3866_v3  ;;  %3864 = vadd.xlane.f32.xlu1 %v3863_v49 }
 0x9cf   :  { %3870 = vadd.xlane.f32.xlu1 %v3869_v15  ;;  %3858 = vadd.xlane.f32.xlu0 %v3857_v59 }
 0x9d3   :  { %3876 = vadd.xlane.f32.xlu1 %v3875_v8  ;;  %3873 = vadd.xlane.f32.xlu0 %v3872_v54 }
 0xa44   :  { %v8335_v55 = vpop.xlane.xlu0 %3887  ;;  %v8337_v14 = vpop.xlane.xlu1 %3855 }
 0xa45   :  { %v3910_v16 = vadd.f32 %v8335_v55, %v8337_v14 }
 0xa47   :  { %vm3974_vm5 = vcmp.gt.f32.partialorder %v3910_v16, 0.0  ;;  %v4038_v0 = vmul.f32 0.2, %v3910_v16 }
 0xa48   :  { %v8341_v25 = vpop.xlane.xlu0 %3893  ;;  %v8343_v24 = vpop.xlane.xlu1 %3890 }
 0xa49   :  { %v3926_v12 = vadd.f32 %v8341_v25, %v8337_v14  ;;  %v3918_v38 = vadd.f32 %v8343_v24, %v8337_v14  ;;  %v8357_v32 = vsel %vm3974_vm5, %v3910_v16, %v4038_v0 }
 0xa4b   :  { %v4054_v23 = vmul.f32 0.2, %v3926_v12  ;;  %v4046_v48 = vmul.f32 0.2, %v3918_v38  ;;  %vm3990_vm6 = vcmp.gt.f32.partialorder %v3926_v12, 0.0  ;;  %vm3982_vm10 = vcmp.gt.f32.partialorder %v3918_v38, 0.0 }
 0xa4c   :  { %v8349_v63 = vpop.xlane.xlu0 %3899  ;;  %v8351_v40 = vpop.xlane.xlu1 %3896 }
 0xa4d   :  { %v3942_v35 = vadd.f32 %v8349_v63, %v8337_v14  ;;  %v3934_v36 = vadd.f32 %v8351_v40, %v8337_v14  ;;  %v8363_v52 = vsel %vm3990_vm6, %v3926_v12, %v4054_v23  ;;  %v8365_v27 = vsel %vm3982_vm10, %v3918_v38, %v4046_v48 }
 0xa4f   :  { %vm4006_vm11 = vcmp.gt.f32.partialorder %v3942_v35, 0.0  ;;  %v4070_v62 = vmul.f32 0.2, %v3942_v35  ;;  %vm3998_vm12 = vcmp.gt.f32.partialorder %v3934_v36, 0.0  ;;  %v4062_v13 = vmul.f32 0.2, %v3934_v36 }
 0xa50   :  { %v8359_v58 = vpop.xlane.xlu0 %3905  ;;  %v8361_v42 = vpop.xlane.xlu1 %3902 }
 0xa51   :  { %v3958_v43 = vadd.f32 %v8359_v58, %v8337_v14  ;;  %v3950_v45 = vadd.f32 %v8361_v42, %v8337_v14  ;;  %v8371_v4 = vsel %vm4006_vm11, %v3942_v35, %v4070_v62  ;;  %v8373_v29 = vsel %vm3998_vm12, %v3934_v36, %v4062_v13 }
 0xa53   :  { %vm4022_vm0 = vcmp.gt.f32.partialorder %v3958_v43, 0.0  ;;  %v4086_v21 = vmul.f32 0.2, %v3958_v43  ;;  %vm4014_vm4 = vcmp.gt.f32.partialorder %v3950_v45, 0.0  ;;  %v4078_v30 = vmul.f32 0.2, %v3950_v45 }
 0xa54   :  { %v3862_v28 = vpop.xlane.xlu0 %3861  ;;  %v8402_v12 = vpop.xlane.xlu1 %3908 }
 0xa55   :  { %v3912_v47 = vadd.f32 %v8335_v55, %v3862_v28  ;;  %v3920_v18 = vadd.f32 %v8343_v24, %v3862_v28  ;;  %v8387_v39 = vsel %vm4022_vm0, %v3958_v43, %v4086_v21  ;;  %v8389_v57 = vsel %vm4014_vm4, %v3950_v45, %v4078_v30 }
 0xa56   :  { %v3928_v50 = vadd.f32 %v8341_v25, %v3862_v28  ;;  %v3936_v20 = vadd.f32 %v8351_v40, %v3862_v28  ;;  %v3944_v11 = vadd.f32 %v8349_v63, %v3862_v28  ;;  %v3952_v60 = vadd.f32 %v8361_v42, %v3862_v28 }
 0xa57   :  { %v3960_v3 = vadd.f32 %v8359_v58, %v3862_v28  ;;  %vm3976_vm2 = vcmp.gt.f32.partialorder %v3912_v47, 0.0  ;;  %vm3984_vm13 = vcmp.gt.f32.partialorder %v3920_v18, 0.0  ;;  %v4040_v49 = vmul.f32 0.2, %v3912_v47 }
 0xa58   :  { %vm3992_vm15 = vcmp.gt.f32.partialorder %v3928_v50, 0.0  ;;  %vm4000_vm5 = vcmp.gt.f32.partialorder %v3936_v20, 0.0  ;;  %vm4008_vm6 = vcmp.gt.f32.partialorder %v3944_v11, 0.0  ;;  %vm4016_vm10 = vcmp.gt.f32.partialorder %v3952_v60, 0.0  ;;  %v3868_v35 = vpop.xlane.xlu0 %3867 }
 0xa59   :  { %vm4024_vm11 = vcmp.gt.f32.partialorder %v3960_v3, 0.0  ;;  %v4048_v22 = vmul.f32 0.2, %v3920_v18  ;;  %v4056_v2 = vmul.f32 0.2, %v3928_v50  ;;  %v8396_v41 = vsel %vm3976_vm2, %v3912_v47, %v4040_v49 }
 0xa5a   :  { %v4064_v15 = vmul.f32 0.2, %v3936_v20  ;;  %v4072_v59 = vmul.f32 0.2, %v3944_v11  ;;  %v4080_v8 = vmul.f32 0.2, %v3952_v60  ;;  %v3966_v47 = vadd.f32 %v8402_v12, %v8337_v14 }
 0xa5b   :  { %v4088_v54 = vmul.f32 0.2, %v3960_v3  ;;  %v8400_v16 = vsel %vm3984_vm13, %v3920_v18, %v4048_v22  ;;  %v8407_v0 = vsel %vm3992_vm15, %v3928_v50, %v4056_v2  ;;  %v3968_v18 = vadd.f32 %v8402_v12, %v3862_v28 }
 0xa5c   :  { %v8410_v23 = vsel %vm4000_vm5, %v3936_v20, %v4064_v15  ;;  %v8413_v48 = vsel %vm4008_vm6, %v3944_v11, %v4072_v59  ;;  %v8416_v36 = vsel %vm4016_vm10, %v3952_v60, %v4080_v8  ;;  %v3914_v50 = vadd.f32 %v8335_v55, %v3868_v35  ;;  %v3859_v7 = vpop.xlane.xlu0 %3858 }
 0xa5d   :  { %v8419_v62 = vsel %vm4024_vm11, %v3960_v3, %v4088_v54  ;;  %v3922_v20 = vadd.f32 %v8343_v24, %v3868_v35  ;;  %v3930_v11 = vadd.f32 %v8341_v25, %v3868_v35  ;;  %vm4030_vm12 = vcmp.gt.f32.partialorder %v3966_v47, 0.0 }
 0xa5e   :  { %v4094_v60 = vmul.f32 0.2, %v3966_v47  ;;  %v3938_v3 = vadd.f32 %v8351_v40, %v3868_v35  ;;  %v3946_v49 = vadd.f32 %v8349_v63, %v3868_v35  ;;  %vm4032_vm0 = vcmp.gt.f32.partialorder %v3968_v18, 0.0 }
 0xa5f   :  { %v4096_v22 = vmul.f32 0.2, %v3968_v18  ;;  %v3954_v2 = vadd.f32 %v8361_v42, %v3868_v35  ;;  %v3962_v14 = vadd.f32 %v8359_v58, %v3868_v35  ;;  %v3970_v8 = vadd.f32 %v8402_v12, %v3868_v35 }
 0xa60   :  { %v8445_v59 = vsel %vm4030_vm12, %v3966_v47, %v4094_v60  ;;  %vm3978_vm4 = vcmp.gt.f32.partialorder %v3914_v50, 0.0  ;;  %vm3986_vm2 = vcmp.gt.f32.partialorder %v3922_v20, 0.0  ;;  %vm3994_vm13 = vcmp.gt.f32.partialorder %v3930_v11, 0.0 }
 0xa61   :  { %v8448_v54 = vsel %vm4032_vm0, %v3968_v18, %v4096_v22  ;;  %vm4002_vm15 = vcmp.gt.f32.partialorder %v3938_v3, 0.0  ;;  %vm4010_vm5 = vcmp.gt.f32.partialorder %v3946_v49, 0.0  ;;  %vm4018_vm6 = vcmp.gt.f32.partialorder %v3954_v2, 0.0  ;;  %v3865_v22 = vpop.xlane.xlu1 %3864 }
 0xa62   :  { %vm4026_vm10 = vcmp.gt.f32.partialorder %v3962_v14, 0.0  ;;  %vm4034_vm11 = vcmp.gt.f32.partialorder %v3970_v8, 0.0  ;;  %v4042_v28 = vmul.f32 0.2, %v3914_v50  ;;  %v4050_v38 = vmul.f32 0.2, %v3922_v20 }
 0xa63   :  { %v4058_v60 = vmul.f32 0.2, %v3930_v11  ;;  %v4066_v35 = vmul.f32 0.2, %v3938_v3  ;;  %v4074_v18 = vmul.f32 0.2, %v3946_v49 }
 0xa64   :  { %v4082_v15 = vmul.f32 0.2, %v3954_v2  ;;  %v4090_v30 = vmul.f32 0.2, %v3962_v14  ;;  %v4098_v26 = vmul.f32 0.2, %v3970_v8  ;;  %v8455_v31 = vsel %vm3978_vm4, %v3914_v50, %v4042_v28 }
 0xa65   :  { %v8458_v21 = vsel %vm3986_vm2, %v3922_v20, %v4050_v38  ;;  %v8461_v45 = vsel %vm3994_vm13, %v3930_v11, %v4058_v60  ;;  %v8464_v43 = vsel %vm4002_vm15, %v3938_v3, %v4066_v35  ;;  %v8467_v47 = vsel %vm4010_vm5, %v3946_v49, %v4074_v18  ;;  %v3871_v56 = vpop.xlane.xlu1 %3870 }
 0xa66   :  { %9973 = vst [vmem:[#allocation31_spill] sm:$0xff] %v8467_v47  ;;  %v8470_v53 = vsel %vm4018_vm6, %v3954_v2, %v4082_v15  ;;  %v8473_v46 = vsel %vm4026_vm10, %v3962_v14, %v4090_v30  ;;  %v3913_v50 = vadd.f32 %v8335_v55, %v3865_v22  ;;  %v3921_v38 = vadd.f32 %v8343_v24, %v3865_v22 }
 0xa67   :  { %9974 = vst [vmem:[#allocation50_spill] sm:$0xff] %v8470_v53  ;;  %9975 = vst [vmem:[#allocation58_spill] sm:$0xff] %v8473_v46  ;;  %v8478_v20 = vsel %vm4034_vm11, %v3970_v8, %v4098_v26  ;;  %v3929_v26 = vadd.f32 %v8341_v25, %v3865_v22  ;;  %v3937_v28 = vadd.f32 %v8351_v40, %v3865_v22 }
 0xa68   :  { %9976 = vst [vmem:[#allocation56_spill] sm:$0xff] %v8478_v20  ;;  %v3945_v15 = vadd.f32 %v8349_v63, %v3865_v22  ;;  %v3953_v8 = vadd.f32 %v8361_v42, %v3865_v22  ;;  %v3961_v60 = vadd.f32 %v8359_v58, %v3865_v22  ;;  %v3969_v18 = vadd.f32 %v8402_v12, %v3865_v22 }
 0xa69   :  { %vm3977_vm12 = vcmp.gt.f32.partialorder %v3913_v50, 0.0  ;;  %vm3985_vm0 = vcmp.gt.f32.partialorder %v3921_v38, 0.0  ;;  %vm3993_vm4 = vcmp.gt.f32.partialorder %v3929_v26, 0.0  ;;  %vm4001_vm2 = vcmp.gt.f32.partialorder %v3937_v28, 0.0 }
 0xa6a   :  { %vm4009_vm13 = vcmp.gt.f32.partialorder %v3945_v15, 0.0  ;;  %vm4017_vm15 = vcmp.gt.f32.partialorder %v3953_v8, 0.0  ;;  %vm4025_vm5 = vcmp.gt.f32.partialorder %v3961_v60, 0.0  ;;  %vm4033_vm6 = vcmp.gt.f32.partialorder %v3969_v18, 0.0 }
 0xa6b   :  { %v4041_v14 = vmul.f32 0.2, %v3913_v50  ;;  %v4049_v2 = vmul.f32 0.2, %v3921_v38  ;;  %v4057_v49 = vmul.f32 0.2, %v3929_v26 }
 0xa6c   :  { %v4065_v3 = vmul.f32 0.2, %v3937_v28  ;;  %v4073_v11 = vmul.f32 0.2, %v3945_v15  ;;  %v4081_v35 = vmul.f32 0.2, %v3953_v8 }
 0xa6d   :  { %v4089_v13 = vmul.f32 0.2, %v3961_v60  ;;  %v4097_v22 = vmul.f32 0.2, %v3969_v18  ;;  %v8503_v5 = vsel %vm3977_vm12, %v3913_v50, %v4041_v14  ;;  %v8506_v17 = vsel %vm3985_vm0, %v3921_v38, %v4049_v2 }
 0xa6e   :  { %v8509_v51 = vsel %vm3993_vm4, %v3929_v26, %v4057_v49  ;;  %v8512_v61 = vsel %vm4001_vm2, %v3937_v28, %v4065_v3  ;;  %v8515_v30 = vsel %vm4009_vm13, %v3945_v15, %v4073_v11  ;;  %v8518_v37 = vsel %vm4017_vm15, %v3953_v8, %v4081_v35 }
 0xa6f   :  { %v8521_v19 = vsel %vm4025_vm5, %v3961_v60, %v4089_v13  ;;  %v3915_v50 = vadd.f32 %v8335_v55, %v3871_v56  ;;  %v3923_v38 = vadd.f32 %v8343_v24, %v3871_v56  ;;  %v8526_v2 = vsel %vm4033_vm6, %v3969_v18, %v4097_v22 }
 0xa70   :  { %v3931_v28 = vadd.f32 %v8341_v25, %v3871_v56  ;;  %v3939_v15 = vadd.f32 %v8351_v40, %v3871_v56  ;;  %v3947_v8 = vadd.f32 %v8349_v63, %v3871_v56  ;;  %v3955_v60 = vadd.f32 %v8361_v42, %v3871_v56 }
 0xa71   :  { %v3963_v35 = vadd.f32 %v8359_v58, %v3871_v56  ;;  %v3971_v22 = vadd.f32 %v8402_v12, %v3871_v56  ;;  %vm3979_vm10 = vcmp.gt.f32.partialorder %v3915_v50, 0.0  ;;  %vm3987_vm11 = vcmp.gt.f32.partialorder %v3923_v38, 0.0 }
 0xa72   :  { %vm3995_vm12 = vcmp.gt.f32.partialorder %v3931_v28, 0.0  ;;  %vm4003_vm0 = vcmp.gt.f32.partialorder %v3939_v15, 0.0  ;;  %vm4011_vm4 = vcmp.gt.f32.partialorder %v3947_v8, 0.0  ;;  %vm4019_vm2 = vcmp.gt.f32.partialorder %v3955_v60, 0.0 }
 0xa73   :  { %vm4027_vm13 = vcmp.gt.f32.partialorder %v3963_v35, 0.0  ;;  %vm4035_vm15 = vcmp.gt.f32.partialorder %v3971_v22, 0.0  ;;  %v4043_v26 = vmul.f32 0.2, %v3915_v50  ;;  %v4051_v14 = vmul.f32 0.2, %v3923_v38 }
 0xa74   :  { %v4059_v49 = vmul.f32 0.2, %v3931_v28  ;;  %v4067_v11 = vmul.f32 0.2, %v3939_v15  ;;  %v4075_v3 = vmul.f32 0.2, %v3947_v8 }
 0xa75   :  { %v4083_v18 = vmul.f32 0.2, %v3955_v60  ;;  %v4091_v6 = vmul.f32 0.2, %v3963_v35  ;;  %v4099_v56 = vmul.f32 0.2, %v3971_v22  ;;  %v8551_v10 = vsel %vm3979_vm10, %v3915_v50, %v4043_v26 }
 0xa76   :  { %v8554_v34 = vsel %vm3987_vm11, %v3923_v38, %v4051_v14  ;;  %v8557_v1 = vsel %vm3995_vm12, %v3931_v28, %v4059_v49  ;;  %v8560_v33 = vsel %vm4003_vm0, %v3939_v15, %v4067_v11  ;;  %v8563_v13 = vsel %vm4011_vm4, %v3947_v8, %v4075_v3 }
 0xa77   :  { %9977 = vst [vmem:[#allocation55_spill] sm:$0xff] %v8554_v34  ;;  %9978 = vst [vmem:[#allocation57_spill] sm:$0xff] %v8557_v1  ;;  %v8566_v44 = vsel %vm4019_vm2, %v3955_v60, %v4083_v18  ;;  %v8569_v20 = vsel %vm4027_vm13, %v3963_v35, %v4091_v6  ;;  %v3911_v50 = vadd.f32 %v8335_v55, %v3859_v7  ;;  %vm9985_vm13 = vcmask 1041409  }
 0xa78   :  { %9979 = vst [vmem:[#allocation59_spill] sm:$0xff] %v8560_v33  ;;  %9980 = vst [vmem:[#allocation53_spill] sm:$0xff] %v8563_v13  ;;  %v3919_v38 = vadd.f32 %v8343_v24, %v3859_v7  ;;  %v8574_v14 = vsel %vm4035_vm15, %v3971_v22, %v4099_v56  ;;  %v3927_v15 = vadd.f32 %v8341_v25, %v3859_v7  ;;  %vm9987_vm15 = vcmask 1042434  }
 0xa79   :  { %9981 = vst [vmem:[#allocation60_spill] sm:$0xff] %v8566_v44  ;;  %9982 = vst [vmem:[#allocation54_spill] sm:$0xff] %v8569_v20  ;;  %v3935_v8 = vadd.f32 %v8351_v40, %v3859_v7  ;;  %v3943_v60 = vadd.f32 %v8349_v63, %v3859_v7  ;;  %v3951_v35 = vadd.f32 %v8361_v42, %v3859_v7  ;;  %vm3975_vm5 = vcmp.gt.f32.partialorder %v3911_v50, 0.0 }
 0xa7a   :  { %9983 = vst [vmem:[#allocation42_spill] sm:$0xff] %v8574_v14  ;;  %v3959_v18 = vadd.f32 %v8359_v58, %v3859_v7  ;;  %v3967_v56 = vadd.f32 %v8402_v12, %v3859_v7  ;;  %vm3983_vm6 = vcmp.gt.f32.partialorder %v3919_v38, 0.0  ;;  %vm3991_vm10 = vcmp.gt.f32.partialorder %v3927_v15, 0.0 }
 0xa7b   :  { %vm3999_vm11 = vcmp.gt.f32.partialorder %v3935_v8, 0.0  ;;  %vm4007_vm12 = vcmp.gt.f32.partialorder %v3943_v60, 0.0  ;;  %vm4015_vm0 = vcmp.gt.f32.partialorder %v3951_v35, 0.0  ;;  %v4039_v28 = vmul.f32 0.2, %v3911_v50 }
 0xa7c   :  { %vm4023_vm4 = vcmp.gt.f32.partialorder %v3959_v18, 0.0  ;;  %vm4031_vm2 = vcmp.gt.f32.partialorder %v3967_v56, 0.0  ;;  %v4047_v26 = vmul.f32 0.2, %v3919_v38  ;;  %v4055_v49 = vmul.f32 0.2, %v3927_v15 }
 0xa7d   :  { %v4063_v3 = vmul.f32 0.2, %v3935_v8  ;;  %v4071_v11 = vmul.f32 0.2, %v3943_v60  ;;  %v4079_v44 = vmul.f32 0.2, %v3951_v35  ;;  %v4103_v7 = vsel %vm3975_vm5, %v3911_v50, %v4039_v28  ;;  %vm9989_vm5 = vmmov %vm9985_vm13 }
 0xa7e   :  { %v4087_v22 = vmul.f32 0.2, %v3959_v18  ;;  %v4095_v20 = vmul.f32 0.2, %v3967_v56  ;;  %v4111_v46 = vsel %vm3983_vm6, %v3919_v38, %v4047_v26  ;;  %v4119_v13 = vsel %vm3991_vm10, %v3927_v15, %v4055_v49  ;;  %v3877_v26 = vpop.xlane.xlu1 %3876  ;;  %vm9991_vm6 = vmmov %vm9989_vm5 }
 0xa7f   :  { %v4127_v33 = vsel %vm3999_vm11, %v3935_v8, %v4063_v3  ;;  %v4135_v53 = vsel %vm4007_vm12, %v3943_v60, %v4071_v11  ;;  %v4143_v1 = vsel %vm4015_vm0, %v3951_v35, %v4079_v44  ;;  %v4237_v34 = vrot.slane %v4103_v7, %v6038_v9  ;;  %vm9993_vm10 = vmmov %vm9989_vm5 }
 0xa80   :  { %v4151_v6 = vsel %vm4023_vm4, %v3959_v18, %v4087_v22  ;;  %v4159_v14 = vsel %vm4031_vm2, %v3967_v56, %v4095_v20  ;;  %v4269_v47 = vrot.slane %v4111_v46, %v6038_v9  ;;  %v4301_v50 = vrot.slane %v4119_v13, %v6038_v9  ;;  %vm9995_vm11 = vmmov %vm9987_vm15 }
 0xa81   :  { %v4333_v38 = vrot.slane %v4127_v33, %v6038_v9  ;;  %v4365_v49 = vrot.slane %v4135_v53, %v6038_v9  ;;  %v4397_v3 = vrot.slane %v4143_v1, %v6038_v9  ;;  %v4429_v11 = vrot.slane %v4151_v6, %v6038_v9  ;;  %vm9997_vm12 = vmmov %vm9995_vm11 }
 0xa82   :  { %v4461_v44 = vrot.slane %v4159_v14, %v6038_v9  ;;  %v9984_v20 = vrot.slane %v8357_v32, %v6038_v9  ;;  %v9986_v46 = vrot.slane %v8396_v41, %v6038_v9  ;;  %v9988_v33 = vrot.slane %v8365_v27, %v6038_v9  ;;  %vm9999_vm0 = vmmov %vm9995_vm11 }
 0xa83   :  { %v9990_v1 = vrot.slane %v8363_v52, %v6038_v9  ;;  %v9992_v32 = vrot.slane %v8373_v29, %v6038_v9  ;;  %v9994_v41 = vrot.slane %v8400_v16, %v6038_v9  ;;  %v9996_v27 = vrot.slane %v8407_v0, %v6038_v9 }
 0xa84   :  { %v4486_v28 = vsel %vm9985_vm13, %v4237_v34, %v9984_v20  ;;  %v4493_v53 = vsel %vm9989_vm5, %v4269_v47, %v9988_v33  ;;  %v9998_v52 = vrot.slane %v8410_v23, %v6038_v9  ;;  %v3917_v8 = vadd.f32 %v8335_v55, %v3877_v26  ;;  %vm10005_vm13 = vmmov %vm9989_vm5 }
 0xa85   :  { %v4487_v13 = vsel %vm9987_vm15, %v9986_v46, %v4486_v28  ;;  %v4500_v14 = vsel %vm9991_vm6, %v4301_v50, %v9990_v1  ;;  %v4507_v34 = vsel %vm9993_vm10, %v4333_v38, %v9992_v32  ;;  %v4494_v6 = vsel %vm9995_vm11, %v9994_v41, %v4493_v53  ;;  %vm10007_vm15 = vmmov %vm9999_vm0 }
 0xa86   :  { %v4501_v47 = vsel %vm9997_vm12, %v9996_v27, %v4500_v14  ;;  %v4508_v15 = vsel %vm9999_vm0, %v9998_v52, %v4507_v34  ;;  %v10000_v29 = vrot.slane %v8503_v5, %v6038_v9  ;;  %vm10001_vm4 = vcmask 1043459   ;;  %vm10010_vm6 = vmmov %vm9989_vm5 }
 0xa87   :  { %v10002_v16 = vrot.slane %v8506_v17, %v6038_v9  ;;  %vm10003_vm2 = vmmov %vm10001_vm4  ;;  %v10004_v0 = vrot.slane %v8371_v4, %v6038_v9  ;;  %v3925_v23 = vadd.f32 %v8343_v24, %v3877_v26  ;;  %v10006_v22 = vrot.slane %v8413_v48, %v6038_v9 }
 0xa88   :  { %v4488_v60 = vsel %vm10001_vm4, %v10000_v29, %v4487_v13  ;;  %v10008_v5 = vrot.slane %v8389_v57, %v6038_v9  ;;  %v10009_v17 = vrot.slane %v8387_v39, %v6038_v9  ;;  %v10011_v4 = vrot.slane %v8445_v59, %v6038_v9  ;;  %vm10012_vm10 = vmmov %vm9989_vm5 }
 0xa89   :  { %v4495_v35 = vsel %vm10003_vm2, %v10002_v16, %v4494_v6  ;;  %v4514_v18 = vsel %vm10005_vm13, %v4365_v49, %v10004_v0  ;;  %v10013_v48 = vrot.slane %v8509_v51, %v6038_v9  ;;  %vm10014_vm11 = vmmov %vm10003_vm2  ;;  %v10015_v57 = vrot.slane %v8512_v61, %v6038_v9 }
 0xa8a   :  { %v4515_v56 = vsel %vm10007_vm15, %v10006_v22, %v4514_v18  ;;  %v4521_v7 = vsel %vm9989_vm5, %v4397_v3, %v10008_v5  ;;  %v4528_v50 = vsel %vm10010_vm6, %v4429_v11, %v10009_v17  ;;  %v4535_v38 = vsel %vm10012_vm10, %v4461_v44, %v10011_v4  ;;  %vm10016_vm12 = vmmov %vm10003_vm2 }
 0xa8b   :  { %v4502_v49 = vsel %vm10014_vm11, %v10013_v48, %v4501_v47  ;;  %v4509_v3 = vsel %vm10016_vm12, %v10015_v57, %v4508_v15  ;;  %v10017_v39 = vrot.slane %v8416_v36, %v6038_v9  ;;  %v10018_v59 = vrot.slane %v8419_v62, %v6038_v9  ;;  %vm10019_vm4 = vmmov %vm9999_vm0  ;;  %v3874_v57 = vpop.xlane.xlu0 %3873 }
 0xa8c   :  { %v10020_v51 = vrot.slane %v8515_v30, %v6038_v9  ;;  %v10021_v61 = vrot.slane %v8518_v37, %v6038_v9  ;;  %vm10022_vm13 = vmmov %vm10003_vm2  ;;  %v10023_v36 = vrot.slane %v8448_v54, %v6038_v9  ;;  %v3933_v13 = vadd.f32 %v8341_v25, %v3877_v26 }
 0xa8d   :  { %v4522_v11 = vsel %vm9999_vm0, %v10017_v39, %v4521_v7  ;;  %v4529_v44 = vsel %vm10019_vm4, %v10018_v59, %v4528_v50  ;;  %vm10024_vm15 = vmmov %vm9999_vm0  ;;  %v3941_v62 = vadd.f32 %v8351_v40, %v3877_v26  ;;  %v3949_v33 = vadd.f32 %v8349_v63, %v3877_v26 }
 0xa8e   :  { %v4516_v20 = vsel %vm10003_vm2, %v10020_v51, %v4515_v56  ;;  %v4523_v28 = vsel %vm10022_vm13, %v10021_v61, %v4522_v11  ;;  %v4536_v46 = vsel %vm10024_vm15, %v10023_v36, %v4535_v38  ;;  %v3957_v30 = vadd.f32 %v8361_v42, %v3877_v26  ;;  %vm10026_vm5 = vmmov %vm10003_vm2  ;;  %v10037_v61 = vld [vmem:[#allocation31_spill] sm:$0xff] }
 0xa8f   :  { %v3965_v53 = vadd.f32 %v8359_v58, %v3877_v26  ;;  %v10025_v37 = vrot.slane %v8521_v19, %v6038_v9  ;;  %v3973_v14 = vadd.f32 %v8402_v12, %v3877_v26  ;;  %vm3981_vm6 = vcmp.gt.f32.partialorder %v3917_v8, 0.0 }
 0xa90   :  { %vm3989_vm10 = vcmp.gt.f32.partialorder %v3925_v23, 0.0  ;;  %vm3997_vm11 = vcmp.gt.f32.partialorder %v3933_v13, 0.0  ;;  %vm4005_vm12 = vcmp.gt.f32.partialorder %v3941_v62, 0.0  ;;  %vm4013_vm0 = vcmp.gt.f32.partialorder %v3949_v33, 0.0 }
 0xa91   :  { %v4530_v1 = vsel %vm10026_vm5, %v10025_v37, %v4529_v44  ;;  %vm4021_vm4 = vcmp.gt.f32.partialorder %v3957_v30, 0.0  ;;  %vm4029_vm2 = vcmp.gt.f32.partialorder %v3965_v53, 0.0  ;;  %vm4037_vm13 = vcmp.gt.f32.partialorder %v3973_v14, 0.0 }
 0xa92   :  { %v4045_v54 = vmul.f32 0.2, %v3917_v8  ;;  %v4053_v32 = vmul.f32 0.2, %v3925_v23  ;;  %v4061_v34 = vmul.f32 0.2, %v3933_v13  ;;  %v10027_v19 = vrot.slane %v8455_v31, %v6038_v9 }
 0xa93   :  { %v4069_v41 = vmul.f32 0.2, %v3941_v62  ;;  %v4077_v6 = vmul.f32 0.2, %v3949_v33  ;;  %vm10028_vm15 = vcmask 1044484   ;;  %v10029_v31 = vrot.slane %v8526_v2, %v6038_v9 }
 0xa94   :  { %v4489_v27 = vsel %vm10028_vm15, %v10027_v19, %v4488_v60  ;;  %v4085_v47 = vmul.f32 0.2, %v3957_v30  ;;  %v4093_v26 = vmul.f32 0.2, %v3965_v53  ;;  %v4101_v52 = vmul.f32 0.2, %v3973_v14 }
 0xa95   :  { %v8719_v15 = vsel %vm3981_vm6, %v3917_v8, %v4045_v54  ;;  %v8722_v29 = vsel %vm3989_vm10, %v3925_v23, %v4053_v32  ;;  %v8725_v16 = vsel %vm3997_vm11, %v3933_v13, %v4061_v34  ;;  %v8728_v0 = vsel %vm4005_vm12, %v3941_v62, %v4069_v41  ;;  %vm10032_vm6 = vmmov %vm10028_vm15  ;;  %v10042_v62 = vld [vmem:[#allocation57_spill] sm:$0xff]  ;;  %v10051_v34 = vld [vmem:[#allocation58_spill] sm:$0xff] }
 0xa96   :  { %v8731_v18 = vsel %vm4013_vm0, %v3949_v33, %v4077_v6  ;;  %v4537_v60 = vsel %vm10026_vm5, %v10029_v31, %v4536_v46  ;;  %v8738_v8 = vsel %vm4021_vm4, %v3957_v30, %v4085_v47  ;;  %v8741_v23 = vsel %vm4029_vm2, %v3965_v53, %v4093_v26  ;;  %vm10034_vm10 = vmmov %vm10032_vm6  ;;  %v10040_v46 = vld [vmem:[#allocation55_spill] sm:$0xff]  ;;  %v10044_v33 = vld [vmem:[#allocation50_spill] sm:$0xff] }
 0xa97   :  { %v10030_v22 = vrot.slane %v8551_v10, %v6038_v9  ;;  %v8750_v5 = vsel %vm4037_vm13, %v3973_v14, %v4101_v52  ;;  %v4261_v2 = vrot.slane %v8719_v15, %v6038_v9  ;;  %v4293_v7 = vrot.slane %v8722_v29, %v6038_v9  ;;  %vm10036_vm11 = vmmov %vm10032_vm6  ;;  %v10047_v53 = vld [vmem:[#allocation59_spill] sm:$0xff]  ;;  %v10049_v14 = vld [vmem:[#allocation53_spill] sm:$0xff] }
 0xa98   :  { %v4325_v17 = vrot.slane %v8725_v16, %v6038_v9  ;;  %v4357_v50 = vrot.slane %v8728_v0, %v6038_v9  ;;  %v4389_v10 = vrot.slane %v8731_v18, %v6038_v9  ;;  %v4421_v4 = vrot.slane %v8738_v8, %v6038_v9  ;;  %vm10039_vm12 = vmmov %vm10032_vm6  ;;  %v10056_v26 = vld [vmem:[#allocation56_spill] sm:$0xff]  ;;  %v10065_v8 = vld [vmem:[#allocation35_spill] sm:$0xff] }
 0xa99   :  { %v8747_v56 = vsel %vm967_vm3, %v10030_v22, %v4489_v27  ;;  %v10031_v38 = vrot.slane %v8458_v21, %v6038_v9  ;;  %v4453_v39 = vrot.slane %v8741_v23, %v6038_v9  ;;  %v10033_v11 = vrot.slane %v8461_v45, %v6038_v9  ;;  %vm10046_vm0 = vmmov %vm10032_vm6  ;;  %v10054_v27 = vld [vmem:[#allocation60_spill] sm:$0xff] }
 0xa9a   :  { %v10035_v44 = vrot.slane %v8464_v43, %v6038_v9  ;;  %v10038_v36 = vrot.slane %v10037_v61, %v6038_v9  ;;  %v10041_v13 = vrot.slane %v10040_v46, %v6038_v9  ;;  %v10050_v54 = vrot.slane %v10049_v14, %v6038_v9  ;;  %vm10053_vm4 = vmmov %vm10046_vm0 }
 0xa9b   :  { %v4496_v48 = vsel %vm10032_vm6, %v10031_v38, %v4495_v35  ;;  %v4503_v59 = vsel %vm10034_vm10, %v10033_v11, %v4502_v49  ;;  %v4485_v35 = vrot.slane %v8750_v5, %v6038_v9  ;;  %v10043_v49 = vrot.slane %v10042_v62, %v6038_v9  ;;  %vm10058_vm2 = vmmov %vm10046_vm0  ;;  %v10070_v5 = vld [vmem:[#allocation38_spill] sm:$0xff] }
 0xa9c   :  { %v4510_v51 = vsel %vm10036_vm11, %v10035_v44, %v4509_v3  ;;  %v4517_v21 = vsel %vm10039_vm12, %v10038_v36, %v4516_v20  ;;  %v4497_v45 = vsel %vm967_vm3, %v10041_v13, %v4496_v48  ;;  %v10045_v3 = vrot.slane %v10044_v33, %v6038_v9 }
 0xa9d   :  { %v4504_v43 = vsel %vm967_vm3, %v10043_v49, %v4503_v59  ;;  %v10048_v20 = vrot.slane %v10047_v53, %v6038_v9  ;;  %v4518_v32 = vsel %vm967_vm3, %v10050_v54, %v4517_v21  ;;  %v10052_v41 = vrot.slane %v10051_v34, %v6038_v9  ;;  %v10059_v59 = vld [vmem:[#allocation54_spill] sm:$0xff] }
 0xa9e   :  { %v4524_v30 = vsel %vm10046_vm0, %v10045_v3, %v4523_v28  ;;  %v3916_v19 = vadd.f32 %v8335_v55, %v3874_v57  ;;  %v10055_v28 = vrot.slane %v10054_v27, %v6038_v9  ;;  %v10057_v52 = vrot.slane %v10056_v26, %v6038_v9 }
 0xa9f   :  { %v4511_v37 = vsel %vm967_vm3, %v10048_v20, %v4510_v51  ;;  %v4531_v6 = vsel %vm10053_vm4, %v10052_v41, %v4530_v1  ;;  %v3924_v22 = vadd.f32 %v8343_v24, %v3874_v57  ;;  %v3932_v38 = vadd.f32 %v8341_v25, %v3874_v57 }
 0xaa0   :  { %v4525_v47 = vsel %vm967_vm3, %v10055_v28, %v4524_v30  ;;  %v4538_v31 = vsel %vm10058_vm2, %v10057_v52, %v4537_v60  ;;  %v3940_v48 = vadd.f32 %v8351_v40, %v3874_v57  ;;  %v3948_v1 = vadd.f32 %v8349_v63, %v3874_v57  ;;  %v10061_v63 = vld [vmem:[#allocation42_spill] sm:$0xff] }
 0xaa1   :  { %v3956_v55 = vadd.f32 %v8361_v42, %v3874_v57  ;;  %v3964_v11 = vadd.f32 %v8359_v58, %v3874_v57  ;;  %v10060_v44 = vrot.slane %v10059_v59, %v6038_v9  ;;  %v3972_v61 = vadd.f32 %v8402_v12, %v3874_v57 }
 0xaa2   :  { %vm3980_vm13 = vcmp.gt.f32.partialorder %v3916_v19, 0.0  ;;  %vm3988_vm15 = vcmp.gt.f32.partialorder %v3924_v22, 0.0  ;;  %vm3996_vm5 = vcmp.gt.f32.partialorder %v3932_v38, 0.0  ;;  %vm4004_vm6 = vcmp.gt.f32.partialorder %v3940_v48, 0.0 }
 0xaa3   :  { %v4532_v51 = vsel %vm967_vm3, %v10060_v44, %v4531_v6  ;;  %vm4012_vm10 = vcmp.gt.f32.partialorder %v3948_v1, 0.0  ;;  %vm4020_vm11 = vcmp.gt.f32.partialorder %v3956_v55, 0.0  ;;  %vm4028_vm12 = vcmp.gt.f32.partialorder %v3964_v11, 0.0 }
 0xaa4   :  { %vm4036_vm0 = vcmp.gt.f32.partialorder %v3972_v61, 0.0  ;;  %v4044_v25 = vmul.f32 0.2, %v3916_v19  ;;  %v4052_v24 = vmul.f32 0.2, %v3924_v22  ;;  %v10062_v40 = vrot.slane %v10061_v63, %v6038_v9 }
 0xaa5   :  { %v4060_v42 = vmul.f32 0.2, %v3932_v38  ;;  %v4068_v60 = vmul.f32 0.2, %v3940_v48  ;;  %v4076_v36 = vmul.f32 0.2, %v3948_v1 }
 0xaa6   :  { %v4539_v58 = vsel %vm967_vm3, %v10062_v40, %v4538_v31  ;;  %v4084_v21 = vmul.f32 0.2, %v3956_v55  ;;  %v4092_v12 = vmul.f32 0.2, %v3964_v11  ;;  %v4100_v57 = vmul.f32 0.2, %v3972_v61 }
 0xaa7   :  { %v4108_v46 = vsel %vm3980_vm13, %v3916_v19, %v4044_v25  ;;  %v4116_v13 = vsel %vm3988_vm15, %v3924_v22, %v4052_v24  ;;  %v4124_v62 = vsel %vm3996_vm5, %v3932_v38, %v4060_v42  ;;  %v4132_v49 = vsel %vm4004_vm6, %v3940_v48, %v4068_v60 }
 0xaa8   :  { %v4140_v33 = vsel %vm4012_vm10, %v3948_v1, %v4076_v36  ;;  %v4148_v3 = vsel %vm4020_vm11, %v3956_v55, %v4084_v21  ;;  %v4156_v30 = vsel %vm4028_vm12, %v3964_v11, %v4092_v12  ;;  %v4164_v53 = vsel %vm4036_vm0, %v3972_v61, %v4100_v57  ;;  %v10074_v1 = vld [vmem:[#allocation44_spill] sm:$0xff] }
 0xaa9   :  { %v4257_v20 = vrot.slane %v4108_v46, %v6038_v9  ;;  %v4289_v14 = vrot.slane %v4116_v13, %v6038_v9  ;;  %v4321_v54 = vrot.slane %v4124_v62, %v6038_v9  ;;  %v4353_v34 = vrot.slane %v4132_v49, %v6038_v9 }
 0xaaa   :  { %v4385_v41 = vrot.slane %v4140_v33, %v6038_v9  ;;  %v4417_v6 = vrot.slane %v4148_v3, %v6038_v9  ;;  %v4449_v19 = vrot.slane %v4156_v30, %v6038_v9  ;;  %v4481_v27 = vrot.slane %v4164_v53, %v6038_v9 }
 0xaab   :  { %v4491_v28 = vsel %vm969_vm8, %v4257_v20, %v8747_v56  ;;  %v4498_v52 = vsel %vm969_vm8, %v4289_v14, %v4497_v45  ;;  %v4505_v31 = vsel %vm969_vm8, %v4321_v54, %v4504_v43  ;;  %v4512_v22 = vsel %vm969_vm8, %v4353_v34, %v4511_v37 }
 0xaac   :  { %v4492_v26 = vsel %vm971_vm1, %v4261_v2, %v4491_v28  ;;  %v4499_v38 = vsel %vm971_vm1, %v4293_v7, %v4498_v52  ;;  %v4506_v56 = vsel %vm971_vm1, %v4325_v17, %v4505_v31  ;;  %v4513_v15 = vsel %vm971_vm1, %v4357_v50, %v4512_v22 }
 0xaad   :  { %v4519_v2 = vsel %vm969_vm8, %v4385_v41, %v4518_v32  ;;  %v4526_v29 = vsel %vm969_vm8, %v4417_v6, %v4525_v47  ;;  %v4533_v7 = vsel %vm969_vm8, %v4449_v19, %v4532_v51  ;;  %v4540_v16 = vsel %vm969_vm8, %v4481_v27, %v4539_v58  ;;  %v10068_v32 = vld [vmem:[#allocation37_spill] sm:$0xff]  ;;  %v10072_v47 = vld [vmem:[#allocation39_spill] sm:$0xff] }
 0xaae   :  { %v4520_v45 = vsel %vm971_vm1, %v4389_v10, %v4519_v2  ;;  %v4527_v0 = vsel %vm971_vm1, %v4421_v4, %v4526_v29  ;;  %v4534_v17 = vsel %vm971_vm1, %v4453_v39, %v4533_v7  ;;  %v4541_v18 = vsel %vm971_vm1, %v4485_v35, %v4540_v16 }
 0xaaf   :  { %v8891_v10 = vsel %vm613_vm9, %v4492_v26, -1e+30  ;;  %v8895_v37 = vsel %vm614_vm7, %v4499_v38, -1e+30  ;;  %vm10066_vm3 = vcmp.gt.f32.partialorder %v10065_v8, 0.0  ;;  %vm10069_vm8 = vcmp.gt.f32.partialorder %v10068_v32, 0.0 }
 0xab0   :  { %v8899_v4 = vsel %vm10066_vm3, %v4506_v56, -1e+30  ;;  %v8903_v39 = vsel %vm616_vm14, %v4513_v15, -1e+30  ;;  %v8907_v9 = vsel %vm10069_vm8, %v4520_v45, -1e+30 }
 0xab1   :  { %vm10071_vm1 = vcmp.gt.f32.partialorder %v10070_v5, 0.0  ;;  %vm10073_vm4 = vcmp.gt.f32.partialorder %v10072_v47, 0.0  ;;  %vm10075_vm2 = vcmp.gt.f32.partialorder %v10074_v1, 0.0  ;;  %vm10076_vm13 = vcmask 31744  }
 0xab2   :  { %v8911_v35 = vsel %vm10071_vm1, %v4527_v0, -1e+30  ;;  %v8915_v48 = vsel %vm10073_vm4, %v4534_v17, -1e+30  ;;  %v8919_v55 = vsel %vm10075_vm2, %v4541_v18, -1e+30  ;;  %vm10077_vm15 = vmmov %vm10076_vm13 }
 0xab3   :  { %v4558_v11 = vsel %vm10076_vm13, %v8891_v10, -inf  ;;  %v4565_v59 = vsel %vm10077_vm15, %v8895_v37, -inf  ;;  %vm10078_vm5 = vmmov %vm10076_vm13  ;;  %vm10086_vm1 = vcmp.gt.f32.partialorder %v10065_v8, 0.0  ;;  %vm10089_vm4 = vcmp.gt.f32.partialorder %v10068_v32, 0.0 }
 0xab4   :  { %v4572_v44 = vsel %vm10078_vm5, %v8899_v4, -inf  ;;  %v4559_v51 = vrot.slane %v4558_v11, 4  ;;  %v4566_v61 = vrot.slane %v4565_v59, 4  ;;  %vm10079_vm6 = vmmov %vm10078_vm5  ;;  %vm10091_vm13 = vcmp.gt.f32.partialorder %v10070_v5, 0.0 }
 0xab5   :  { %v4573_v25 = vrot.slane %v4572_v44, 4  ;;  %v4579_v24 = vsel %vm10079_vm6, %v8903_v39, -inf  ;;  %vm10080_vm10 = vmmov %vm10078_vm5  ;;  %vm10093_vm15 = vcmp.gt.f32.partialorder %v10072_v47, 0.0  ;;  %vm10095_vm6 = vcmp.gt.f32.partialorder %v10074_v1, 0.0 }
 0xab6   :  { %v4580_v63 = vrot.slane %v4579_v24, 4  ;;  %v4586_v40 = vsel %vm10080_vm10, %v8907_v9, -inf  ;;  %vm10081_vm11 = vmmov %vm10078_vm5  ;;  %v4560_v60 = vmax.f32 %v4558_v11, %v4559_v51  ;;  %v4567_v36 = vmax.f32 %v4565_v59, %v4566_v61 }
 0xab7   :  { %v4593_v58 = vsel %vm10081_vm11, %v8911_v35, -inf  ;;  %vm10082_vm12 = vmmov %vm10078_vm5  ;;  %v4574_v21 = vmax.f32 %v4572_v44, %v4573_v25  ;;  %v4587_v12 = vrot.slane %v4586_v40, 4  ;;  %vm10107_vm11 = vcmask 60416  }
 0xab8   :  { %v4600_v42 = vsel %vm10082_vm12, %v8915_v48, -inf  ;;  %v4581_v57 = vmax.f32 %v4579_v24, %v4580_v63  ;;  %v4594_v46 = vrot.slane %v4593_v58, 4  ;;  %vm10083_vm0 = vmmov %vm10078_vm5  ;;  %v4561_v49 = vrot.slane %v4560_v60, 2 }
 0xab9   :  { %v4601_v13 = vrot.slane %v4600_v42, 4  ;;  %v4607_v62 = vsel %vm10083_vm0, %v8919_v55, -inf  ;;  %v4568_v33 = vrot.slane %v4567_v36, 2  ;;  %v4575_v3 = vrot.slane %v4574_v21, 2  ;;  %vm10084_vm3 = vmmov %vm10083_vm0 }
 0xaba   :  { %v4588_v30 = vmax.f32 %v4586_v40, %v4587_v12  ;;  %v4582_v53 = vrot.slane %v4581_v57, 2  ;;  %v4595_v20 = vmax.f32 %v4593_v58, %v4594_v46  ;;  %v4608_v54 = vrot.slane %v4607_v62, 4  ;;  %vm10085_vm8 = vmmov %vm10083_vm0 }
 0xabb   :  { %v4602_v14 = vmax.f32 %v4600_v42, %v4601_v13  ;;  %v4562_v34 = vmax.f32 %v4560_v60, %v4561_v49  ;;  %v4569_v41 = vmax.f32 %v4567_v36, %v4568_v33  ;;  %v4576_v6 = vmax.f32 %v4574_v21, %v4575_v3  ;;  %vm10090_vm2 = vmmov %vm10083_vm0 }
 0xabc   :  { %v4589_v19 = vrot.slane %v4588_v30, 2  ;;  %v4583_v27 = vmax.f32 %v4581_v57, %v4582_v53  ;;  %v4596_v28 = vrot.slane %v4595_v20, 2  ;;  %v4609_v52 = vmax.f32 %v4607_v62, %v4608_v54  ;;  %vm10094_vm5 = vmmov %vm10083_vm0 }
 0xabd   :  { %v4603_v26 = vrot.slane %v4602_v14, 2  ;;  %v4563_v31 = vrot.slane %v4562_v34, 1  ;;  %v4570_v22 = vrot.slane %v4569_v41, 1  ;;  %v4577_v38 = vrot.slane %v4576_v6, 1  ;;  %vm10096_vm10 = vmmov %vm10083_vm0 }
 0xabe   :  { %v4590_v56 = vmax.f32 %v4588_v30, %v4589_v19  ;;  %v4584_v15 = vrot.slane %v4583_v27, 1  ;;  %v4597_v2 = vmax.f32 %v4595_v20, %v4596_v28  ;;  %v4610_v29 = vrot.slane %v4609_v52, 2  ;;  %vm10108_vm12 = vmmov %vm10107_vm11 }
 0xabf   :  { %v4604_v45 = vmax.f32 %v4602_v14, %v4603_v26  ;;  %v4564_v7 = vmax.f32 %v4562_v34, %v4563_v31  ;;  %v4571_v16 = vmax.f32 %v4569_v41, %v4570_v22  ;;  %v4578_v0 = vmax.f32 %v4576_v6, %v4577_v38 }
 0xac0   :  { %v4591_v17 = vrot.slane %v4590_v56, 1  ;;  %v4585_v18 = vmax.f32 %v4583_v27, %v4584_v15  ;;  %v4598_v11 = vrot.slane %v4597_v2, 1  ;;  %v4611_v44 = vmax.f32 %v4609_v52, %v4610_v29 }
 0xac1   :  { %v4605_v59 = vrot.slane %v4604_v45, 1  ;;  %v4614_v61 = vsub.f32 %v8891_v10, %v4564_v7  ;;  %v4615_v25 = vsub.f32 %v8895_v37, %v4571_v16  ;;  %v4616_v24 = vsub.f32 %v8899_v4, %v4578_v0 }
 0xac2   :  { %v4592_v51 = vmax.f32 %v4590_v56, %v4591_v17  ;;  %v4599_v63 = vmax.f32 %v4597_v2, %v4598_v11  ;;  %v4612_v58 = vrot.slane %v4611_v44, 1  ;;  %v4617_v42 = vsub.f32 %v8903_v39, %v4585_v18 }
 0xac3   :  { %v4606_v40 = vmax.f32 %v4604_v45, %v4605_v59  ;;  %v4622_v36 = vmul.f32 1.442695, %v4614_v61  ;;  %v4624_v21 = vmul.f32 1.442695, %v4615_v25  ;;  %v4626_v12 = vmul.f32 1.442695, %v4616_v24 }
 0xac4   :  { %v4618_v60 = vsub.f32 %v8907_v9, %v4592_v51  ;;  %v4613_v57 = vmax.f32 %v4611_v44, %v4612_v58  ;;  %v4619_v46 = vsub.f32 %v8911_v35, %v4599_v63  ;;  %v4628_v10 = vmul.f32 1.442695, %v4617_v42 }
 0xac5   :  { %v4620_v13 = vsub.f32 %v8915_v48, %v4606_v40  ;;  %5619 = vpow2.f32 %v4622_v36 }
 0xac6   :  { %v4630_v37 = vmul.f32 1.442695, %v4618_v60  ;;  %v4621_v4 = vsub.f32 %v8919_v55, %v4613_v57  ;;  %5621 = vpow2.f32 %v4624_v21  ;;  %v4632_v62 = vmul.f32 1.442695, %v4619_v46 }
 0xac7   :  { %5623 = vpow2.f32 %v4626_v12  ;;  %v4634_v49 = vmul.f32 1.442695, %v4620_v13 }
 0xac8   :  { %5625 = vpow2.f32 %v4628_v10  ;;  %v4636_v39 = vmul.f32 1.442695, %v4621_v4 }
 0xac9   :  { %5627 = vpow2.f32 %v4630_v37 }
 0xaca   :  { %5629 = vpow2.f32 %v4632_v62 }
 0xacb   :  { %5631 = vpow2.f32 %v4634_v49 }
 0xacc   :  { %5633 = vpow2.f32 %v4636_v39 }
 0xacf   :  { %v5620_v9 = vpop.eup %5619 }
 0xad0   :  { %v5622_v33 = vpop.eup %5621  ;;  %v8947_v35 = vsel %vm613_vm9, %v5620_v9, 0.0  ;;  %vm10087_vm9 = vmmov %vm10083_vm0 }
 0xad1   :  { %v5624_v48 = vpop.eup %5623  ;;  %v4646_v55 = vsel %vm10084_vm3, %v8947_v35, 0.0  ;;  %v8953_v3 = vsel %vm614_vm7, %v5622_v33, 0.0  ;;  %vm10088_vm7 = vmmov %vm10083_vm0 }
 0xad2   :  { %v5626_v30 = vpop.eup %5625  ;;  %v4647_v53 = vrot.slane %v4646_v55, 4  ;;  %v4653_v20 = vsel %vm10085_vm8, %v8953_v3, 0.0  ;;  %v8959_v14 = vsel %vm10086_vm1, %v5624_v48, 0.0 }
 0xad3   :  { %v5628_v50 = vpop.eup %5627  ;;  %v4654_v54 = vrot.slane %v4653_v20, 4  ;;  %v4660_v34 = vsel %vm10087_vm9, %v8959_v14, 0.0  ;;  %v8965_v41 = vsel %vm616_vm14, %v5626_v30, 0.0  ;;  %vm10092_vm14 = vmmov %vm10083_vm0 }
 0xad4   :  { %v5630_v43 = vpop.eup %5629  ;;  %v4648_v6 = vadd.f32 %v4647_v53, %v4646_v55  ;;  %v4661_v19 = vrot.slane %v4660_v34, 4  ;;  %v4667_v27 = vsel %vm10088_vm7, %v8965_v41, 0.0  ;;  %v8971_v8 = vsel %vm10089_vm4, %v5628_v50, 0.0  ;;  %vm10109_vm0 = vmmov %vm10107_vm11 }
 0xad5   :  { %v5632_v28 = vpop.eup %5631  ;;  %v4655_v26 = vadd.f32 %v4654_v54, %v4653_v20  ;;  %v4668_v52 = vrot.slane %v4667_v27, 4  ;;  %v4674_v31 = vsel %vm10090_vm2, %v8971_v8, 0.0  ;;  %v8977_v23 = vsel %vm10091_vm13, %v5630_v43, 0.0  ;;  %v10097_v54 = vld [vmem:[#allocation15_spill] sm:$0xff]  ;;  %v10098_v43 = vld [vmem:[#allocation17_spill] sm:$0xff]  ;;  %vm10110_vm3 = vmmov %vm10109_vm0 }
 0xad6   :  { %v4649_v22 = vrot.slane %v4648_v6, 2  ;;  %v4662_v38 = vadd.f32 %v4661_v19, %v4660_v34  ;;  %v4675_v56 = vrot.slane %v4674_v31, 4  ;;  %v4681_v15 = vsel %vm10092_vm14, %v8977_v23, 0.0  ;;  %v5634_v2 = vpop.eup %5633  ;;  %vm10111_vm8 = vmmov %vm10109_vm0 }
 0xad7   :  { %v4656_v32 = vrot.slane %v4655_v26, 2  ;;  %v4669_v45 = vadd.f32 %v4668_v52, %v4667_v27  ;;  %v4682_v29 = vrot.slane %v4681_v15, 4  ;;  %v8983_v7 = vsel %vm10093_vm15, %v5632_v28, 0.0  ;;  %vm10112_vm1 = vmmov %vm10109_vm0 }
 0xad8   :  { %v4650_v16 = vadd.f32 %v4649_v22, %v4648_v6  ;;  %v4663_v0 = vrot.slane %v4662_v38, 2  ;;  %v4676_v17 = vadd.f32 %v4675_v56, %v4674_v31  ;;  %v4688_v5 = vsel %vm10094_vm5, %v8983_v7, 0.0  ;;  %vm10113_vm9 = vmmov %vm10109_vm0 }
 0xad9   :  { %v4657_v18 = vadd.f32 %v4656_v32, %v4655_v26  ;;  %v4670_v11 = vrot.slane %v4669_v45, 2  ;;  %v4683_v59 = vadd.f32 %v4682_v29, %v4681_v15  ;;  %v4689_v44 = vrot.slane %v4688_v5, 4  ;;  %vm10114_vm7 = vmmov %vm10109_vm0 }
 0xada   :  { %v4651_v51 = vrot.slane %v4650_v16, 1  ;;  %v4664_v61 = vadd.f32 %v4663_v0, %v4662_v38  ;;  %v4677_v25 = vrot.slane %v4676_v17, 2  ;;  %v8989_v24 = vsel %vm10095_vm6, %v5634_v2, 0.0  ;;  %vm10115_vm4 = vmmov %vm10109_vm0 }
 0xadb   :  { %v4658_v47 = vrot.slane %v4657_v18, 1  ;;  %v4671_v63 = vadd.f32 %v4670_v11, %v4669_v45  ;;  %v4695_v42 = vsel %vm10096_vm10, %v8989_v24, 0.0  ;;  %v4684_v21 = vrot.slane %v4683_v59, 2  ;;  %vm10116_vm2 = vmmov %vm10109_vm0 }
 0xadc   :  { %v4652_v40 = vadd.f32 %v4651_v51, %v4650_v16  ;;  %v4665_v58 = vrot.slane %v4664_v61, 1  ;;  %v4678_v36 = vadd.f32 %v4677_v25, %v4676_v17  ;;  %v4690_v12 = vadd.f32 %v4689_v44, %v4688_v5  ;;  %vm10117_vm13 = vmmov %vm10109_vm0 }
 0xadd   :  { %v4659_v60 = vadd.f32 %v4658_v47, %v4657_v18  ;;  %v4672_v46 = vrot.slane %v4671_v63, 1  ;;  %v4696_v13 = vrot.slane %v4695_v42, 4  ;;  %v4685_v10 = vadd.f32 %v4684_v21, %v4683_v59  ;;  %vm10118_vm14 = vmmov %vm10109_vm0 }
 0xade   :  { %5635 = vrcp.f32 %v4652_v40  ;;  %v4666_v57 = vadd.f32 %v4665_v58, %v4664_v61  ;;  %v4691_v1 = vrot.slane %v4690_v12, 2  ;;  %v4679_v4 = vrot.slane %v4678_v36, 1  ;;  %v10099_v61 = vld [vmem:[#allocation16_spill] sm:$0xff]  ;;  %vm10119_vm15 = vmmov %vm10109_vm0 }
 0xadf   :  { %5637 = vrcp.f32 %v4659_v60  ;;  %v4673_v37 = vadd.f32 %v4672_v46, %v4671_v63  ;;  %v4697_v62 = vadd.f32 %v4696_v13, %v4695_v42  ;;  %v4686_v49 = vrot.slane %v4685_v10, 1  ;;  %vm10120_vm5 = vmmov %vm10109_vm0 }
 0xae0   :  { %5639 = vrcp.f32 %v4666_v57  ;;  %v4680_v39 = vadd.f32 %v4679_v4, %v4678_v36  ;;  %v4692_v9 = vadd.f32 %v4691_v1, %v4690_v12  ;;  %v10100_v36 = vld [vmem:[#allocation19_spill] sm:$0xff]  ;;  %v10101_v4 = vld [vmem:[#allocation18_spill] sm:$0xff]  ;;  %vm10121_vm6 = vmmov %vm10109_vm0 }
 0xae1   :  { %5641 = vrcp.f32 %v4673_v37  ;;  %v4698_v33 = vrot.slane %v4697_v62, 2  ;;  %v4687_v53 = vadd.f32 %v4686_v49, %v4685_v10  ;;  %vm10122_vm10 = vmmov %vm10109_vm0 }
 0xae2   :  { %5643 = vrcp.f32 %v4680_v39  ;;  %v4693_v20 = vrot.slane %v4692_v9, 1 }
 0xae3   :  { %v4699_v50 = vadd.f32 %v4698_v33, %v4697_v62  ;;  %5645 = vrcp.f32 %v4687_v53 }
 0xae4   :  { %v4694_v28 = vadd.f32 %v4693_v20, %v4692_v9  ;;  %v10102_v20 = vld [vmem:[#allocation21_spill] sm:$0xff] }
 0xae6   :  { %5647 = vrcp.f32 %v4694_v28 }
 0xae8   :  { %v5636_v48 = vpop.eup %5635 }
 0xae9   :  { %v5638_v55 = vpop.eup %5637  ;;  %v8994_v30 = vmul.f32 %v5636_v48, %v8947_v35  ;;  %v4700_v35 = vrot.slane %v4699_v50, 1 }
 0xaea   :  { %v9001_v19 = vmul.f32 %v5638_v55, %v8953_v3  ;;  %v5640_v27 = vpop.eup %5639 }
 0xaeb   :  { %v4728_v34 = vrot.slane %v8994_v30, %v10097_v54  ;;  %v4721_v6 = vrot.slane %v8994_v30, %v10098_v43  ;;  %v9008_v31 = vmul.f32 %v5640_v27, %v8959_v14  ;;  %v5642_v22 = vpop.eup %5641  ;;  %v4701_v3 = vadd.f32 %v4700_v35, %v4699_v50 }
 0xaec   :  { %v4777_v26 = vrot.slane %v9001_v19, %v10098_v43  ;;  %v4784_v52 = vrot.slane %v9001_v19, %v10097_v54  ;;  %v9015_v15 = vmul.f32 %v5642_v22, %v8965_v41  ;;  %v5644_v2 = vpop.eup %5643  ;;  %v4735_v25 = vrot.slane %v8994_v30, %v10099_v61 }
 0xaed   :  { %4730 = vbcast.lane.b32.xlu1 %v4728_v34, 256  ;;  %4723 = vbcast.lane.b32.xlu0 %v4721_v6, 256  ;;  %v4833_v38 = vrot.slane %v9008_v31, %v10098_v43  ;;  %v4840_v56 = vrot.slane %v9008_v31, %v10097_v54  ;;  %5649 = vrcp.f32 %v4701_v3  ;;  %v9022_v45 = vmul.f32 %v5644_v2, %v8971_v8  ;;  %v5646_v29 = vpop.eup %5645 }
 0xaee   :  { %v4889_v14 = vrot.slane %v9015_v15, %v10098_v43  ;;  %v4896_v32 = vrot.slane %v9015_v15, %v10097_v54  ;;  %v9029_v0 = vmul.f32 %v5646_v29, %v8977_v23  ;;  %v4791_v47 = vrot.slane %v9001_v19, %v10099_v61  ;;  %v10104_v29 = vld [vmem:[#allocation32_spill] sm:$0xff] }
 0xaef   :  { %v4945_v41 = vrot.slane %v9022_v45, %v10098_v43  ;;  %v4952_v16 = vrot.slane %v9022_v45, %v10097_v54  ;;  %v4903_v63 = vrot.slane %v9015_v15, %v10099_v61  ;;  %v4959_v40 = vrot.slane %v9022_v45, %v10099_v61 }
 0xaf0   :  { %v5648_v17 = vpop.eup %5647  ;;  %v5001_v5 = vrot.slane %v9029_v0, %v10098_v43  ;;  %v5008_v8 = vrot.slane %v9029_v0, %v10097_v54  ;;  %v5015_v58 = vrot.slane %v9029_v0, %v10099_v61  ;;  %v4742_v21 = vrot.slane %v8994_v30, %v10100_v36 }
 0xaf1   :  { %4779 = vbcast.lane.b32.xlu1 %v4777_v26, 256  ;;  %4786 = vbcast.lane.b32.xlu0 %v4784_v52, 256  ;;  %v9036_v18 = vmul.f32 %v5648_v17, %v8983_v7  ;;  %v4798_v12 = vrot.slane %v9001_v19, %v10100_v36  ;;  %v4854_v57 = vrot.slane %v9008_v31, %v10100_v36  ;;  %v10103_v26 = vld [vmem:[#allocation20_spill] sm:$0xff] }
 0xaf2   :  { %v4910_v46 = vrot.slane %v9015_v15, %v10100_v36  ;;  %v4966_v13 = vrot.slane %v9022_v45, %v10100_v36  ;;  %v5022_v10 = vrot.slane %v9029_v0, %v10100_v36  ;;  %v4749_v62 = vrot.slane %v8994_v30, %v10101_v4 }
 0xaf3   :  { %v5057_v59 = vrot.slane %v9036_v18, %v10098_v43  ;;  %v5064_v23 = vrot.slane %v9036_v18, %v10097_v54  ;;  %v5071_v42 = vrot.slane %v9036_v18, %v10099_v61  ;;  %v5078_v1 = vrot.slane %v9036_v18, %v10100_v36 }
 0xaf4   :  { %v4805_v49 = vrot.slane %v9001_v19, %v10101_v4  ;;  %v4861_v39 = vrot.slane %v9008_v31, %v10101_v4  ;;  %v4917_v9 = vrot.slane %v9015_v15, %v10101_v4  ;;  %v4973_v33 = vrot.slane %v9022_v45, %v10101_v4 }
 0xaf5   :  { %4835 = vbcast.lane.b32.xlu1 %v4833_v38, 256  ;;  %4842 = vbcast.lane.b32.xlu0 %v4840_v56, 256  ;;  %v5029_v48 = vrot.slane %v9029_v0, %v10101_v4  ;;  %v5085_v55 = vrot.slane %v9036_v18, %v10101_v4  ;;  %v4756_v50 = vrot.slane %v8994_v30, %v10102_v20 }
 0xaf6   :  { %v4868_v34 = vrot.slane %v9008_v31, %v10102_v20  ;;  %v4980_v6 = vrot.slane %v9022_v45, %v10102_v20  ;;  %v5036_v27 = vrot.slane %v9029_v0, %v10102_v20  ;;  %v5092_v28 = vrot.slane %v9036_v18, %v10102_v20 }
 0xaf7   :  { %v5650_v11 = vpop.eup %5649  ;;  %v4763_v52 = vrot.slane %v8994_v30, %v10103_v26  ;;  %v4819_v22 = vrot.slane %v9001_v19, %v10103_v26  ;;  %v4875_v3 = vrot.slane %v9008_v31, %v10103_v26  ;;  %v4931_v38 = vrot.slane %v9015_v15, %v10103_v26 }
 0xaf8   :  { %v9043_v44 = vmul.f32 %v5650_v11, %v8989_v24  ;;  %v4847_v24 = vrot.slane %v9008_v31, %v10099_v61  ;;  %v4987_v56 = vrot.slane %v9022_v45, %v10103_v26  ;;  %v5043_v2 = vrot.slane %v9029_v0, %v10103_v26 }
 0xaf9   :  { %4891 = vbcast.lane.b32.xlu1 %v4889_v14, 256  ;;  %4898 = vbcast.lane.b32.xlu0 %v4896_v32, 256  ;;  %v5099_v14 = vrot.slane %v9036_v18, %v10103_v26  ;;  %v4938_v11 = vrot.slane %v9015_v15, %v10104_v29 }
 0xafa   :  { %v5113_v51 = vrot.slane %v9043_v44, %v10098_v43  ;;  %v5120_v7 = vrot.slane %v9043_v44, %v10097_v54  ;;  %v5127_v60 = vrot.slane %v9043_v44, %v10099_v61  ;;  %v5134_v37 = vrot.slane %v9043_v44, %v10100_v36 }
 0xafb   :  { %v5141_v53 = vrot.slane %v9043_v44, %v10101_v4  ;;  %v4812_v54 = vrot.slane %v9001_v19, %v10102_v20  ;;  %v4924_v43 = vrot.slane %v9015_v15, %v10102_v20  ;;  %v5148_v35 = vrot.slane %v9043_v44, %v10102_v20 }
 0xafc   :  { %v5155_v32 = vrot.slane %v9043_v44, %v10103_v26  ;;  %v5050_v15 = vrot.slane %v9029_v0, %v10104_v29 }
 0xafd   :  { %4947 = vbcast.lane.b32.xlu1 %v4945_v41, 256  ;;  %4954 = vbcast.lane.b32.xlu0 %v4952_v16, 256  ;;  %v4770_v41 = vrot.slane %v8994_v30, %v10104_v29  ;;  %v4826_v16 = vrot.slane %v9001_v19, %v10104_v29 }
 0xb01   :  { %5003 = vbcast.lane.b32.xlu1 %v5001_v5, 256  ;;  %5010 = vbcast.lane.b32.xlu0 %v5008_v8, 256  ;;  %v4882_v8 = vrot.slane %v9008_v31, %v10104_v29  ;;  %v4994_v31 = vrot.slane %v9022_v45, %v10104_v29  ;;  %v5162_v45 = vrot.slane %v9043_v44, %v10104_v29 }
 0xb05   :  { %5059 = vbcast.lane.b32.xlu1 %v5057_v59, 256  ;;  %5066 = vbcast.lane.b32.xlu0 %v5064_v23, 256  ;;  %v10105_v59 = vld [vmem:[#allocation26_spill] sm:$0xff] }
 0xb09   :  { %5115 = vbcast.lane.b32.xlu1 %v5113_v51, 256  ;;  %5122 = vbcast.lane.b32.xlu0 %v5120_v7, 256  ;;  %v10106_v51 = vld [vmem:[#allocation40_spill] sm:$0xff] }
 0xb0d   :  { %4737 = vbcast.lane.b32.xlu1 %v4735_v25, 256  ;;  %4793 = vbcast.lane.b32.xlu0 %v4791_v47, 256 }
 0xb11   :  { %4849 = vbcast.lane.b32.xlu1 %v4847_v24, 256  ;;  %4905 = vbcast.lane.b32.xlu0 %v4903_v63, 256 }
 0xb15   :  { %4961 = vbcast.lane.b32.xlu1 %v4959_v40, 256  ;;  %5017 = vbcast.lane.b32.xlu0 %v5015_v58, 256 }
 0xb19   :  { %5073 = vbcast.lane.b32.xlu1 %v5071_v42, 256  ;;  %5129 = vbcast.lane.b32.xlu0 %v5127_v60, 256 }
 0xb1d   :  { %4744 = vbcast.lane.b32.xlu1 %v4742_v21, 256  ;;  %4800 = vbcast.lane.b32.xlu0 %v4798_v12, 256  ;;  %v5106_v21 = vrot.slane %v9036_v18, %v10104_v29 }
 0xb21   :  { %4856 = vbcast.lane.b32.xlu1 %v4854_v57, 256  ;;  %4912 = vbcast.lane.b32.xlu0 %v4910_v46, 256 }
 0xb25   :  { %4968 = vbcast.lane.b32.xlu1 %v4966_v13, 256  ;;  %5024 = vbcast.lane.b32.xlu0 %v5022_v10, 256 }
 0xb29   :  { %5080 = vbcast.lane.b32.xlu1 %v5078_v1, 256  ;;  %5136 = vbcast.lane.b32.xlu0 %v5134_v37, 256 }
 0xb2d   :  { %4751 = vbcast.lane.b32.xlu1 %v4749_v62, 256  ;;  %4807 = vbcast.lane.b32.xlu0 %v4805_v49, 256 }
 0xb31   :  { %4863 = vbcast.lane.b32.xlu1 %v4861_v39, 256  ;;  %4919 = vbcast.lane.b32.xlu0 %v4917_v9, 256 }
 0xb35   :  { %4975 = vbcast.lane.b32.xlu1 %v4973_v33, 256  ;;  %5031 = vbcast.lane.b32.xlu0 %v5029_v48, 256 }
 0xb39   :  { %5087 = vbcast.lane.b32.xlu1 %v5085_v55, 256  ;;  %5143 = vbcast.lane.b32.xlu0 %v5141_v53, 256 }
 0xb3d   :  { %4758 = vbcast.lane.b32.xlu1 %v4756_v50, 256  ;;  %4814 = vbcast.lane.b32.xlu0 %v4812_v54, 256 }
 0xb41   :  { %4870 = vbcast.lane.b32.xlu1 %v4868_v34, 256  ;;  %4926 = vbcast.lane.b32.xlu0 %v4924_v43, 256 }
 0xb45   :  { %4982 = vbcast.lane.b32.xlu1 %v4980_v6, 256  ;;  %5038 = vbcast.lane.b32.xlu0 %v5036_v27, 256 }
 0xb49   :  { %5094 = vbcast.lane.b32.xlu1 %v5092_v28, 256  ;;  %5150 = vbcast.lane.b32.xlu0 %v5148_v35, 256 }
 0xb4d   :  { %4765 = vbcast.lane.b32.xlu1 %v4763_v52, 256  ;;  %4821 = vbcast.lane.b32.xlu0 %v4819_v22, 256 }
 0xb51   :  { %4877 = vbcast.lane.b32.xlu1 %v4875_v3, 256  ;;  %4933 = vbcast.lane.b32.xlu0 %v4931_v38, 256 }
 0xb55   :  { %4989 = vbcast.lane.b32.xlu1 %v4987_v56, 256  ;;  %5045 = vbcast.lane.b32.xlu0 %v5043_v2, 256 }
 0xb59   :  { %5101 = vbcast.lane.b32.xlu1 %v5099_v14, 256  ;;  %5157 = vbcast.lane.b32.xlu0 %v5155_v32, 256 }
 0xb5d   :  { %4772 = vbcast.lane.b32.xlu1 %v4770_v41, 256  ;;  %4828 = vbcast.lane.b32.xlu0 %v4826_v16, 256 }
 0xb5f   :  { %v4731_v17 = vpop.permute.xlu1 %4730  ;;  %v4724_v5 = vpop.permute.xlu0 %4723 }
 0xb60   :  { %v5167_v23 = vmul.f32 %v4731_v17, %v10105_v59  ;;  %v5166_v7 = vmul.f32 %v4724_v5, %v10106_v51 }
 0xb61   :  { %4884 = vbcast.lane.b32.xlu1 %v4882_v8, 256  ;;  %4940 = vbcast.lane.b32.xlu0 %v4938_v11, 256  ;;  %v10123_v8 = vld [vmem:[#allocation24_spill] sm:$0xff] }
 0xb62   :  { %v5231_v30 = vsel %vm10107_vm11, %v5167_v23, 0.0  ;;  %v5230_v19 = vsel %vm10108_vm12, %v5166_v7, 0.0  ;;  %vm10124_vm11 = vmmov %vm10109_vm0 }
 0xb63   :  { %v9141_v61 = vadd.f32 %v5231_v30, %v5230_v19  ;;  %v4780_v25 = vpop.permute.xlu1 %4779  ;;  %v4787_v47 = vpop.permute.xlu0 %4786  ;;  %vm10125_vm12 = vmmov %vm10109_vm0 }
 0xb64   :  { %v5174_v24 = vmul.f32 %v4780_v25, %v10106_v51  ;;  %v5175_v63 = vmul.f32 %v4787_v47, %v10105_v59 }
 0xb65   :  { %4996 = vbcast.lane.b32.xlu1 %v4994_v31, 256  ;;  %5052 = vbcast.lane.b32.xlu0 %v5050_v15, 256 }
 0xb66   :  { %v5245_v40 = vsel %vm10109_vm0, %v5174_v24, 0.0  ;;  %v5246_v58 = vsel %vm10110_vm3, %v5175_v63, 0.0  ;;  %vm10126_vm3 = vmmov %vm10109_vm0 }
 0xb67   :  { %v5247_v42 = vadd.f32 %v5246_v58, %v5245_v40  ;;  %v4836_v60 = vpop.permute.xlu1 %4835  ;;  %v4843_v36 = vpop.permute.xlu0 %4842 }
 0xb68   :  { %v5182_v0 = vmul.f32 %v4836_v60, %v10106_v51  ;;  %v5183_v12 = vmul.f32 %v4843_v36, %v10105_v59 }
 0xb69   :  { %5108 = vbcast.lane.b32.xlu1 %v5106_v21, 256  ;;  %5164 = vbcast.lane.b32.xlu0 %v5162_v45, 256 }
 0xb6a   :  { %v5260_v57 = vsel %vm10111_vm8, %v5182_v0, 0.0  ;;  %v5261_v46 = vsel %vm10112_vm1, %v5183_v12, 0.0  ;;  %vm10127_vm8 = vmmov %vm10109_vm0 }
 0xb6b   :  { %v5262_v13 = vadd.f32 %v5261_v46, %v5260_v57  ;;  %v4892_v10 = vpop.permute.xlu1 %4891  ;;  %v4899_v1 = vpop.permute.xlu0 %4898  ;;  %vm10128_vm1 = vmmov %vm10109_vm0 }
 0xb6c   :  { %v5190_v37 = vmul.f32 %v4892_v10, %v10106_v51  ;;  %v5191_v18 = vmul.f32 %v4899_v1, %v10105_v59 }
 0xb6e   :  { %v5275_v4 = vsel %vm10113_vm9, %v5190_v37, 0.0  ;;  %v5276_v44 = vsel %vm10114_vm7, %v5191_v18, 0.0  ;;  %vm10129_vm9 = vmmov %vm10109_vm0 }
 0xb6f   :  { %v5277_v62 = vadd.f32 %v5276_v44, %v5275_v4  ;;  %v4948_v49 = vpop.permute.xlu1 %4947  ;;  %v4955_v39 = vpop.permute.xlu0 %4954  ;;  %vm10130_vm7 = vmmov %vm10109_vm0 }
 0xb70   :  { %v5198_v9 = vmul.f32 %v4948_v49, %v10106_v51  ;;  %v5199_v33 = vmul.f32 %v4955_v39, %v10105_v59 }
 0xb72   :  { %v5290_v48 = vsel %vm10115_vm4, %v5198_v9, 0.0  ;;  %v5291_v55 = vsel %vm10116_vm2, %v5199_v33, 0.0  ;;  %vm10132_vm4 = vmmov %vm10109_vm0 }
 0xb73   :  { %v5292_v53 = vadd.f32 %v5291_v55, %v5290_v48  ;;  %v5004_v20 = vpop.permute.xlu1 %5003  ;;  %v5011_v50 = vpop.permute.xlu0 %5010  ;;  %vm10133_vm2 = vmmov %vm10109_vm0 }
 0xb74   :  { %v5206_v54 = vmul.f32 %v5004_v20, %v10106_v51  ;;  %v5207_v34 = vmul.f32 %v5011_v50, %v10105_v59 }
 0xb76   :  { %v5305_v43 = vsel %vm10117_vm13, %v5206_v54, 0.0  ;;  %v5306_v6 = vsel %vm10118_vm14, %v5207_v34, 0.0  ;;  %vm10134_vm13 = vmmov %vm10109_vm0 }
 0xb77   :  { %v5307_v27 = vadd.f32 %v5306_v6, %v5305_v43  ;;  %v5060_v28 = vpop.permute.xlu1 %5059  ;;  %v5067_v35 = vpop.permute.xlu0 %5066  ;;  %vm10135_vm14 = vmmov %vm10109_vm0 }
 0xb78   :  { %v5214_v26 = vmul.f32 %v5060_v28, %v10106_v51  ;;  %v5215_v52 = vmul.f32 %v5067_v35, %v10105_v59 }
 0xb7a   :  { %v5320_v22 = vsel %vm10119_vm15, %v5214_v26, 0.0  ;;  %v5321_v3 = vsel %vm10120_vm5, %v5215_v52, 0.0  ;;  %vm10137_vm15 = vmmov %vm10109_vm0 }
 0xb7b   :  { %v5322_v38 = vadd.f32 %v5321_v3, %v5320_v22  ;;  %v5116_v56 = vpop.permute.xlu1 %5115  ;;  %v5123_v2 = vpop.permute.xlu0 %5122  ;;  %vm10138_vm5 = vmmov %vm10109_vm0 }
 0xb7c   :  { %v5222_v14 = vmul.f32 %v5116_v56, %v10106_v51  ;;  %v5223_v32 = vmul.f32 %v5123_v2, %v10105_v59 }
 0xb7e   :  { %v5335_v29 = vsel %vm10121_vm6, %v5222_v14, 0.0  ;;  %v5336_v41 = vsel %vm10122_vm10, %v5223_v32, 0.0  ;;  %vm10139_vm6 = vmmov %vm10109_vm0 }
 0xb7f   :  { %v5337_v16 = vadd.f32 %v5336_v41, %v5335_v29  ;;  %v4738_v17 = vpop.permute.xlu1 %4737  ;;  %v4794_v5 = vpop.permute.xlu0 %4793  ;;  %vm10140_vm10 = vmmov %vm10109_vm0 }
 0xb80   :  { %v5168_v11 = vmul.f32 %v4738_v17, %v10123_v8  ;;  %v5176_v23 = vmul.f32 %v4794_v5, %v10123_v8 }
 0xb82   :  { %v5233_v7 = vsel %vm10124_vm11, %v5168_v11, 0.0  ;;  %v5248_v30 = vsel %vm10125_vm12, %v5176_v23, 0.0  ;;  %vm10141_vm11 = vmmov %vm10109_vm0 }
 0xb83   :  { %v5234_v19 = vadd.f32 %v5233_v7, %v9141_v61  ;;  %v5249_v51 = vadd.f32 %v5248_v30, %v5247_v42  ;;  %v4850_v25 = vpop.permute.xlu1 %4849  ;;  %v4906_v59 = vpop.permute.xlu0 %4905  ;;  %vm10142_vm12 = vmmov %vm10109_vm0 }
 0xb84   :  { %v5184_v47 = vmul.f32 %v4850_v25, %v10123_v8  ;;  %v5192_v31 = vmul.f32 %v4906_v59, %v10123_v8 }
 0xb86   :  { %v5263_v15 = vsel %vm10109_vm0, %v5184_v47, 0.0  ;;  %v5278_v24 = vsel %vm10126_vm3, %v5192_v31, 0.0  ;;  %v10136_v31 = vld [vmem:[#allocation25_spill] sm:$0xff]  ;;  %vm10143_vm3 = vmmov %vm10109_vm0 }
 0xb87   :  { %v5264_v63 = vadd.f32 %v5263_v15, %v5262_v13  ;;  %v5279_v40 = vadd.f32 %v5278_v24, %v5277_v62  ;;  %v4962_v58 = vpop.permute.xlu1 %4961  ;;  %v5018_v60 = vpop.permute.xlu0 %5017  ;;  %v10131_v62 = vld [vmem:[#allocation28_spill] sm:$0xff] }
 0xb88   :  { %v5200_v36 = vmul.f32 %v4962_v58, %v10123_v8  ;;  %v5208_v21 = vmul.f32 %v5018_v60, %v10123_v8 }
 0xb8a   :  { %v5293_v61 = vsel %vm10127_vm8, %v5200_v36, 0.0  ;;  %v5308_v42 = vsel %vm10128_vm1, %v5208_v21, 0.0  ;;  %vm10144_vm8 = vmmov %vm10109_vm0 }
 0xb8b   :  { %v9192_v45 = vadd.f32 %v5293_v61, %v5292_v53  ;;  %v9194_v0 = vadd.f32 %v5308_v42, %v5307_v27  ;;  %v5074_v12 = vpop.permute.xlu1 %5073  ;;  %v5130_v57 = vpop.permute.xlu0 %5129  ;;  %vm10145_vm1 = vmmov %vm10109_vm0 }
 0xb8c   :  { %v5216_v46 = vmul.f32 %v5074_v12, %v10123_v8  ;;  %v5224_v13 = vmul.f32 %v5130_v57, %v10123_v8 }
 0xb8e   :  { %v5323_v10 = vsel %vm10129_vm9, %v5216_v46, 0.0  ;;  %v5338_v1 = vsel %vm10130_vm7, %v5224_v13, 0.0  ;;  %vm10147_vm9 = vmmov %vm10109_vm0 }
 0xb8f   :  { %v9200_v37 = vadd.f32 %v5323_v10, %v5322_v38  ;;  %v9202_v18 = vadd.f32 %v5338_v1, %v5337_v16  ;;  %v4745_v4 = vpop.permute.xlu1 %4744  ;;  %v4801_v44 = vpop.permute.xlu0 %4800  ;;  %vm10148_vm7 = vmmov %vm10109_vm0 }
 0xb90   :  { %v5169_v49 = vmul.f32 %v4745_v4, %v10131_v62  ;;  %v5177_v39 = vmul.f32 %v4801_v44, %v10131_v62 }
 0xb92   :  { %v5235_v9 = vsel %vm10132_vm4, %v5169_v49, 0.0  ;;  %v5250_v33 = vsel %vm10133_vm2, %v5177_v39, 0.0  ;;  %vm10149_vm4 = vmmov %vm10109_vm0 }
 0xb93   :  { %v9208_v48 = vadd.f32 %v5235_v9, %v5234_v19  ;;  %v9210_v55 = vadd.f32 %v5250_v33, %v5249_v51  ;;  %v4857_v53 = vpop.permute.xlu1 %4856  ;;  %v4913_v20 = vpop.permute.xlu0 %4912  ;;  %v10146_v33 = vld [vmem:[#allocation30_spill] sm:$0xff]  ;;  %vm10150_vm2 = vmmov %vm10109_vm0 }
 0xb94   :  { %v5185_v50 = vmul.f32 %v4857_v53, %v10131_v62  ;;  %v5193_v54 = vmul.f32 %v4913_v20, %v10131_v62 }
 0xb96   :  { %v5265_v34 = vsel %vm10134_vm13, %v5185_v50, 0.0  ;;  %v5280_v43 = vsel %vm10135_vm14, %v5193_v54, 0.0  ;;  %vm10151_vm13 = vmmov %vm10109_vm0 }
 0xb97   :  { %v5266_v6 = vadd.f32 %v5265_v34, %v5264_v63  ;;  %v5281_v27 = vadd.f32 %v5280_v43, %v5279_v40  ;;  %v4969_v28 = vpop.permute.xlu1 %4968  ;;  %v5025_v35 = vpop.permute.xlu0 %5024  ;;  %vm10152_vm14 = vmmov %vm10109_vm0 }
 0xb98   :  { %v5201_v51 = vmul.f32 %v4969_v28, %v10131_v62  ;;  %v5209_v25 = vmul.f32 %v5025_v35, %v10131_v62 }
 0xb9a   :  { %v5295_v61 = vsel %vm10137_vm15, %v5201_v51, 0.0  ;;  %v5310_v42 = vsel %vm10138_vm5, %v5209_v25, 0.0  ;;  %vm10155_vm15 = vmmov %vm10109_vm0 }
 0xb9b   :  { %v5081_v26 = vpop.permute.xlu1 %5080  ;;  %v5137_v52 = vpop.permute.xlu0 %5136  ;;  %v5296_v50 = vadd.f32 %v5295_v61, %v9192_v45  ;;  %v5311_v54 = vadd.f32 %v5310_v42, %v9194_v0  ;;  %vm10156_vm5 = vmmov %vm10109_vm0 }
 0xb9c   :  { %v5217_v59 = vmul.f32 %v5081_v26, %v10131_v62  ;;  %v5225_v47 = vmul.f32 %v5137_v52, %v10131_v62 }
 0xb9e   :  { %v5325_v12 = vsel %vm10139_vm6, %v5217_v59, 0.0  ;;  %v5340_v57 = vsel %vm10140_vm10, %v5225_v47, 0.0  ;;  %vm10157_vm6 = vmmov %vm10109_vm0 }
 0xb9f   :  { %v4752_v22 = vpop.permute.xlu1 %4751  ;;  %v4808_v3 = vpop.permute.xlu0 %4807  ;;  %v5326_v28 = vadd.f32 %v5325_v12, %v9200_v37  ;;  %v5341_v35 = vadd.f32 %v5340_v57, %v9202_v18  ;;  %vm10158_vm10 = vmmov %vm10109_vm0 }
 0xba0   :  { %v5170_v15 = vmul.f32 %v4752_v22, %v10136_v31  ;;  %v5178_v24 = vmul.f32 %v4808_v3, %v10136_v31 }
 0xba2   :  { %v5237_v46 = vsel %vm10141_vm11, %v5170_v15, 0.0  ;;  %v5252_v13 = vsel %vm10142_vm12, %v5178_v24, 0.0  ;;  %v10154_v24 = vld [vmem:[#allocation29_spill] sm:$0xff]  ;;  %vm10159_vm11 = vmmov %vm10109_vm0 }
 0xba3   :  { %v4864_v38 = vpop.permute.xlu1 %4863  ;;  %v4920_v56 = vpop.permute.xlu0 %4919  ;;  %v5238_v26 = vadd.f32 %v5237_v46, %v9208_v48  ;;  %v5253_v52 = vadd.f32 %v5252_v13, %v9210_v55  ;;  %vm10160_vm12 = vmmov %vm10109_vm0 }
 0xba4   :  { %v5186_v63 = vmul.f32 %v4864_v38, %v10136_v31  ;;  %v5194_v40 = vmul.f32 %v4920_v56, %v10136_v31 }
 0xba6   :  { %v5267_v10 = vsel %vm10109_vm0, %v5186_v63, 0.0  ;;  %v5282_v1 = vsel %vm10143_vm3, %v5194_v40, 0.0  ;;  %vm10161_vm3 = vmmov %vm10109_vm0 }
 0xba7   :  { %v4976_v2 = vpop.permute.xlu1 %4975  ;;  %v5032_v14 = vpop.permute.xlu0 %5031  ;;  %v5268_v22 = vadd.f32 %v5267_v10, %v5266_v6  ;;  %v5283_v3 = vadd.f32 %v5282_v1, %v5281_v27  ;;  %v10153_v27 = vld [vmem:[#allocation27_spill] sm:$0xff] }
 0xba8   :  { %v5202_v58 = vmul.f32 %v4976_v2, %v10136_v31  ;;  %v5210_v60 = vmul.f32 %v5032_v14, %v10136_v31 }
 0xbaa   :  { %v5297_v4 = vsel %vm10144_vm8, %v5202_v58, 0.0  ;;  %v5312_v44 = vsel %vm10145_vm1, %v5210_v60, 0.0  ;;  %vm10162_vm8 = vmmov %vm10109_vm0 }
 0xbab   :  { %v5088_v32 = vpop.permute.xlu1 %5087  ;;  %v5144_v29 = vpop.permute.xlu0 %5143  ;;  %v5298_v38 = vadd.f32 %v5297_v4, %v5296_v50  ;;  %v5313_v56 = vadd.f32 %v5312_v44, %v5311_v54  ;;  %vm10163_vm1 = vmmov %vm10109_vm0 }
 0xbac   :  { %v5218_v39 = vmul.f32 %v5088_v32, %v10136_v31  ;;  %v5226_v9 = vmul.f32 %v5144_v29, %v10136_v31 }
 0xbae   :  { %v5327_v0 = vsel %vm10147_vm9, %v5218_v39, 0.0  ;;  %v5342_v14 = vsel %vm10148_vm7, %v5226_v9, 0.0  ;;  %vm10164_vm9 = vmmov %vm10109_vm0 }
 0xbaf   :  { %v4759_v41 = vpop.permute.xlu1 %4758  ;;  %v4815_v16 = vpop.permute.xlu0 %4814  ;;  %v5343_v51 = vadd.f32 %v5342_v14, %v5341_v35  ;;  %vm10165_vm7 = vmmov %vm10109_vm0 }
 0xbb0   :  { %v5171_v53 = vmul.f32 %v4759_v41, %v10146_v33  ;;  %v5179_v20 = vmul.f32 %v4815_v16, %v10146_v33 }
 0xbb2   :  { %v5239_v32 = vsel %vm10149_vm4, %v5171_v53, 0.0  ;;  %v5254_v37 = vsel %vm10150_vm2, %v5179_v20, 0.0  ;;  %vm10166_vm4 = vmmov %vm10109_vm0 }
 0xbb3   :  { %v4871_v17 = vpop.permute.xlu1 %4870  ;;  %v4927_v5 = vpop.permute.xlu0 %4926  ;;  %v5240_v15 = vadd.f32 %v5239_v32, %v5238_v26  ;;  %vm10167_vm2 = vmmov %vm10109_vm0 }
 0xbb4   :  { %v5187_v34 = vmul.f32 %v4871_v17, %v10146_v33  ;;  %v5195_v43 = vmul.f32 %v4927_v5, %v10146_v33  ;;  %v5328_v5 = vadd.f32 %v5327_v0, %v5326_v28 }
 0xbb6   :  { %v5269_v18 = vsel %vm10151_vm13, %v5187_v34, 0.0  ;;  %v5284_v48 = vsel %vm10152_vm14, %v5195_v43, 0.0  ;;  %vm10168_vm13 = vmmov %vm10109_vm0 }
 0xbb7   :  { %v4983_v8 = vpop.permute.xlu1 %4982  ;;  %v5039_v11 = vpop.permute.xlu0 %5038  ;;  %v5270_v63 = vadd.f32 %v5269_v18, %v5268_v22  ;;  %vm10169_vm14 = vmmov %vm10109_vm0 }
 0xbb8   :  { %v5203_v55 = vmul.f32 %v4983_v8, %v10146_v33  ;;  %v5211_v6 = vmul.f32 %v5039_v11, %v10146_v33  ;;  %v5255_v8 = vadd.f32 %v5254_v37, %v5253_v52 }
 0xbba   :  { %v5299_v40 = vsel %vm10155_vm15, %v5203_v55, 0.0  ;;  %v5314_v58 = vsel %vm10156_vm5, %v5211_v6, 0.0  ;;  %vm10171_vm15 = vmmov %vm10109_vm0 }
 0xbbb   :  { %v5095_v23 = vpop.permute.xlu1 %5094  ;;  %v5151_v7 = vpop.permute.xlu0 %5150  ;;  %vm10172_vm5 = vmmov %vm10109_vm0 }
 0xbbc   :  { %v5219_v25 = vmul.f32 %v5095_v23, %v10146_v33  ;;  %v5227_v59 = vmul.f32 %v5151_v7, %v10146_v33 }
 0xbbe   :  { %v5344_v61 = vsel %vm10161_vm3, %v5227_v59, 0.0  ;;  %vm10179_vm3 = vcmask 261120  }
 0xbbf   :  { %v4766_v30 = vpop.permute.xlu1 %4765  ;;  %v4822_v19 = vpop.permute.xlu0 %4821  ;;  %v5345_v37 = vadd.f32 %v5344_v61, %v5343_v51 }
 0xbc0   :  { %v5172_v29 = vmul.f32 %v4766_v30, %v10153_v27  ;;  %v5180_v41 = vmul.f32 %v4822_v19, %v10153_v27  ;;  %v5285_v19 = vadd.f32 %v5284_v48, %v5283_v3 }
 0xbc2   :  { %v5241_v60 = vsel %vm10157_vm6, %v5172_v29, 0.0  ;;  %v5256_v23 = vsel %vm10158_vm10, %v5180_v41, 0.0  ;;  %vm10173_vm6 = vmmov %vm10109_vm0 }
 0xbc3   :  { %v4878_v36 = vpop.permute.xlu1 %4877  ;;  %v4934_v21 = vpop.permute.xlu0 %4933  ;;  %v5242_v44 = vadd.f32 %v5241_v60, %v5240_v15  ;;  %v5257_v39 = vadd.f32 %v5256_v23, %v5255_v8  ;;  %vm10174_vm10 = vmmov %vm10109_vm0 }
 0xbc4   :  { %v5188_v16 = vmul.f32 %v4878_v36, %v10153_v27  ;;  %v5196_v17 = vmul.f32 %v4934_v21, %v10153_v27  ;;  %v5329_v21 = vsel %vm10109_vm0, %v5219_v25, 0.0  ;;  %vm10178_vm0 = vcmask 195584  }
 0xbc5   :  { %v5330_v32 = vadd.f32 %v5329_v21, %v5328_v5 }
 0xbc6   :  { %v5271_v7 = vsel %vm10159_vm11, %v5188_v16, 0.0  ;;  %v5286_v36 = vsel %vm10160_vm12, %v5196_v17, 0.0  ;;  %vm10176_vm11 = vcmask 64512   ;;  %vm10177_vm12 = vcmask 130048  }
 0xbc7   :  { %v4990_v62 = vpop.permute.xlu1 %4989  ;;  %v5046_v49 = vpop.permute.xlu0 %5045  ;;  %v5272_v9 = vadd.f32 %v5271_v7, %v5270_v63  ;;  %v5287_v33 = vadd.f32 %v5286_v36, %v5285_v19  ;;  %v10175_v36 = vld [vmem:[#allocation23_spill] sm:$0xff] }
 0xbc8   :  { %v5204_v42 = vmul.f32 %v4990_v62, %v10153_v27  ;;  %v5212_v12 = vmul.f32 %v5046_v49, %v10153_v27 }
 0xbca   :  { %v5301_v26 = vsel %vm10166_vm4, %v5204_v42, 0.0  ;;  %v5316_v52 = vsel %vm10167_vm2, %v5212_v12, 0.0 }
 0xbcb   :  { %v5102_v2 = vpop.permute.xlu1 %5101  ;;  %v5158_v45 = vpop.permute.xlu0 %5157 }
 0xbcc   :  { %v5220_v53 = vmul.f32 %v5102_v2, %v10153_v27  ;;  %v5228_v62 = vmul.f32 %v5158_v45, %v10153_v27  ;;  %v5300_v2 = vadd.f32 %v5299_v40, %v5298_v38  ;;  %v5315_v45 = vadd.f32 %v5314_v58, %v5313_v56  ;;  %v10170_v27 = vld [vmem:[#allocation22_spill] sm:$0xff] }
 0xbce   :  { %v5331_v18 = vsel %vm10168_vm13, %v5220_v53, 0.0  ;;  %v5346_v48 = vsel %vm10169_vm14, %v5228_v62, 0.0  ;;  %v5302_v55 = vadd.f32 %v5301_v26, %v5300_v2  ;;  %v5317_v6 = vadd.f32 %v5316_v52, %v5315_v45 }
 0xbcf   :  { %v4773_v47 = vpop.permute.xlu1 %4772  ;;  %v4829_v31 = vpop.permute.xlu0 %4828  ;;  %v5332_v51 = vadd.f32 %v5331_v18, %v5330_v32  ;;  %v5347_v59 = vadd.f32 %v5346_v48, %v5345_v37 }
 0xbd0   :  { %v5173_v11 = vmul.f32 %v4773_v47, %v10154_v24  ;;  %v5181_v30 = vmul.f32 %v4829_v31, %v10154_v24 }
 0xbd2   :  { %v5243_v13 = vsel %vm10162_vm8, %v5173_v11, 0.0  ;;  %v5258_v10 = vsel %vm10163_vm1, %v5181_v30, 0.0 }
 0xbd3   :  { %v4885_v57 = vpop.permute.xlu1 %4884  ;;  %v4941_v46 = vpop.permute.xlu0 %4940  ;;  %v5244_v50 = vadd.f32 %v5243_v13, %v5242_v44  ;;  %v5259_v54 = vadd.f32 %v5258_v10, %v5257_v39  ;;  %v5469_v39 = vld [vmem:[%s9329_s5 + $0x2] ss:$0 sm:$0xff] }
 0xbd4   :  { %v5189_v1 = vmul.f32 %v4885_v57, %v10154_v24  ;;  %v5197_v4 = vmul.f32 %v4941_v46, %v10154_v24 }
 0xbd6   :  { %v5273_v49 = vsel %vm10164_vm9, %v5189_v1, 0.0  ;;  %v5288_v20 = vsel %vm10165_vm7, %v5197_v4, 0.0 }
 0xbd7   :  { %v5274_v34 = vadd.f32 %v5273_v49, %v5272_v9  ;;  %v5289_v43 = vadd.f32 %v5288_v20, %v5287_v33  ;;  %v4997_v28 = vpop.permute.xlu1 %4996  ;;  %v5053_v35 = vpop.permute.xlu0 %5052  ;;  %v5653_v49 = vld [vmem:[#allocation2] sm:$0xff] }
 0xbd8   :  { %v5205_v22 = vmul.f32 %v4997_v28, %v10154_v24  ;;  %v5213_v3 = vmul.f32 %v5053_v35, %v10154_v24 }
 0xbd9   :  { %v5350_v0 = vcombine.low %v5244_v50, %v5274_v34  ;;  %v5358_v14 = vcombine.low %v5259_v54, %v5289_v43 }
 0xbda   :  { %v5303_v25 = vsel %vm10171_vm15, %v5205_v22, 0.0  ;;  %v5318_v38 = vsel %vm10172_vm5, %v5213_v3, 0.0 }
 0xbdb   :  { %v5357_v29 = vrot.slane %v5350_v0, %v10170_v27  ;;  %v5365_v41 = vrot.slane %v5358_v14, %v10170_v27  ;;  %v5109_v16 = vpop.permute.xlu1 %5108  ;;  %v5165_v17 = vpop.permute.xlu0 %5164  ;;  %v5304_v11 = vadd.f32 %v5303_v25, %v5302_v55  ;;  %v5319_v30 = vadd.f32 %v5318_v38, %v5317_v6 }
 0xbdc   :  { %v5221_v56 = vmul.f32 %v5109_v16, %v10154_v24  ;;  %v5229_v5 = vmul.f32 %v5165_v17, %v10154_v24 }
 0xbdd   :  { %v5383_v47 = vcombine.high %v5357_v29, %v5365_v41  ;;  %v5382_v31 = vcombine.low %v5357_v29, %v5365_v41 }
 0xbde   :  { %v5333_v15 = vsel %vm10173_vm6, %v5221_v56, 0.0  ;;  %v5348_v8 = vsel %vm10174_vm10, %v5229_v5, 0.0 }
 0xbdf   :  { %v5334_v63 = vadd.f32 %v5333_v15, %v5332_v51  ;;  %v5349_v19 = vadd.f32 %v5348_v8, %v5347_v59  ;;  %v5397_v21 = vrot.slane %v5383_v47, %v10175_v36  ;;  %v5390_v42 = vrot.slane %v5382_v31, %v10175_v36 }
 0xbe1   :  { %v5366_v40 = vcombine.low %v5304_v11, %v5334_v63  ;;  %v5374_v58 = vcombine.low %v5319_v30, %v5349_v19 }
 0xbe3   :  { %v5373_v60 = vrot.slane %v5366_v40, %v10170_v27  ;;  %v5381_v23 = vrot.slane %v5374_v58, %v10170_v27 }
 0xbe5   :  { %v5399_v7 = vcombine.high %v5373_v60, %v5381_v23  ;;  %v5398_v24 = vcombine.low %v5373_v60, %v5381_v23 }
 0xbe7   :  { %v5413_v61 = vrot.slane %v5399_v7, %v10175_v36  ;;  %v5406_v12 = vrot.slane %v5398_v24, %v10175_v36 }
 0xbe9   :  { %v5416_v57 = vcombine.low %v5397_v21, %v5413_v61  ;;  %v5415_v46 = vcombine.high %v5390_v42, %v5406_v12  ;;  %v5417_v13 = vcombine.high %v5397_v21, %v5413_v61  ;;  %v5414_v10 = vcombine.low %v5390_v42, %v5406_v12 }
 0xbeb   :  { %5423 = vrot.lane.b32.xlu0 %v5416_v57, %s5788_s26  ;;  %5419 = vrot.lane.b32.xlu1 %v5415_v46, %s5776_s24  ;;  %s5742_s24 = scalar_lea.vmem %s5450_s13, 128 }
 0xbec   :  { %p5743_p4 = scmp.ne.s32.totalorder %s5450_s13, %s5742_s24  ;;  %p5748_p6 = scmp.lt.s32.totalorder %s5742_s24, %s5742_s24 }
 0xbee   :  { %p5749_p7 = por %p5748_p6, %p5747_p5 }
 0xbef   :  { %5427 = vrot.lane.b32.xlu1 %v5417_v13, %s5789_s27 }
 0xbf0   :  { %p5750_p8 = pnand %p5749_p7, %p5743_p4 }
 0xc5d   :  { %v5420_v1 = vpop.permute.xlu1 %5419  ;;  %v5424_v4 = vpop.permute.xlu0 %5423 }
 0xc5e   :  { %v5430_v44 = vsel %vm10176_vm11, %v5414_v10, %v5420_v1 }
 0xc5f   :  { %v5431_v33 = vsel %vm10177_vm12, %v5430_v44, %v5424_v4 }
 0xc61   :  { %v5428_v9 = vpop.permute.xlu1 %5427 }
 0xc62   :  { %v5432_v53 = vsel %vm10178_vm0, %v5431_v33, %v5428_v9 }
 0xc63   :  { %v5439_v62 = vadd.f32 %v5469_v39, %v5432_v53 }
 0xc65   :  { %v5440_v20 = vadd.f32 %v5653_v49, %v5439_v62 }
 0xc67   :  { %v5441_v50 = vmax.f32 %v5440_v20, 0.0 }
 0xc69   :  { %5442 = vst.msk [vmem:[#allocation10] sm:$0xff] %vm10179_vm3, %v5441_v50 }
 0xc6a   :  { %5753 = shalt.err (!%p5750_p8)
}
 0xc6b   :  { %s5754_s15 = scalar_lea.hbm %s9330_s6, 128 }
 0xc6c   :  { %p5755_p9 = scmp.ne.s32.totalorder %s9330_s6, %s5754_s15  ;;  %p5758_p10 = scmp.lt.u32.totalorder %s5754_s15, %s9330_s6 }
 0xc6e   :  { %p5760_p11 = pnand %p5758_p10, %p5755_p9 }
 0xc70   :  { %5763 = shalt.err (!%p5760_p11)
}
 0xc71   :  { %5452 = dma.vmem_to_hbm [thread:$0]  %s5450_s13, 128, %s9330_s6, [#allocation4]  }
 0xc72   :  { %5770 = dma.done.wait [#allocation4], 128  }
 0xc73   :  { %5771 = vsyncadd [#allocation4], 4294967168 }
 0xc74   :  { %5456 = vsyncpa [#allocation3], 1 }
 0xc75   :  { %5457 = vsyncpa [#allocation6], 1 }
 0xc76   :  { %5458 = vsyncpa [#allocation9], 1 }
 0xc77   :  { %5459 = vsyncpa [#allocation4], 1 }

</bundles_post_ra>
